<compile_context>
chip_gen: v5e
topology: v5e:2x2
jax: 0.10.0
libtpu: 0.0.40
codegen_flags: <defaults>
</compile_context>

<pallas_src>
import jax
import jax.numpy as jnp
from jax.experimental import pallas as pl
from jax.experimental.pallas import tpu as pltpu


def _ffn_kernel(x_ref, w1_ref, b1_ref, w2_ref, b2_ref, gamma_ref, beta_ref,
                o_ref, acc_ref):
    """grid = (row_tile i ["parallel"], hidden_tile k ["arbitrary" reduction])."""
    k = pl.program_id(1)

    @pl.when(k == 0)
    def _():
        acc_ref[...] = jnp.zeros_like(acc_ref)

    x = x_ref[...]  # (TM, d_in), native dtype -> bf16 MXU fast path for bf16 models

    # w_1: Conv1d(d_in, d_hid, 1) == per-position linear; f32 accumulation on the MXU.
    h = jnp.dot(x, w1_ref[...], preferred_element_type=jnp.float32)
    h = jnp.maximum(h + b1_ref[...], 0.0)  # bias (pre-cast f32) + ReLU

    # w_2: Conv1d(d_hid, d_in, 1); accumulate partial products over hidden-dim tiles.
    acc_ref[...] += jnp.dot(h.astype(w2_ref.dtype), w2_ref[...],
                            preferred_element_type=jnp.float32)

    @pl.when(k == pl.num_programs(1) - 1)
    def _():
        # TODO(synk): dropout is identity (eval mode); training-mode masking not implemented.
        z = acc_ref[...] + b2_ref[...] + x.astype(jnp.float32)  # bias + residual, f32

        # LayerNorm over features, eps=1e-5 (PyTorch default), biased variance.
        # Two-pass (centered) statistics to avoid catastrophic cancellation.
        inv_n = 1.0 / z.shape[-1]
        mean = jnp.sum(z, axis=-1, keepdims=True) * inv_n
        zc = z - mean
        var = jnp.sum(zc * zc, axis=-1, keepdims=True) * inv_n
        zn = zc * jax.lax.rsqrt(var + 1e-5)
        o_ref[...] = (zn * gamma_ref[...] + beta_ref[...]).astype(o_ref.dtype)


def _round_up(x, m):
    return (x + m - 1) // m * m


def _physical_vmem_bytes():
    try:
        cap = getattr(pltpu.get_tpu_info(), "vmem_capacity_bytes", None)
        if cap:
            return int(cap)
    except Exception:
        pass
    return 64 * 1024 * 1024  # conservative fallback = v7x physical VMEM per TensorCore


def _vmem_need_bytes(tile_rows, tile_hid, d_in, x_bytes, w_bytes):
    io = 2 * 2 * tile_rows * d_in * x_bytes                 # double-buffered x + out tiles
    w = 2 * (d_in * tile_hid + tile_hid * d_in) * w_bytes   # double-buffered W1/W2 blocks
    small = 2 * tile_hid * 4 + 3 * d_in * 4                 # f32 b1 block + b2/gamma/beta
    acc = tile_rows * d_in * 4                               # f32 accumulator scratch
    interm = tile_rows * (tile_hid + 3 * d_in) * 4           # f32 h + LayerNorm temporaries
    return io + w + small + acc + interm


def _choose_tiles(rows, d_in, d_hid, x_bytes, w_bytes, tile_rows, tile_hid, vmem_cap):
    if tile_hid is None:
        tile_hid = d_hid
        if d_hid > 2048:  # stream the hidden dim at production widths
            for cand in (2048, 1536, 1024, 512, 256, 128):
                if d_hid % cand == 0:
                    tile_hid = cand
                    break
    if tile_rows is None:
        # HBM-bound at small d_in: large row tiles amortize the ~0.35us/grid-step
        # overhead. ~2048 is the v6e/v7x sweet spot (~1024 on v5e) -- sweep per chip.
        tile_rows = 2048
        # Keep >= ~8 row tiles on large inputs so both v7x TensorCores get several
        # pipelined steps each under megacore sharding of the "parallel" row axis.
        while tile_rows > 256 and rows > tile_rows and rows < 8 * tile_rows:
            tile_rows //= 2
        tile_rows = max(128, min(tile_rows, _round_up(rows, 128)))
        # Shrink until the working set fits comfortably under physical VMEM.
        while (tile_rows > 256 and
               _vmem_need_bytes(tile_rows, tile_hid, d_in, x_bytes, w_bytes)
               > int(0.7 * vmem_cap)):
            tile_rows //= 2
    return tile_rows, tile_hid


def positionwise_feed_forward(x, w1, b1, w2, b2, gamma, beta, *,
                              tile_rows=None, tile_hid=None, matmul_dtype=None):
    """Fused x @ W1 -> ReLU -> @ W2 -> (+residual) -> LayerNorm (eval-mode dropout).

    x: (B, L, d_in).  w1: (d_in, d_hid) and w2: (d_hid, d_in) are the matmul forms of
    the 1x1 conv weights (conv weight (d_out, d_in, 1) -> squeeze(-1).T).
    d_in / d_hid should be multiples of 128 for lane-dense vregs / unmasked stores.
    matmul_dtype (e.g. jnp.bfloat16) optionally casts x/W1/W2 for the bf16 MXU fast
    path (f32 accumulation kept) -- useful on v5e where f32 operands are multi-pass.
    """
    B, L, d_in = x.shape
    d_hid = w1.shape[1]
    rows = B * L
    out_dtype = x.dtype

    x2d = x.reshape(rows, d_in)
    if matmul_dtype is not None:
        x2d = x2d.astype(matmul_dtype)
        w1 = w1.astype(matmul_dtype)
        w2 = w2.astype(matmul_dtype)

    vmem_cap = _physical_vmem_bytes()
    tile_rows, tile_hid = _choose_tiles(rows, d_in, d_hid, x2d.dtype.itemsize,
                                        w1.dtype.itemsize, tile_rows, tile_hid, vmem_cap)
    assert tile_rows % 8 == 0, "tile_rows must be a multiple of 8 (128 preferred)"
    assert d_hid % tile_hid == 0, "tile_hid must divide d_hid (ragged reduction unsafe)"
    assert tile_hid == d_hid or tile_hid % 128 == 0

    n_row_tiles = pl.cdiv(rows, tile_rows)  # ragged last row tile handled by Pallas
    n_hid_tiles = d_hid // tile_hid

    # Tiny epilogue params: cast to f32 once in the wrapper, not per grid step.
    b1_2d = b1.reshape(1, d_hid).astype(jnp.float32)
    b2_2d = b2.reshape(1, d_in).astype(jnp.float32)
    gamma_2d = gamma.reshape(1, d_in).astype(jnp.float32)
    beta_2d = beta.reshape(1, d_in).astype(jnp.float32)

    def resident(shape):  # constant-index residents: single buffer
        return pl.BlockSpec(shape, lambda i, k: (0, 0), pipeline_mode=pl.Buffered(1))

    need = _vmem_need_bytes(tile_rows, tile_hid, d_in,
                            x2d.dtype.itemsize, w1.dtype.itemsize)
    # Generation-aware scoped VMEM: ~50% headroom over the computed need, at least the
    # 32 MiB default, at most ~80% of physical (64 MiB v7x, 128 MiB v5e/v6e).
    vmem_limit = int(min(max(int(1.5 * need), 32 * 1024 * 1024), 0.8 * vmem_cap))

    flops = 4 * rows * d_in * d_hid + 10 * rows * d_in
    bytes_accessed = (2 * rows * d_in * x2d.dtype.itemsize
                      + n_row_tiles * (2 * d_in * d_hid + d_hid) * w1.dtype.itemsize
                      + 3 * d_in * 4)
    cost = pl.CostEstimate(flops=flops, transcendentals=rows,
                           bytes_accessed=bytes_accessed)

    out = pl.pallas_call(
        _ffn_kernel,
        out_shape=jax.ShapeDtypeStruct((rows, d_in), out_dtype),
        grid_spec=pltpu.PrefetchScalarGridSpec(
            num_scalar_prefetch=0,
            grid=(n_row_tiles, n_hid_tiles),
            in_specs=[
                # x row tile: index depends only on i -> resident across the k loop.
                # (pipeline_mode=pl.Buffered(3) is a candidate sweep once tiles are big.)
                pl.BlockSpec((tile_rows, d_in), lambda i, k: (i, 0)),
                pl.BlockSpec((d_in, tile_hid), lambda i, k: (0, k)),  # W1 column block
                pl.BlockSpec((1, tile_hid), lambda i, k: (0, k)),     # b1 block (f32)
                pl.BlockSpec((tile_hid, d_in), lambda i, k: (k, 0)),  # W2 row block
                resident((1, d_in)),    # b2 (f32)
                resident((1, d_in)),    # gamma (f32)
                resident((1, d_in)),    # beta (f32)
            ],
            out_specs=pl.BlockSpec((tile_rows, d_in), lambda i, k: (i, 0)),
            scratch_shapes=[pltpu.VMEM((tile_rows, d_in), jnp.float32)],
        ),
        compiler_params=pltpu.CompilerParams(
            dimension_semantics=("parallel", "arbitrary"),
            vmem_limit_bytes=vmem_limit,
        ),
        cost_estimate=cost,
    )(x2d, w1, b1_2d, w2, b2_2d, gamma_2d, beta_2d)

    return out.reshape(B, L, d_in)


def _reference(x, w1, b1, w2, b2, gamma, beta):
    """Pure-JAX eval-mode reference (dropout = identity), f32 math."""
    xf = x.astype(jnp.float32)
    h = jnp.maximum(xf @ w1.astype(jnp.float32) + b1.astype(jnp.float32), 0.0)
    y = h @ w2.astype(jnp.float32) + b2.astype(jnp.float32)
    z = y + xf
    mean = jnp.mean(z, axis=-1, keepdims=True)
    var = jnp.mean((z - mean) ** 2, axis=-1, keepdims=True)
    return ((z - mean) / jnp.sqrt(var + 1e-5) * gamma.astype(jnp.float32)
            + beta.astype(jnp.float32))


def _make_params(key, d_in, d_hid):
    k1, kb1, k2, kb2 = jax.random.split(key, 4)
    # Conv1d weight (d_out, d_in, 1) stored in transposed matmul form; synthetic init.
    w1 = jax.random.normal(k1, (d_in, d_hid), jnp.float32) * (d_in ** -0.5)
    b1 = jax.random.normal(kb1, (d_hid,), jnp.float32) * 0.01
    w2 = jax.random.normal(k2, (d_hid, d_in), jnp.float32) * (d_hid ** -0.5)
    b2 = jax.random.normal(kb2, (d_in,), jnp.float32) * 0.01
    gamma = jnp.ones((d_in,), jnp.float32)   # LayerNorm default init
    beta = jnp.zeros((d_in,), jnp.float32)
    return w1, b1, w2, b2, gamma, beta


if __name__ == "__main__":
    key = jax.random.PRNGKey(0)
    kx1, kx2, kp1, kp2 = jax.random.split(key, 4)

    # --- Case 1: f32, rows an exact tile multiple, single hidden tile. ---
    B, L, d_in, d_hid = 2, 256, 128, 256
    x = jax.random.normal(kx1, (B, L, d_in), jnp.float32)
    params = _make_params(kp1, d_in, d_hid)
    out = jax.block_until_ready(positionwise_feed_forward(x, *params))
    ref = _reference(x, *params)
    assert out.shape == (B, L, d_in)
    assert jnp.allclose(out, ref, atol=2e-3, rtol=2e-3), "f32 mismatch vs reference"

    # --- Case 2: ragged row count (no host-side pad/slice) + hidden-dim tiling. ---
    B2, L2, d_in2, d_hid2 = 2, 250, 128, 512   # rows = 500, not a tile multiple
    x2 = jax.random.normal(kx2, (B2, L2, d_in2), jnp.float32)
    params2 = _make_params(kp2, d_in2, d_hid2)
    out2 = jax.block_until_ready(
        positionwise_feed_forward(x2, *params2, tile_rows=256, tile_hid=256))
    ref2 = _reference(x2, *params2)
    assert out2.shape == (B2, L2, d_in2)
    assert jnp.allclose(out2, ref2, atol=2e-3, rtol=2e-3), \
        "ragged/hid-tiled mismatch vs reference"

    # --- Case 3: bf16 end-to-end (native bf16 MXU operands, f32 accumulation). ---
    xb = x.astype(jnp.bfloat16)
    params_b = tuple(p.astype(jnp.bfloat16) for p in params)
    out_b = jax.block_until_ready(positionwise_feed_forward(xb, *params_b))
    ref_b = _reference(xb, *params_b)
    assert out_b.dtype == jnp.bfloat16
    assert jnp.allclose(out_b.astype(jnp.float32), ref_b, atol=1e-1, rtol=5e-2), \
        "bf16 mismatch vs reference"

    # --- Case 4: f32 model run with bf16 MXU operands (v5e-friendly fast path). ---
    out_c = jax.block_until_ready(
        positionwise_feed_forward(x, *params, matmul_dtype=jnp.bfloat16))
    assert out_c.dtype == jnp.float32
    assert jnp.allclose(out_c, ref, atol=1e-1, rtol=5e-2), \
        "matmul_dtype=bf16 mismatch vs reference"

    print("KERNEL_OK")
</pallas_src>

<mosaic_0001>
module attributes {stable_mosaic.version = 11 : i64} {
  func.func @_ffn_kernel(%arg0: i32, %arg1: i32, %arg2: memref<512x128xf32, #tpu.memory_space<vmem>>, %arg3: memref<128x256xf32, #tpu.memory_space<vmem>>, %arg4: memref<1x256xf32, #tpu.memory_space<vmem>>, %arg5: memref<256x128xf32, #tpu.memory_space<vmem>>, %arg6: memref<1x128xf32, #tpu.memory_space<vmem>>, %arg7: memref<1x128xf32, #tpu.memory_space<vmem>>, %arg8: memref<1x128xf32, #tpu.memory_space<vmem>>, %arg9: memref<512x128xf32, #tpu.memory_space<vmem>>, %arg10: memref<512x128xf32, #tpu.memory_space<vmem>>) attributes {dimension_semantics = [#tpu.dimension_semantics<parallel>, #tpu.dimension_semantics<arbitrary>], iteration_bounds = array<i64: 1, 1>, scalar_prefetch = 0 : i64, scratch_operands = 1 : i64, tpu.core_type = #tpu.core_type<tc>, window_params = [{transform_indices = @transform_0, window_bounds = array<i64: 512, 128>}, {transform_indices = @transform_1, window_bounds = array<i64: 128, 256>}, {transform_indices = @transform_2, window_bounds = array<i64: 1, 256>}, {transform_indices = @transform_3, window_bounds = array<i64: 256, 128>}, {pipeline_mode = #tpu.pipeline_mode<synchronous>, transform_indices = @transform_4, window_bounds = array<i64: 1, 128>}, {pipeline_mode = #tpu.pipeline_mode<synchronous>, transform_indices = @transform_5, window_bounds = array<i64: 1, 128>}, {pipeline_mode = #tpu.pipeline_mode<synchronous>, transform_indices = @transform_6, window_bounds = array<i64: 1, 128>}, {transform_indices = @transform_7, window_bounds = array<i64: 512, 128>}]} {
    %c0_i32 = arith.constant 0 : i32
    %0 = arith.cmpi eq, %arg1, %c0_i32 : i32
    %1 = arith.extui %0 : i1 to i32
    %c0_i32_0 = arith.constant 0 : i32
    %2 = arith.cmpi ne, %1, %c0_i32_0 : i32
    scf.if %2 {
      %cst_16 = arith.constant 0.000000e+00 : f32
      %19 = vector.broadcast %cst_16 : f32 to vector<512x128xf32>
      %c0_17 = arith.constant 0 : index
      %c0_18 = arith.constant 0 : index
      %20 = vector.load %arg10[%c0_17, %c0_18] : memref<512x128xf32, #tpu.memory_space<vmem>>, vector<512x128xf32>
      tpu.vector_store %arg10[%c0_17, %c0_18], %19 {strides = array<i32>} : memref<512x128xf32, #tpu.memory_space<vmem>>, vector<512x128xf32>,
    } else {
    }
    %c0 = arith.constant 0 : index
    %c0_1 = arith.constant 0 : index
    %3 = vector.load %arg2[%c0, %c0_1] : memref<512x128xf32, #tpu.memory_space<vmem>>, vector<512x128xf32>
    %c0_2 = arith.constant 0 : index
    %c0_3 = arith.constant 0 : index
    %4 = vector.load %arg3[%c0_2, %c0_3] : memref<128x256xf32, #tpu.memory_space<vmem>>, vector<128x256xf32>
    %cst = arith.constant dense<0.000000e+00> : vector<512x256xf32>
    %5 = tpu.matmul %3, %4, %cst {dimension_numbers = #tpu.dot_dimension_numbers<[1], [0], [0], [1], [0, 0, 1, 1], [], []>} : vector<512x128xf32>, vector<128x256xf32>, vector<512x256xf32> -> vector<512x256xf32>
    %c0_4 = arith.constant 0 : index
    %c0_5 = arith.constant 0 : index
    %6 = vector.load %arg4[%c0_4, %c0_5] : memref<1x256xf32, #tpu.memory_space<vmem>>, vector<1x256xf32>
    %7 = vector.broadcast %6 : vector<1x256xf32> to vector<512x256xf32>
    %8 = arith.addf %5, %7 : vector<512x256xf32>
    %cst_6 = arith.constant 0.000000e+00 : f32
    %9 = vector.broadcast %cst_6 : f32 to vector<512x256xf32>
    %10 = arith.maximumf %8, %9 : vector<512x256xf32>
    %c0_7 = arith.constant 0 : index
    %c0_8 = arith.constant 0 : index
    %11 = vector.load %arg10[%c0_7, %c0_8] : memref<512x128xf32, #tpu.memory_space<vmem>>, vector<512x128xf32>
    %c0_9 = arith.constant 0 : index
    %c0_10 = arith.constant 0 : index
    %12 = vector.load %arg5[%c0_9, %c0_10] : memref<256x128xf32, #tpu.memory_space<vmem>>, vector<256x128xf32>
    %cst_11 = arith.constant dense<0.000000e+00> : vector<512x128xf32>
    %13 = tpu.matmul %10, %12, %cst_11 {dimension_numbers = #tpu.dot_dimension_numbers<[1], [0], [0], [1], [0, 0, 1, 1], [], []>} : vector<512x256xf32>, vector<256x128xf32>, vector<512x128xf32> -> vector<512x128xf32>
    %14 = arith.addf %11, %13 : vector<512x128xf32>
    %c0_12 = arith.constant 0 : index
    %c0_13 = arith.constant 0 : index
    %15 = vector.load %arg10[%c0_12, %c0_13] : memref<512x128xf32, #tpu.memory_space<vmem>>, vector<512x128xf32>
    tpu.vector_store %arg10[%c0_12, %c0_13], %14 {strides = array<i32>} : memref<512x128xf32, #tpu.memory_space<vmem>>, vector<512x128xf32>,
    %c0_i32_14 = arith.constant 0 : i32
    %16 = arith.cmpi eq, %arg1, %c0_i32_14 : i32
    %17 = arith.extui %16 : i1 to i32
    %c0_i32_15 = arith.constant 0 : i32
    %18 = arith.cmpi ne, %17, %c0_i32_15 : i32
    scf.if %18 {
      %c0_16 = arith.constant 0 : index
      %c0_17 = arith.constant 0 : index
      %19 = vector.load %arg10[%c0_16, %c0_17] : memref<512x128xf32, #tpu.memory_space<vmem>>, vector<512x128xf32>
      %c0_18 = arith.constant 0 : index
      %c0_19 = arith.constant 0 : index
      %20 = vector.load %arg6[%c0_18, %c0_19] : memref<1x128xf32, #tpu.memory_space<vmem>>, vector<1x128xf32>
      %21 = vector.broadcast %20 : vector<1x128xf32> to vector<512x128xf32>
      %22 = arith.addf %19, %21 : vector<512x128xf32>
      %23 = arith.addf %22, %3 : vector<512x128xf32>
      %cst_20 = arith.constant dense<0.000000e+00> : vector<512xf32>
      %24 = vector.multi_reduction <add>, %23, %cst_20 [1] : vector<512x128xf32> to vector<512xf32>
      %25 = vector.shape_cast %24 : vector<512xf32> to vector<512x1xf32>
      %cst_21 = arith.constant 7.812500e-03 : f32
      %26 = vector.broadcast %cst_21 : f32 to vector<512x1xf32>
      %27 = arith.mulf %25, %26 : vector<512x1xf32>
      %28 = vector.broadcast %27 : vector<512x1xf32> to vector<512x128xf32>
      %29 = arith.subf %23, %28 : vector<512x128xf32>
      %30 = arith.mulf %29, %29 : vector<512x128xf32>
      %cst_22 = arith.constant dense<0.000000e+00> : vector<512xf32>
      %31 = vector.multi_reduction <add>, %30, %cst_22 [1] : vector<512x128xf32> to vector<512xf32>
      %32 = vector.shape_cast %31 : vector<512xf32> to vector<512x1xf32>
      %cst_23 = arith.constant 7.812500e-03 : f32
      %33 = vector.broadcast %cst_23 : f32 to vector<512x1xf32>
      %34 = arith.mulf %32, %33 : vector<512x1xf32>
      %cst_24 = arith.constant 9.99999974E-6 : f32
      %35 = vector.broadcast %cst_24 : f32 to vector<512x1xf32>
      %36 = arith.addf %34, %35 : vector<512x1xf32>
      %37 = math.rsqrt %36 : vector<512x1xf32>
      %38 = vector.broadcast %37 : vector<512x1xf32> to vector<512x128xf32>
      %39 = arith.mulf %29, %38 : vector<512x128xf32>
      %c0_25 = arith.constant 0 : index
      %c0_26 = arith.constant 0 : index
      %40 = vector.load %arg7[%c0_25, %c0_26] : memref<1x128xf32, #tpu.memory_space<vmem>>, vector<1x128xf32>
      %41 = vector.broadcast %40 : vector<1x128xf32> to vector<512x128xf32>
      %42 = arith.mulf %39, %41 : vector<512x128xf32>
      %c0_27 = arith.constant 0 : index
      %c0_28 = arith.constant 0 : index
      %43 = vector.load %arg8[%c0_27, %c0_28] : memref<1x128xf32, #tpu.memory_space<vmem>>, vector<1x128xf32>
      %44 = vector.broadcast %43 : vector<1x128xf32> to vector<512x128xf32>
      %45 = arith.addf %42, %44 : vector<512x128xf32>
      %c0_29 = arith.constant 0 : index
      %c0_30 = arith.constant 0 : index
      %46 = vector.load %arg9[%c0_29, %c0_30] : memref<512x128xf32, #tpu.memory_space<vmem>>, vector<512x128xf32>
      tpu.vector_store %arg9[%c0_29, %c0_30], %45 {strides = array<i32>} : memref<512x128xf32, #tpu.memory_space<vmem>>, vector<512x128xf32>,
    } else {
    }
    return
  }
  func.func @transform_0(%arg0: i32, %arg1: i32) -> (i32, i32) {
    %c0_i32 = arith.constant 0 : i32
    %c0_i32_0 = arith.constant 0 : i32
    return %arg0, %c0_i32 : i32, i32
  }
  func.func @transform_1(%arg0: i32, %arg1: i32) -> (i32, i32) {
    %c0_i32 = arith.constant 0 : i32
    %c0_i32_0 = arith.constant 0 : i32
    return %c0_i32, %arg1 : i32, i32
  }
  func.func @transform_2(%arg0: i32, %arg1: i32) -> (i32, i32) {
    %c0_i32 = arith.constant 0 : i32
    %c0_i32_0 = arith.constant 0 : i32
    return %c0_i32, %arg1 : i32, i32
  }
  func.func @transform_3(%arg0: i32, %arg1: i32) -> (i32, i32) {
    %c0_i32 = arith.constant 0 : i32
    %c0_i32_0 = arith.constant 0 : i32
    return %arg1, %c0_i32 : i32, i32
  }
  func.func @transform_4(%arg0: i32, %arg1: i32) -> (i32, i32) {
    %c0_i32 = arith.constant 0 : i32
    %c0_i32_0 = arith.constant 0 : i32
    %c0_i32_1 = arith.constant 0 : i32
    return %c0_i32, %c0_i32_0 : i32, i32
  }
  func.func @transform_5(%arg0: i32, %arg1: i32) -> (i32, i32) {
    %c0_i32 = arith.constant 0 : i32
    %c0_i32_0 = arith.constant 0 : i32
    %c0_i32_1 = arith.constant 0 : i32
    return %c0_i32, %c0_i32_0 : i32, i32
  }
  func.func @transform_6(%arg0: i32, %arg1: i32) -> (i32, i32) {
    %c0_i32 = arith.constant 0 : i32
    %c0_i32_0 = arith.constant 0 : i32
    %c0_i32_1 = arith.constant 0 : i32
    return %c0_i32, %c0_i32_0 : i32, i32
  }
  func.func @transform_7(%arg0: i32, %arg1: i32) -> (i32, i32) {
    %c0_i32 = arith.constant 0 : i32
    %c0_i32_0 = arith.constant 0 : i32
    return %arg0, %c0_i32 : i32, i32
  }
}

</mosaic_0001>

<bundles_post_ra>
// kernel: tpu_custom_call.1
= control target key start
LH: loop header
LB: loop body
LE: loop exit
PB: predicated region body
PF: predicated region fallthrough
CT: control target
= control target key end

     0   :  { %12 = vsyncpa [#allocation4], 0  ;;  %s4753_s0 = inlined_call_operand.hbm [shape: f32[512,128], index: 0, kind: input, shape index: {}]   ;;  %s4754_s1 = inlined_call_operand.hbm [shape: f32[128,256], index: 1, kind: input, shape index: {}]   ;;  %s4755_s2 = inlined_call_operand.hbm [shape: f32[1,256], index: 2, kind: input, shape index: {}]   ;;  %s4756_s3 = inlined_call_operand.hbm [shape: f32[256,128], index: 3, kind: input, shape index: {}]   ;;  %s4757_s4 = inlined_call_operand.vmem [shape: f32[1,128], index: 4, kind: input, shape index: {}]   ;;  %s4758_s5 = inlined_call_operand.vmem [shape: f32[1,128], index: 5, kind: input, shape index: {}]   ;;  %s4759_s6 = inlined_call_operand.vmem [shape: f32[1,128], index: 6, kind: input, shape index: {}]   ;;  %s4760_s7 = inlined_call_operand.hbm [shape: f32[512,128], index: 7, kind: output, shape index: {}]  }
   0x1   :  { %13 = vsyncpa [#allocation7], 0 }
   0x2   :  { %14 = vsyncpa [#allocation10], 0  ;;  %s33_s26 = sshll.u32 %s4754_s1, 4  ;;  %s34_s26 = int_to_ptr.hbm [resolvable:$true] %s33_s26 }
   0x3   :  { %15 = vsyncpa [#allocation5], 0  ;;  %s3468_s27 = smov [#allocation6]   ;;  %s20_s8 = sshll.u32 %s4753_s0, 4  ;;  %s21_s8 = int_to_ptr.hbm [resolvable:$true] %s20_s8 }
   0x4   :  { %s35_s28 = sshll.u32 %s3468_s27, 4  ;;  %s3469_s9 = smov 256   ;;  %s36_s28 = int_to_ptr.vmem [resolvable:$true] %s35_s28 }
   0x5   :  { %s3470_s10 = smov 16   ;;  %s3471_s11 = smov [#allocation3]  }
   0x6   :  { %41 = dma.hbm_to_vmem [thread:$0]  %s34_s26, 4096, %s36_s28, [#allocation7], %s3469_s9, %s3469_s9, %s3470_s10  }
   0x7   :  { %s22_s12 = sshll.u32 %s3471_s11, 4  ;;  %s3472_s13 = smov 128   ;;  %s23_s12 = int_to_ptr.vmem [resolvable:$true] %s22_s12 }
   0x8   :  { %s3473_s14 = smov 8   ;;  %s47_s16 = sshll.u32 %s4755_s2, 4  ;;  %s48_s16 = int_to_ptr.hbm [resolvable:$true] %s47_s16 }
   0x9   :  { %28 = dma.hbm_to_vmem [thread:$0]  %s21_s8, 8192, %s23_s12, [#allocation4], %s3472_s13, %s3472_s13, %s3473_s14  }
   0xa   :  { %s3474_s17 = smov [#allocation8]   ;;  %s57_s20 = sshll.u32 %s4756_s3, 4  ;;  %s58_s20 = int_to_ptr.hbm [resolvable:$true] %s57_s20 }
   0xb   :  { %s49_s0 = sshll.u32 %s3474_s17, 4  ;;  %s3475_s21 = smov [#allocation9]   ;;  %s50_s0 = int_to_ptr.vmem [resolvable:$true] %s49_s0 }
   0xc   :  { %52 = dma.hbm_to_vmem [thread:$0]  %s48_s16, 32, %s50_s0, [#allocation7]  }
   0xd   :  { %s59_s22 = sshll.u32 %s3475_s21, 4  ;;  %s60_s22 = int_to_ptr.vmem [resolvable:$true] %s59_s22 }
   0xe   :  { %65 = dma.hbm_to_vmem [thread:$0]  %s58_s20, 4096, %s60_s22, [#allocation10], %s3472_s13, %s3472_s13, %s3473_s14  }
   0xf   :  { %3460 = dma.done.wait [#allocation4], 8192  }
  0x10   :  { %3461 = vsyncadd [#allocation4], 4294959104 }
  0x11   :  { %3462 = dma.done.wait [#allocation7], 4128  }
  0x12   :  { %3463 = vsyncadd [#allocation7], 4294963168 }
  0x13   :  { %3464 = dma.done.wait [#allocation10], 4096  }
  0x14   :  { %3465 = vsyncadd [#allocation10], 4294963200  ;;  %v250_v0 = vld [vmem:[#allocation6 + $0xf0] sm:$0xff]  ;;  %v251_v1 = vld [vmem:[#allocation6 + $0xf8] sm:$0xff]  ;;  %s3131_s2 = sshll.u32 %s4760_s7, 4  ;;  %s3132_s2 = int_to_ptr.hbm [resolvable:$true] %s3131_s2 }
  0x15   :  { %v248_v2 = vld [vmem:[#allocation6 + $0xe0] sm:$0xff]  ;;  %258 = vmatpush.msra.mxu0 %v250_v0  ;;  %467 = vmatpush.msra.mxu1 %v251_v1  ;;  %v249_v3 = vld [vmem:[#allocation6 + $0xe8] sm:$0xff]  ;;  %v246_v4 = vld [vmem:[#allocation6 + $0xd0] sm:$0xff] }
  0x16   :  { %v247_v5 = vld [vmem:[#allocation6 + $0xd8] sm:$0xff]  ;;  %v244_v6 = vld [vmem:[#allocation6 + $0xc0] sm:$0xff]  ;;  %v245_v7 = vld [vmem:[#allocation6 + $0xc8] sm:$0xff] }
  0x17   :  { %259 = vmatpush.msra.mxu0 %v248_v2  ;;  %468 = vmatpush.msra.mxu1 %v249_v3  ;;  %v242_v8 = vld [vmem:[#allocation6 + $0xb0] sm:$0xff]  ;;  %v243_v9 = vld [vmem:[#allocation6 + $0xb8] sm:$0xff]  ;;  %v240_v10 = vld [vmem:[#allocation6 + $0xa0] sm:$0xff] }
  0x18   :  { %v241_v11 = vld [vmem:[#allocation6 + $0xa8] sm:$0xff]  ;;  %v238_v12 = vld [vmem:[#allocation6 + $0x90] sm:$0xff]  ;;  %v239_v13 = vld [vmem:[#allocation6 + $0x98] sm:$0xff] }
  0x19   :  { %260 = vmatpush.msra.mxu0 %v246_v4  ;;  %469 = vmatpush.msra.mxu1 %v247_v5  ;;  %v236_v14 = vld [vmem:[#allocation6 + $0x80] sm:$0xff]  ;;  %v237_v15 = vld [vmem:[#allocation6 + $0x88] sm:$0xff]  ;;  %v234_v16 = vld [vmem:[#allocation6 + $0x70] sm:$0xff] }
  0x1a   :  { %v235_v17 = vld [vmem:[#allocation6 + $0x78] sm:$0xff]  ;;  %v232_v18 = vld [vmem:[#allocation6 + $0x60] sm:$0xff]  ;;  %v233_v19 = vld [vmem:[#allocation6 + $0x68] sm:$0xff] }
  0x1b   :  { %261 = vmatpush.msra.mxu0 %v244_v6  ;;  %470 = vmatpush.msra.mxu1 %v245_v7  ;;  %v230_v20 = vld [vmem:[#allocation6 + $0x50] sm:$0xff]  ;;  %v231_v21 = vld [vmem:[#allocation6 + $0x58] sm:$0xff]  ;;  %v228_v22 = vld [vmem:[#allocation6 + $0x40] sm:$0xff] }
  0x1c   :  { %v229_v23 = vld [vmem:[#allocation6 + $0x48] sm:$0xff]  ;;  %v226_v24 = vld [vmem:[#allocation6 + $0x30] sm:$0xff]  ;;  %v227_v25 = vld [vmem:[#allocation6 + $0x38] sm:$0xff] }
  0x1d   :  { %262 = vmatpush.msra.mxu0 %v242_v8  ;;  %471 = vmatpush.msra.mxu1 %v243_v9  ;;  %v224_v26 = vld [vmem:[#allocation6 + $0x20] sm:$0xff]  ;;  %v225_v27 = vld [vmem:[#allocation6 + $0x28] sm:$0xff]  ;;  %v222_v28 = vld [vmem:[#allocation6 + $0x10] sm:$0xff] }
  0x1e   :  { %v223_v29 = vld [vmem:[#allocation6 + $0x18] sm:$0xff]  ;;  %v220_v30 = vld [vmem:[#allocation6] sm:$0xff]  ;;  %v221_v31 = vld [vmem:[#allocation6 + $0x8] sm:$0xff] }
  0x1f   :  { %263 = vmatpush.msra.mxu0 %v240_v10  ;;  %472 = vmatpush.msra.mxu1 %v241_v11  ;;  %v3535_v32 = vld [vmem:[#allocation3] sm:$0xff]  ;;  %v3539_v33 = vld [vmem:[#allocation3 + $0x8] sm:$0xff]  ;;  %v3543_v34 = vld [vmem:[#allocation3 + $0x10] sm:$0xff] }
  0x20   :  { %v3547_v35 = vld [vmem:[#allocation3 + $0x18] sm:$0xff]  ;;  %v3551_v36 = vld [vmem:[#allocation3 + $0x20] sm:$0xff]  ;;  %v3555_v37 = vld [vmem:[#allocation3 + $0x28] sm:$0xff] }
  0x21   :  { %264 = vmatpush.msra.mxu0 %v238_v12  ;;  %473 = vmatpush.msra.mxu1 %v239_v13  ;;  %v3559_v38 = vld [vmem:[#allocation3 + $0x30] sm:$0xff]  ;;  %v3563_v39 = vld [vmem:[#allocation3 + $0x38] sm:$0xff]  ;;  %v3567_v40 = vld [vmem:[#allocation3 + $0x40] sm:$0xff] }
  0x22   :  { %v883_v41 = vld [vmem:[#allocation9 + $0x78] sm:$0xff]  ;;  %v882_v43 = vld [vmem:[#allocation9 + $0x70] sm:$0xff]  ;;  %v881_v45 = vld [vmem:[#allocation9 + $0x68] sm:$0xff] }
  0x23   :  { %265 = vmatpush.msra.mxu0 %v236_v14  ;;  %474 = vmatpush.msra.mxu1 %v237_v15  ;;  %v899_v42 = vld [vmem:[#allocation9 + $0xf8] sm:$0xff]  ;;  %v898_v44 = vld [vmem:[#allocation9 + $0xf0] sm:$0xff]  ;;  %v897_v46 = vld [vmem:[#allocation9 + $0xe8] sm:$0xff] }
  0x24   :  { %900 = vmatpush.msra.mxu2 %v883_v41  ;;  %1109 = vmatpush.msra.mxu3 %v899_v42  ;;  %v3571_v47 = vld [vmem:[#allocation3 + $0x48] sm:$0xff]  ;;  %v879_v50 = vld [vmem:[#allocation9 + $0x58] sm:$0xff]  ;;  %v878_v52 = vld [vmem:[#allocation9 + $0x50] sm:$0xff] }
  0x25   :  { %266 = vmatpush.msra.mxu0 %v234_v16  ;;  %475 = vmatpush.msra.mxu1 %v235_v17  ;;  %v880_v48 = vld [vmem:[#allocation9 + $0x60] sm:$0xff]  ;;  %v895_v51 = vld [vmem:[#allocation9 + $0xd8] sm:$0xff]  ;;  %v894_v53 = vld [vmem:[#allocation9 + $0xd0] sm:$0xff] }
  0x26   :  { %901 = vmatpush.msra.mxu2 %v882_v43  ;;  %1110 = vmatpush.msra.mxu3 %v898_v44  ;;  %v896_v49 = vld [vmem:[#allocation9 + $0xe0] sm:$0xff]  ;;  %v877_v54 = vld [vmem:[#allocation9 + $0x48] sm:$0xff]  ;;  %v875_v59 = vld [vmem:[#allocation9 + $0x38] sm:$0xff] }
  0x27   :  { %267 = vmatpush.msra.mxu0 %v232_v18  ;;  %476 = vmatpush.msra.mxu1 %v233_v19  ;;  %v893_v55 = vld [vmem:[#allocation9 + $0xc8] sm:$0xff]  ;;  %v876_v57 = vld [vmem:[#allocation9 + $0x40] sm:$0xff]  ;;  %v891_v60 = vld [vmem:[#allocation9 + $0xb8] sm:$0xff] }
  0x28   :  { %902 = vmatpush.msra.mxu2 %v881_v45  ;;  %1111 = vmatpush.msra.mxu3 %v897_v46  ;;  %v3575_v56 = vld [vmem:[#allocation3 + $0x50] sm:$0xff]  ;;  %v892_v58 = vld [vmem:[#allocation9 + $0xc0] sm:$0xff]  ;;  %v3579_v1 = vld [vmem:[#allocation3 + $0x58] sm:$0xff] }
  0x29   :  { %268 = vmatpush.msra.mxu0 %v230_v20  ;;  %477 = vmatpush.msra.mxu1 %v231_v21  ;;  %v874_v61 = vld [vmem:[#allocation9 + $0x30] sm:$0xff]  ;;  %v873_v63 = vld [vmem:[#allocation9 + $0x28] sm:$0xff]  ;;  %v872_v2 = vld [vmem:[#allocation9 + $0x20] sm:$0xff] }
  0x2a   :  { %903 = vmatpush.msra.mxu2 %v880_v48  ;;  %1112 = vmatpush.msra.mxu3 %v896_v49  ;;  %v890_v62 = vld [vmem:[#allocation9 + $0xb0] sm:$0xff]  ;;  %v889_v0 = vld [vmem:[#allocation9 + $0xa8] sm:$0xff]  ;;  %v888_v3 = vld [vmem:[#allocation9 + $0xa0] sm:$0xff] }
  0x2b   :  { %269 = vmatpush.msra.mxu0 %v228_v22  ;;  %478 = vmatpush.msra.mxu1 %v229_v23  ;;  %v871_v4 = vld [vmem:[#allocation9 + $0x18] sm:$0xff]  ;;  %v870_v6 = vld [vmem:[#allocation9 + $0x10] sm:$0xff]  ;;  %v869_v9 = vld [vmem:[#allocation9 + $0x8] sm:$0xff] }
  0x2c   :  { %904 = vmatpush.msra.mxu2 %v879_v50  ;;  %1113 = vmatpush.msra.mxu3 %v895_v51  ;;  %v887_v5 = vld [vmem:[#allocation9 + $0x98] sm:$0xff]  ;;  %v886_v7 = vld [vmem:[#allocation9 + $0x90] sm:$0xff]  ;;  %v885_v10 = vld [vmem:[#allocation9 + $0x88] sm:$0xff] }
  0x2d   :  { %270 = vmatpush.msra.mxu0 %v226_v24  ;;  %479 = vmatpush.msra.mxu1 %v227_v25  ;;  %v3583_v8 = vld [vmem:[#allocation3 + $0x60] sm:$0xff]  ;;  %v3587_v13 = vld [vmem:[#allocation3 + $0x68] sm:$0xff]  ;;  %v3591_v14 = vld [vmem:[#allocation3 + $0x70] sm:$0xff] }
  0x2e   :  { %905 = vmatpush.msra.mxu2 %v878_v52  ;;  %1114 = vmatpush.msra.mxu3 %v894_v53  ;;  %v868_v11 = vld [vmem:[#allocation9] sm:$0xff]  ;;  %v3595_v15 = vld [vmem:[#allocation3 + $0x78] sm:$0xff]  ;;  %v252_v16 = vld [vmem:[#allocation8] sm:$0x3] }
  0x2f   :  { %271 = vmatpush.msra.mxu0 %v224_v26  ;;  %480 = vmatpush.msra.mxu1 %v225_v27  ;;  %v884_v12 = vld [vmem:[#allocation9 + $0x80] sm:$0xff]  ;;  %v3599_v17 = vperm.slane %v252_v16, 0  ;;  %v3601_v18 = vperm.slane %v252_v16, 1  ;;  %v3615_v44 = vld [vmem:[#allocation3 + $0x90] sm:$0xff]  ;;  %v175_v52 = vld [vmem:[#allocation3 + $0x98] sm:$0xff] }
  0x30   :  { %906 = vmatpush.msra.mxu2 %v877_v54  ;;  %1115 = vmatpush.msra.mxu3 %v893_v55  ;;  %v3603_v21 = vld [vmem:[#allocation3 + $0x80] sm:$0xff] }
  0x31   :  { %272 = vmatpush.msra.mxu0 %v222_v28  ;;  %481 = vmatpush.msra.mxu1 %v223_v29  ;;  %v3609_v28 = vld [vmem:[#allocation3 + $0x88] sm:$0xff] }
  0x32   :  { %907 = vmatpush.msra.mxu2 %v876_v57  ;;  %1116 = vmatpush.msra.mxu3 %v892_v58 }
  0x33   :  { %273 = vmatpush.msra.mxu0 %v220_v30  ;;  %482 = vmatpush.msra.mxu1 %v221_v31 }
  0x34   :  { %274 = vmatmul.f32.vlgmr.msra.gmra.mxu0 %v3535_v32  ;;  %483 = vmatmul.f32.vlgmr.msra.gmra.mxu1 %v3535_v32 }
  0x35   :  { %908 = vmatpush.msra.mxu2 %v875_v59  ;;  %1117 = vmatpush.msra.mxu3 %v891_v60  ;;  %v176_v60 = vld [vmem:[#allocation3 + $0xa0] sm:$0xff] }
  0x37   :  { %909 = vmatpush.msra.mxu2 %v874_v61  ;;  %1118 = vmatpush.msra.mxu3 %v890_v62 }
  0x39   :  { %910 = vmatpush.msra.mxu2 %v873_v63  ;;  %1119 = vmatpush.msra.mxu3 %v889_v0 }
  0x3b   :  { %911 = vmatpush.msra.mxu2 %v872_v2  ;;  %1120 = vmatpush.msra.mxu3 %v888_v3 }
  0x3c   :  { %277 = vmatmul.f32.gmra.mxu0 %v3539_v33  ;;  %486 = vmatmul.f32.gmra.mxu1 %v3539_v33 }
  0x3d   :  { %912 = vmatpush.msra.mxu2 %v871_v4  ;;  %1121 = vmatpush.msra.mxu3 %v887_v5  ;;  %v177_v4 = vld [vmem:[#allocation3 + $0xa8] sm:$0xff] }
  0x3f   :  { %913 = vmatpush.msra.mxu2 %v870_v6  ;;  %1122 = vmatpush.msra.mxu3 %v886_v7 }
  0x41   :  { %914 = vmatpush.msra.mxu2 %v869_v9  ;;  %1123 = vmatpush.msra.mxu3 %v885_v10 }
  0x43   :  { %915 = vmatpush.msra.mxu2 %v868_v11  ;;  %1124 = vmatpush.msra.mxu3 %v884_v12  ;;  %v178_v12 = vld [vmem:[#allocation3 + $0xb0] sm:$0xff] }
  0x44   :  { %280 = vmatmul.f32.gmra.mxu0 %v3543_v34  ;;  %489 = vmatmul.f32.gmra.mxu1 %v3543_v34 }
  0x4c   :  { %283 = vmatmul.f32.gmra.mxu0 %v3547_v35  ;;  %492 = vmatmul.f32.gmra.mxu1 %v3547_v35 }
  0x54   :  { %286 = vmatmul.f32.gmra.mxu0 %v3551_v36  ;;  %495 = vmatmul.f32.gmra.mxu1 %v3551_v36 }
  0x5c   :  { %289 = vmatmul.f32.gmra.mxu0 %v3555_v37  ;;  %498 = vmatmul.f32.gmra.mxu1 %v3555_v37 }
  0x64   :  { %292 = vmatmul.f32.gmra.mxu0 %v3559_v38  ;;  %501 = vmatmul.f32.gmra.mxu1 %v3559_v38 }
  0x6c   :  { %295 = vmatmul.f32.gmra.mxu0 %v3563_v39  ;;  %504 = vmatmul.f32.gmra.mxu1 %v3563_v39 }
  0x74   :  { %298 = vmatmul.f32.gmra.mxu0 %v3567_v40  ;;  %507 = vmatmul.f32.gmra.mxu1 %v3567_v40 }
  0x7c   :  { %301 = vmatmul.f32.gmra.mxu0 %v3571_v47  ;;  %510 = vmatmul.f32.gmra.mxu1 %v3571_v47 }
  0x84   :  { %304 = vmatmul.f32.gmra.mxu0 %v3575_v56  ;;  %513 = vmatmul.f32.gmra.mxu1 %v3575_v56 }
  0x8c   :  { %307 = vmatmul.f32.gmra.mxu0 %v3579_v1  ;;  %516 = vmatmul.f32.gmra.mxu1 %v3579_v1 }
  0x94   :  { %310 = vmatmul.f32.gmra.mxu0 %v3583_v8  ;;  %519 = vmatmul.f32.gmra.mxu1 %v3583_v8 }
  0x9c   :  { %313 = vmatmul.f32.gmra.mxu0 %v3587_v13  ;;  %522 = vmatmul.f32.gmra.mxu1 %v3587_v13 }
  0xa4   :  { %316 = vmatmul.f32.gmra.mxu0 %v3591_v14  ;;  %525 = vmatmul.f32.gmra.mxu1 %v3591_v14 }
  0xac   :  { %319 = vmatmul.f32.gmra.mxu0 %v3595_v15  ;;  %528 = vmatmul.f32.gmra.mxu1 %v3595_v15 }
  0xb1   :  { %v275_v19 = vpop.f32.mrf.mxu0  ;;  %v484_v20 = vpop.f32.mrf.mxu1 }
  0xb2   :  { %v276_v22 = vadd.f32 %v275_v19, %v3599_v17  ;;  %v485_v23 = vadd.f32 %v484_v20, %v3601_v18 }
  0xb4   :  { %322 = vmatmul.f32.gmra.mxu0 %v3603_v21  ;;  %531 = vmatmul.f32.gmra.mxu1 %v3603_v21  ;;  %v676_v24 = vmax.f32 %v276_v22, 0.0  ;;  %v677_v25 = vmax.f32 %v485_v23, 0.0 }
  0xb6   :  { %916 = vmatmul.f32.vlgmr.msra.gmra.mxu2 %v676_v24  ;;  %1125 = vmatmul.f32.vlgmr.msra.gmra.mxu3 %v677_v25  ;;  %v179_v25 = vld [vmem:[#allocation3 + $0xb8] sm:$0xff] }
  0xb9   :  { %v278_v26 = vpop.f32.mrf.mxu0  ;;  %v487_v27 = vpop.f32.mrf.mxu1 }
  0xba   :  { %v279_v29 = vadd.f32 %v278_v26, %v3599_v17  ;;  %v488_v30 = vadd.f32 %v487_v27, %v3601_v18 }
  0xbc   :  { %325 = vmatmul.f32.gmra.mxu0 %v3609_v28  ;;  %534 = vmatmul.f32.gmra.mxu1 %v3609_v28  ;;  %v678_v31 = vmax.f32 %v279_v29, 0.0  ;;  %v679_v41 = vmax.f32 %v488_v30, 0.0 }
  0xbe   :  { %919 = vmatmul.f32.gmra.mxu2 %v678_v31  ;;  %1128 = vmatmul.f32.gmra.mxu3 %v679_v41 }
  0xc1   :  { %v281_v42 = vpop.f32.mrf.mxu0  ;;  %v490_v43 = vpop.f32.mrf.mxu1 }
  0xc2   :  { %v282_v45 = vadd.f32 %v281_v42, %v3599_v17  ;;  %v491_v46 = vadd.f32 %v490_v43, %v3601_v18  ;;  %v180_v42 = vld [vmem:[#allocation3 + $0xc0] sm:$0xff] }
  0xc4   :  { %328 = vmatmul.f32.gmra.mxu0 %v3615_v44  ;;  %537 = vmatmul.f32.gmra.mxu1 %v3615_v44  ;;  %v680_v48 = vmax.f32 %v282_v45, 0.0  ;;  %v681_v49 = vmax.f32 %v491_v46, 0.0 }
  0xc6   :  { %922 = vmatmul.f32.gmra.mxu2 %v680_v48  ;;  %1131 = vmatmul.f32.gmra.mxu3 %v681_v49 }
  0xc9   :  { %v284_v50 = vpop.f32.mrf.mxu0  ;;  %v493_v51 = vpop.f32.mrf.mxu1 }
  0xca   :  { %v285_v53 = vadd.f32 %v284_v50, %v3599_v17  ;;  %v494_v54 = vadd.f32 %v493_v51, %v3601_v18  ;;  %v181_v51 = vld [vmem:[#allocation3 + $0xc8] sm:$0xff] }
  0xcc   :  { %331 = vmatmul.f32.gmra.mxu0 %v175_v52  ;;  %540 = vmatmul.f32.gmra.mxu1 %v175_v52  ;;  %v682_v55 = vmax.f32 %v285_v53, 0.0  ;;  %v683_v57 = vmax.f32 %v494_v54, 0.0 }
  0xce   :  { %925 = vmatmul.f32.gmra.mxu2 %v682_v55  ;;  %1134 = vmatmul.f32.gmra.mxu3 %v683_v57 }
  0xd1   :  { %v287_v58 = vpop.f32.mrf.mxu0  ;;  %v496_v59 = vpop.f32.mrf.mxu1 }
  0xd2   :  { %v288_v61 = vadd.f32 %v287_v58, %v3599_v17  ;;  %v497_v62 = vadd.f32 %v496_v59, %v3601_v18  ;;  %v182_v59 = vld [vmem:[#allocation3 + $0xd0] sm:$0xff] }
  0xd4   :  { %334 = vmatmul.f32.gmra.mxu0 %v176_v60  ;;  %543 = vmatmul.f32.gmra.mxu1 %v176_v60  ;;  %v684_v63 = vmax.f32 %v288_v61, 0.0  ;;  %v685_v0 = vmax.f32 %v497_v62, 0.0 }
  0xd6   :  { %928 = vmatmul.f32.gmra.mxu2 %v684_v63  ;;  %1137 = vmatmul.f32.gmra.mxu3 %v685_v0 }
  0xd9   :  { %v290_v2 = vpop.f32.mrf.mxu0  ;;  %v499_v3 = vpop.f32.mrf.mxu1 }
  0xda   :  { %v291_v5 = vadd.f32 %v290_v2, %v3599_v17  ;;  %v500_v6 = vadd.f32 %v499_v3, %v3601_v18  ;;  %v183_v3 = vld [vmem:[#allocation3 + $0xd8] sm:$0xff] }
  0xdc   :  { %337 = vmatmul.f32.gmra.mxu0 %v177_v4  ;;  %546 = vmatmul.f32.gmra.mxu1 %v177_v4  ;;  %v686_v7 = vmax.f32 %v291_v5, 0.0  ;;  %v687_v9 = vmax.f32 %v500_v6, 0.0 }
  0xde   :  { %931 = vmatmul.f32.gmra.mxu2 %v686_v7  ;;  %1140 = vmatmul.f32.gmra.mxu3 %v687_v9 }
  0xe1   :  { %v293_v10 = vpop.f32.mrf.mxu0  ;;  %v502_v11 = vpop.f32.mrf.mxu1 }
  0xe2   :  { %v294_v16 = vadd.f32 %v293_v10, %v3599_v17  ;;  %v503_v19 = vadd.f32 %v502_v11, %v3601_v18  ;;  %v184_v11 = vld [vmem:[#allocation3 + $0xe0] sm:$0xff] }
  0xe4   :  { %340 = vmatmul.f32.gmra.mxu0 %v178_v12  ;;  %549 = vmatmul.f32.gmra.mxu1 %v178_v12  ;;  %v688_v20 = vmax.f32 %v294_v16, 0.0  ;;  %v689_v22 = vmax.f32 %v503_v19, 0.0 }
  0xe6   :  { %934 = vmatmul.f32.gmra.mxu2 %v688_v20  ;;  %1143 = vmatmul.f32.gmra.mxu3 %v689_v22 }
  0xe9   :  { %v296_v23 = vpop.f32.mrf.mxu0  ;;  %v505_v24 = vpop.f32.mrf.mxu1 }
  0xea   :  { %v297_v26 = vadd.f32 %v296_v23, %v3599_v17  ;;  %v506_v27 = vadd.f32 %v505_v24, %v3601_v18  ;;  %v185_v24 = vld [vmem:[#allocation3 + $0xe8] sm:$0xff] }
  0xec   :  { %343 = vmatmul.f32.gmra.mxu0 %v179_v25  ;;  %552 = vmatmul.f32.gmra.mxu1 %v179_v25  ;;  %v690_v29 = vmax.f32 %v297_v26, 0.0  ;;  %v691_v30 = vmax.f32 %v506_v27, 0.0 }
  0xee   :  { %937 = vmatmul.f32.gmra.mxu2 %v690_v29  ;;  %1146 = vmatmul.f32.gmra.mxu3 %v691_v30 }
  0xf1   :  { %v299_v31 = vpop.f32.mrf.mxu0  ;;  %v508_v41 = vpop.f32.mrf.mxu1 }
  0xf2   :  { %v300_v43 = vadd.f32 %v299_v31, %v3599_v17  ;;  %v509_v45 = vadd.f32 %v508_v41, %v3601_v18  ;;  %v186_v41 = vld [vmem:[#allocation3 + $0xf0] sm:$0xff] }
  0xf4   :  { %346 = vmatmul.f32.gmra.mxu0 %v180_v42  ;;  %555 = vmatmul.f32.gmra.mxu1 %v180_v42  ;;  %v692_v46 = vmax.f32 %v300_v43, 0.0  ;;  %v693_v48 = vmax.f32 %v509_v45, 0.0 }
  0xf6   :  { %940 = vmatmul.f32.gmra.mxu2 %v692_v46  ;;  %1149 = vmatmul.f32.gmra.mxu3 %v693_v48 }
  0xf9   :  { %v302_v49 = vpop.f32.mrf.mxu0  ;;  %v511_v50 = vpop.f32.mrf.mxu1 }
  0xfa   :  { %v303_v52 = vadd.f32 %v302_v49, %v3599_v17  ;;  %v512_v53 = vadd.f32 %v511_v50, %v3601_v18  ;;  %v187_v50 = vld [vmem:[#allocation3 + $0xf8] sm:$0xff] }
  0xfc   :  { %349 = vmatmul.f32.gmra.mxu0 %v181_v51  ;;  %558 = vmatmul.f32.gmra.mxu1 %v181_v51  ;;  %v694_v54 = vmax.f32 %v303_v52, 0.0  ;;  %v695_v55 = vmax.f32 %v512_v53, 0.0 }
  0xfe   :  { %943 = vmatmul.f32.gmra.mxu2 %v694_v54  ;;  %1152 = vmatmul.f32.gmra.mxu3 %v695_v55 }
 0x101   :  { %v305_v57 = vpop.f32.mrf.mxu0  ;;  %v514_v58 = vpop.f32.mrf.mxu1 }
 0x102   :  { %v306_v60 = vadd.f32 %v305_v57, %v3599_v17  ;;  %v515_v61 = vadd.f32 %v514_v58, %v3601_v18  ;;  %v188_v58 = vld [vmem:[#allocation3 + $0x100] sm:$0xff] }
 0x104   :  { %352 = vmatmul.f32.gmra.mxu0 %v182_v59  ;;  %561 = vmatmul.f32.gmra.mxu1 %v182_v59  ;;  %v696_v62 = vmax.f32 %v306_v60, 0.0  ;;  %v697_v63 = vmax.f32 %v515_v61, 0.0 }
 0x106   :  { %946 = vmatmul.f32.gmra.mxu2 %v696_v62  ;;  %1155 = vmatmul.f32.gmra.mxu3 %v697_v63 }
 0x109   :  { %v308_v0 = vpop.f32.mrf.mxu0  ;;  %v517_v2 = vpop.f32.mrf.mxu1 }
 0x10a   :  { %v309_v4 = vadd.f32 %v308_v0, %v3599_v17  ;;  %v518_v5 = vadd.f32 %v517_v2, %v3601_v18  ;;  %v189_v2 = vld [vmem:[#allocation3 + $0x108] sm:$0xff] }
 0x10c   :  { %355 = vmatmul.f32.gmra.mxu0 %v183_v3  ;;  %564 = vmatmul.f32.gmra.mxu1 %v183_v3  ;;  %v698_v6 = vmax.f32 %v309_v4, 0.0  ;;  %v699_v7 = vmax.f32 %v518_v5, 0.0  ;;  %v3652_v3 = vld [vmem:[%s4757_s4] ss:$0 sm:$0xff] }
 0x10e   :  { %949 = vmatmul.f32.gmra.mxu2 %v698_v6  ;;  %1158 = vmatmul.f32.gmra.mxu3 %v699_v7 }
 0x111   :  { %v311_v9 = vpop.f32.mrf.mxu0  ;;  %v520_v10 = vpop.f32.mrf.mxu1 }
 0x112   :  { %v312_v12 = vadd.f32 %v311_v9, %v3599_v17  ;;  %v521_v16 = vadd.f32 %v520_v10, %v3601_v18 }
 0x114   :  { %358 = vmatmul.f32.gmra.mxu0 %v184_v11  ;;  %567 = vmatmul.f32.gmra.mxu1 %v184_v11  ;;  %v700_v19 = vmax.f32 %v312_v12, 0.0  ;;  %v701_v20 = vmax.f32 %v521_v16, 0.0 }
 0x116   :  { %952 = vmatmul.f32.gmra.mxu2 %v700_v19  ;;  %1161 = vmatmul.f32.gmra.mxu3 %v701_v20 }
 0x119   :  { %v314_v22 = vpop.f32.mrf.mxu0  ;;  %v523_v23 = vpop.f32.mrf.mxu1 }
 0x11a   :  { %v315_v25 = vadd.f32 %v314_v22, %v3599_v17  ;;  %v524_v26 = vadd.f32 %v523_v23, %v3601_v18  ;;  %v190_v22 = vld [vmem:[#allocation3 + $0x110] sm:$0xff] }
 0x11c   :  { %361 = vmatmul.f32.gmra.mxu0 %v185_v24  ;;  %570 = vmatmul.f32.gmra.mxu1 %v185_v24  ;;  %v702_v27 = vmax.f32 %v315_v25, 0.0  ;;  %v703_v29 = vmax.f32 %v524_v26, 0.0 }
 0x11e   :  { %955 = vmatmul.f32.gmra.mxu2 %v702_v27  ;;  %1164 = vmatmul.f32.gmra.mxu3 %v703_v29 }
 0x121   :  { %v317_v30 = vpop.f32.mrf.mxu0  ;;  %v526_v31 = vpop.f32.mrf.mxu1 }
 0x122   :  { %v318_v42 = vadd.f32 %v317_v30, %v3599_v17  ;;  %v527_v43 = vadd.f32 %v526_v31, %v3601_v18 }
 0x124   :  { %364 = vmatmul.f32.gmra.mxu0 %v186_v41  ;;  %573 = vmatmul.f32.gmra.mxu1 %v186_v41  ;;  %v704_v45 = vmax.f32 %v318_v42, 0.0  ;;  %v705_v46 = vmax.f32 %v527_v43, 0.0  ;;  %v191_v43 = vld [vmem:[#allocation3 + $0x118] sm:$0xff] }
 0x126   :  { %958 = vmatmul.f32.gmra.mxu2 %v704_v45  ;;  %1167 = vmatmul.f32.gmra.mxu3 %v705_v46 }
 0x129   :  { %v320_v48 = vpop.f32.mrf.mxu0  ;;  %v529_v49 = vpop.f32.mrf.mxu1 }
 0x12a   :  { %v321_v51 = vadd.f32 %v320_v48, %v3599_v17  ;;  %v530_v52 = vadd.f32 %v529_v49, %v3601_v18 }
 0x12c   :  { %367 = vmatmul.f32.gmra.mxu0 %v187_v50  ;;  %576 = vmatmul.f32.gmra.mxu1 %v187_v50  ;;  %v706_v53 = vmax.f32 %v321_v51, 0.0  ;;  %v707_v54 = vmax.f32 %v530_v52, 0.0 }
 0x12e   :  { %961 = vmatmul.f32.gmra.mxu2 %v706_v53  ;;  %1170 = vmatmul.f32.gmra.mxu3 %v707_v54 }
 0x131   :  { %v323_v55 = vpop.f32.mrf.mxu0  ;;  %v532_v57 = vpop.f32.mrf.mxu1 }
 0x132   :  { %v324_v59 = vadd.f32 %v323_v55, %v3599_v17  ;;  %v533_v60 = vadd.f32 %v532_v57, %v3601_v18  ;;  %v192_v57 = vld [vmem:[#allocation3 + $0x120] sm:$0xff] }
 0x134   :  { %370 = vmatmul.f32.gmra.mxu0 %v188_v58  ;;  %579 = vmatmul.f32.gmra.mxu1 %v188_v58  ;;  %v708_v61 = vmax.f32 %v324_v59, 0.0  ;;  %v709_v62 = vmax.f32 %v533_v60, 0.0 }
 0x136   :  { %964 = vmatmul.f32.gmra.mxu2 %v708_v61  ;;  %1173 = vmatmul.f32.gmra.mxu3 %v709_v62 }
 0x139   :  { %v326_v63 = vpop.f32.mrf.mxu0  ;;  %v535_v0 = vpop.f32.mrf.mxu1 }
 0x13a   :  { %v327_v4 = vadd.f32 %v326_v63, %v3599_v17  ;;  %v536_v5 = vadd.f32 %v535_v0, %v3601_v18  ;;  %v917_v6 = vpop.f32.mrf.mxu2  ;;  %v1126_v7 = vpop.f32.mrf.mxu3 }
 0x13b   :  { %v1127_v9 = vadd.f32 %v1126_v7, %v917_v6  ;;  %v193_v6 = vld [vmem:[#allocation3 + $0x128] sm:$0xff] }
 0x13c   :  { %373 = vmatmul.f32.gmra.mxu0 %v189_v2  ;;  %582 = vmatmul.f32.gmra.mxu1 %v189_v2  ;;  %v710_v10 = vmax.f32 %v327_v4, 0.0  ;;  %v711_v11 = vmax.f32 %v536_v5, 0.0 }
 0x13d   :  { %v1517_v12 = vadd.f32 %v3652_v3, %v1127_v9 }
 0x13e   :  { %967 = vmatmul.f32.gmra.mxu2 %v710_v10  ;;  %1176 = vmatmul.f32.gmra.mxu3 %v711_v11 }
 0x13f   :  { %v3658_v16 = vadd.f32 %v1517_v12, %v3535_v32 }
 0x141   :  { %1645 = vadd.xlane.f32.xlu0 %v3658_v16  ;;  %v329_v19 = vpop.f32.mrf.mxu0  ;;  %v538_v20 = vpop.f32.mrf.mxu1 }
 0x142   :  { %v330_v23 = vadd.f32 %v329_v19, %v3599_v17  ;;  %v539_v24 = vadd.f32 %v538_v20, %v3601_v18  ;;  %v920_v25 = vpop.f32.mrf.mxu2  ;;  %v1129_v26 = vpop.f32.mrf.mxu3 }
 0x143   :  { %v1130_v27 = vadd.f32 %v1129_v26, %v920_v25  ;;  %v194_v25 = vld [vmem:[#allocation3 + $0x130] sm:$0xff] }
 0x144   :  { %376 = vmatmul.f32.gmra.mxu0 %v190_v22  ;;  %585 = vmatmul.f32.gmra.mxu1 %v190_v22  ;;  %v712_v29 = vmax.f32 %v330_v23, 0.0  ;;  %v713_v30 = vmax.f32 %v539_v24, 0.0 }
 0x145   :  { %v1518_v31 = vadd.f32 %v3652_v3, %v1130_v27 }
 0x146   :  { %970 = vmatmul.f32.gmra.mxu2 %v712_v29  ;;  %1179 = vmatmul.f32.gmra.mxu3 %v713_v30 }
 0x147   :  { %v3665_v32 = vadd.f32 %v1518_v31, %v3539_v33 }
 0x149   :  { %1647 = vadd.xlane.f32.xlu0 %v3665_v32  ;;  %v332_v41 = vpop.f32.mrf.mxu0  ;;  %v541_v42 = vpop.f32.mrf.mxu1 }
 0x14a   :  { %v333_v45 = vadd.f32 %v332_v41, %v3599_v17  ;;  %v542_v46 = vadd.f32 %v541_v42, %v3601_v18  ;;  %v923_v48 = vpop.f32.mrf.mxu2  ;;  %v1132_v49 = vpop.f32.mrf.mxu3 }
 0x14b   :  { %v1133_v50 = vadd.f32 %v1132_v49, %v923_v48  ;;  %v195_v48 = vld [vmem:[#allocation3 + $0x138] sm:$0xff] }
 0x14c   :  { %379 = vmatmul.f32.gmra.mxu0 %v191_v43  ;;  %588 = vmatmul.f32.gmra.mxu1 %v191_v43  ;;  %v714_v51 = vmax.f32 %v333_v45, 0.0  ;;  %v715_v52 = vmax.f32 %v542_v46, 0.0 }
 0x14d   :  { %v1519_v53 = vadd.f32 %v3652_v3, %v1133_v50 }
 0x14e   :  { %973 = vmatmul.f32.gmra.mxu2 %v714_v51  ;;  %1182 = vmatmul.f32.gmra.mxu3 %v715_v52 }
 0x14f   :  { %v3672_v33 = vadd.f32 %v1519_v53, %v3543_v34 }
 0x151   :  { %1649 = vadd.xlane.f32.xlu1 %v3672_v33  ;;  %v335_v54 = vpop.f32.mrf.mxu0  ;;  %v544_v55 = vpop.f32.mrf.mxu1 }
 0x152   :  { %v336_v58 = vadd.f32 %v335_v54, %v3599_v17  ;;  %v545_v59 = vadd.f32 %v544_v55, %v3601_v18  ;;  %v926_v60 = vpop.f32.mrf.mxu2  ;;  %v1135_v61 = vpop.f32.mrf.mxu3 }
 0x153   :  { %v1136_v62 = vadd.f32 %v1135_v61, %v926_v60  ;;  %v196_v60 = vld [vmem:[#allocation3 + $0x140] sm:$0xff] }
 0x154   :  { %382 = vmatmul.f32.gmra.mxu0 %v192_v57  ;;  %591 = vmatmul.f32.gmra.mxu1 %v192_v57  ;;  %v716_v63 = vmax.f32 %v336_v58, 0.0  ;;  %v717_v0 = vmax.f32 %v545_v59, 0.0 }
 0x155   :  { %v1520_v2 = vadd.f32 %v3652_v3, %v1136_v62 }
 0x156   :  { %976 = vmatmul.f32.gmra.mxu2 %v716_v63  ;;  %1185 = vmatmul.f32.gmra.mxu3 %v717_v0 }
 0x157   :  { %v3679_v34 = vadd.f32 %v1520_v2, %v3547_v35 }
 0x159   :  { %1651 = vadd.xlane.f32.xlu1 %v3679_v34  ;;  %v338_v4 = vpop.f32.mrf.mxu0  ;;  %v547_v5 = vpop.f32.mrf.mxu1 }
 0x15a   :  { %v339_v7 = vadd.f32 %v338_v4, %v3599_v17  ;;  %v548_v9 = vadd.f32 %v547_v5, %v3601_v18  ;;  %v929_v10 = vpop.f32.mrf.mxu2  ;;  %v1138_v11 = vpop.f32.mrf.mxu3 }
 0x15b   :  { %v1139_v12 = vadd.f32 %v1138_v11, %v929_v10  ;;  %v197_v10 = vld [vmem:[#allocation3 + $0x148] sm:$0xff] }
 0x15c   :  { %385 = vmatmul.f32.gmra.mxu0 %v193_v6  ;;  %594 = vmatmul.f32.gmra.mxu1 %v193_v6  ;;  %v718_v19 = vmax.f32 %v339_v7, 0.0  ;;  %v719_v20 = vmax.f32 %v548_v9, 0.0 }
 0x15d   :  { %v1521_v22 = vadd.f32 %v3652_v3, %v1139_v12 }
 0x15e   :  { %979 = vmatmul.f32.gmra.mxu2 %v718_v19  ;;  %1188 = vmatmul.f32.gmra.mxu3 %v719_v20 }
 0x15f   :  { %v3686_v35 = vadd.f32 %v1521_v22, %v3551_v36 }
 0x161   :  { %1653 = vadd.xlane.f32.xlu2 %v3686_v35  ;;  %v341_v23 = vpop.f32.mrf.mxu0  ;;  %v550_v24 = vpop.f32.mrf.mxu1 }
 0x162   :  { %v342_v26 = vadd.f32 %v341_v23, %v3599_v17  ;;  %v551_v27 = vadd.f32 %v550_v24, %v3601_v18  ;;  %v932_v29 = vpop.f32.mrf.mxu2  ;;  %v1141_v30 = vpop.f32.mrf.mxu3 }
 0x163   :  { %v1142_v31 = vadd.f32 %v1141_v30, %v932_v29  ;;  %v198_v29 = vld [vmem:[#allocation3 + $0x150] sm:$0xff] }
 0x164   :  { %388 = vmatmul.f32.gmra.mxu0 %v194_v25  ;;  %597 = vmatmul.f32.gmra.mxu1 %v194_v25  ;;  %v720_v41 = vmax.f32 %v342_v26, 0.0  ;;  %v721_v42 = vmax.f32 %v551_v27, 0.0 }
 0x165   :  { %v1522_v43 = vadd.f32 %v3652_v3, %v1142_v31 }
 0x166   :  { %982 = vmatmul.f32.gmra.mxu2 %v720_v41  ;;  %1191 = vmatmul.f32.gmra.mxu3 %v721_v42 }
 0x167   :  { %v3693_v36 = vadd.f32 %v1522_v43, %v3555_v37 }
 0x169   :  { %1655 = vadd.xlane.f32.xlu2 %v3693_v36  ;;  %v344_v45 = vpop.f32.mrf.mxu0  ;;  %v553_v46 = vpop.f32.mrf.mxu1 }
 0x16a   :  { %v345_v49 = vadd.f32 %v344_v45, %v3599_v17  ;;  %v554_v50 = vadd.f32 %v553_v46, %v3601_v18  ;;  %v935_v51 = vpop.f32.mrf.mxu2  ;;  %v1144_v52 = vpop.f32.mrf.mxu3 }
 0x16b   :  { %v1145_v53 = vadd.f32 %v1144_v52, %v935_v51  ;;  %v199_v51 = vld [vmem:[#allocation3 + $0x158] sm:$0xff] }
 0x16c   :  { %391 = vmatmul.f32.gmra.mxu0 %v195_v48  ;;  %600 = vmatmul.f32.gmra.mxu1 %v195_v48  ;;  %v722_v54 = vmax.f32 %v345_v49, 0.0  ;;  %v723_v55 = vmax.f32 %v554_v50, 0.0 }
 0x16d   :  { %v1523_v57 = vadd.f32 %v3652_v3, %v1145_v53 }
 0x16e   :  { %985 = vmatmul.f32.gmra.mxu2 %v722_v54  ;;  %1194 = vmatmul.f32.gmra.mxu3 %v723_v55 }
 0x16f   :  { %v3700_v37 = vadd.f32 %v1523_v57, %v3559_v38 }
 0x171   :  { %1657 = vadd.xlane.f32.xlu0 %v3700_v37  ;;  %v347_v58 = vpop.f32.mrf.mxu0  ;;  %v556_v59 = vpop.f32.mrf.mxu1 }
 0x172   :  { %v348_v61 = vadd.f32 %v347_v58, %v3599_v17  ;;  %v557_v62 = vadd.f32 %v556_v59, %v3601_v18  ;;  %v938_v63 = vpop.f32.mrf.mxu2  ;;  %v1147_v0 = vpop.f32.mrf.mxu3 }
 0x173   :  { %v1148_v2 = vadd.f32 %v1147_v0, %v938_v63  ;;  %v200_v63 = vld [vmem:[#allocation3 + $0x160] sm:$0xff] }
 0x174   :  { %v724_v4 = vmax.f32 %v348_v61, 0.0  ;;  %v725_v5 = vmax.f32 %v557_v62, 0.0  ;;  %394 = vmatmul.f32.gmra.mxu0 %v196_v60  ;;  %603 = vmatmul.f32.gmra.mxu1 %v196_v60 }
 0x175   :  { %v1524_v6 = vadd.f32 %v3652_v3, %v1148_v2 }
 0x176   :  { %988 = vmatmul.f32.gmra.mxu2 %v724_v4  ;;  %1197 = vmatmul.f32.gmra.mxu3 %v725_v5 }
 0x177   :  { %v3707_v38 = vadd.f32 %v1524_v6, %v3563_v39 }
 0x179   :  { %1659 = vadd.xlane.f32.xlu1 %v3707_v38  ;;  %v350_v7 = vpop.f32.mrf.mxu0  ;;  %v559_v9 = vpop.f32.mrf.mxu1 }
 0x17a   :  { %v351_v11 = vadd.f32 %v350_v7, %v3599_v17  ;;  %v560_v12 = vadd.f32 %v559_v9, %v3601_v18  ;;  %v941_v19 = vpop.f32.mrf.mxu2  ;;  %v1150_v20 = vpop.f32.mrf.mxu3 }
 0x17b   :  { %v1151_v22 = vadd.f32 %v1150_v20, %v941_v19  ;;  %v201_v19 = vld [vmem:[#allocation3 + $0x168] sm:$0xff] }
 0x17c   :  { %v726_v23 = vmax.f32 %v351_v11, 0.0  ;;  %v727_v24 = vmax.f32 %v560_v12, 0.0  ;;  %397 = vmatmul.f32.gmra.mxu0 %v197_v10  ;;  %606 = vmatmul.f32.gmra.mxu1 %v197_v10 }
 0x17d   :  { %v1525_v25 = vadd.f32 %v3652_v3, %v1151_v22 }
 0x17e   :  { %991 = vmatmul.f32.gmra.mxu2 %v726_v23  ;;  %1200 = vmatmul.f32.gmra.mxu3 %v727_v24 }
 0x17f   :  { %v3714_v39 = vadd.f32 %v1525_v25, %v3567_v40 }
 0x181   :  { %1661 = vadd.xlane.f32.xlu2 %v3714_v39  ;;  %v353_v26 = vpop.f32.mrf.mxu0  ;;  %v562_v27 = vpop.f32.mrf.mxu1 }
 0x182   :  { %v354_v30 = vadd.f32 %v353_v26, %v3599_v17  ;;  %v563_v31 = vadd.f32 %v562_v27, %v3601_v18  ;;  %v944_v41 = vpop.f32.mrf.mxu2  ;;  %v1153_v42 = vpop.f32.mrf.mxu3 }
 0x183   :  { %v1154_v43 = vadd.f32 %v1153_v42, %v944_v41  ;;  %v202_v41 = vld [vmem:[#allocation3 + $0x170] sm:$0xff] }
 0x184   :  { %v728_v45 = vmax.f32 %v354_v30, 0.0  ;;  %v729_v46 = vmax.f32 %v563_v31, 0.0  ;;  %400 = vmatmul.f32.gmra.mxu0 %v198_v29  ;;  %609 = vmatmul.f32.gmra.mxu1 %v198_v29 }
 0x185   :  { %v1526_v48 = vadd.f32 %v3652_v3, %v1154_v43 }
 0x186   :  { %994 = vmatmul.f32.gmra.mxu2 %v728_v45  ;;  %1203 = vmatmul.f32.gmra.mxu3 %v729_v46 }
 0x187   :  { %v3721_v40 = vadd.f32 %v1526_v48, %v3571_v47 }
 0x189   :  { %1663 = vadd.xlane.f32.xlu0 %v3721_v40  ;;  %v356_v49 = vpop.f32.mrf.mxu0  ;;  %v565_v50 = vpop.f32.mrf.mxu1 }
 0x18a   :  { %v357_v52 = vadd.f32 %v356_v49, %v3599_v17  ;;  %v566_v53 = vadd.f32 %v565_v50, %v3601_v18  ;;  %v947_v54 = vpop.f32.mrf.mxu2  ;;  %v1156_v55 = vpop.f32.mrf.mxu3 }
 0x18b   :  { %v1157_v57 = vadd.f32 %v1156_v55, %v947_v54  ;;  %v203_v54 = vld [vmem:[#allocation3 + $0x178] sm:$0xff] }
 0x18c   :  { %v730_v58 = vmax.f32 %v357_v52, 0.0  ;;  %v731_v59 = vmax.f32 %v566_v53, 0.0  ;;  %403 = vmatmul.f32.gmra.mxu0 %v199_v51  ;;  %612 = vmatmul.f32.gmra.mxu1 %v199_v51 }
 0x18d   :  { %v1527_v60 = vadd.f32 %v3652_v3, %v1157_v57 }
 0x18e   :  { %997 = vmatmul.f32.gmra.mxu2 %v730_v58  ;;  %1206 = vmatmul.f32.gmra.mxu3 %v731_v59 }
 0x18f   :  { %v3728_v47 = vadd.f32 %v1527_v60, %v3575_v56 }
 0x191   :  { %1665 = vadd.xlane.f32.xlu1 %v3728_v47  ;;  %v359_v61 = vpop.f32.mrf.mxu0  ;;  %v568_v62 = vpop.f32.mrf.mxu1 }
 0x192   :  { %v360_v0 = vadd.f32 %v359_v61, %v3599_v17  ;;  %v569_v2 = vadd.f32 %v568_v62, %v3601_v18  ;;  %v950_v4 = vpop.f32.mrf.mxu2  ;;  %v1159_v5 = vpop.f32.mrf.mxu3 }
 0x193   :  { %v1160_v6 = vadd.f32 %v1159_v5, %v950_v4  ;;  %v204_v4 = vld [vmem:[#allocation3 + $0x180] sm:$0xff] }
 0x194   :  { %v732_v7 = vmax.f32 %v360_v0, 0.0  ;;  %v733_v9 = vmax.f32 %v569_v2, 0.0  ;;  %406 = vmatmul.f32.gmra.mxu0 %v200_v63  ;;  %615 = vmatmul.f32.gmra.mxu1 %v200_v63 }
 0x195   :  { %v1528_v10 = vadd.f32 %v3652_v3, %v1160_v6 }
 0x196   :  { %1000 = vmatmul.f32.gmra.mxu2 %v732_v7  ;;  %1209 = vmatmul.f32.gmra.mxu3 %v733_v9 }
 0x197   :  { %v3735_v56 = vadd.f32 %v1528_v10, %v3579_v1 }
 0x199   :  { %1667 = vadd.xlane.f32.xlu2 %v3735_v56  ;;  %v362_v11 = vpop.f32.mrf.mxu0  ;;  %v571_v12 = vpop.f32.mrf.mxu1 }
 0x19a   :  { %v363_v20 = vadd.f32 %v362_v11, %v3599_v17  ;;  %v572_v22 = vadd.f32 %v571_v12, %v3601_v18  ;;  %v953_v23 = vpop.f32.mrf.mxu2  ;;  %v1162_v24 = vpop.f32.mrf.mxu3 }
 0x19b   :  { %v1163_v25 = vadd.f32 %v1162_v24, %v953_v23 }
 0x19c   :  { %v734_v26 = vmax.f32 %v363_v20, 0.0  ;;  %v735_v27 = vmax.f32 %v572_v22, 0.0  ;;  %409 = vmatmul.f32.gmra.mxu0 %v201_v19  ;;  %618 = vmatmul.f32.gmra.mxu1 %v201_v19 }
 0x19d   :  { %v1529_v29 = vadd.f32 %v3652_v3, %v1163_v25 }
 0x19e   :  { %1003 = vmatmul.f32.gmra.mxu2 %v734_v26  ;;  %1212 = vmatmul.f32.gmra.mxu3 %v735_v27  ;;  %v205_v27 = vld [vmem:[#allocation3 + $0x188] sm:$0xff] }
 0x19f   :  { %v3742_v1 = vadd.f32 %v1529_v29, %v3583_v8 }
 0x1a1   :  { %1669 = vadd.xlane.f32.xlu0 %v3742_v1  ;;  %v365_v30 = vpop.f32.mrf.mxu0  ;;  %v574_v31 = vpop.f32.mrf.mxu1 }
 0x1a2   :  { %v366_v42 = vadd.f32 %v365_v30, %v3599_v17  ;;  %v575_v43 = vadd.f32 %v574_v31, %v3601_v18  ;;  %v956_v45 = vpop.f32.mrf.mxu2  ;;  %v1165_v46 = vpop.f32.mrf.mxu3 }
 0x1a3   :  { %v1166_v48 = vadd.f32 %v1165_v46, %v956_v45 }
 0x1a4   :  { %v736_v49 = vmax.f32 %v366_v42, 0.0  ;;  %v737_v50 = vmax.f32 %v575_v43, 0.0  ;;  %412 = vmatmul.f32.gmra.mxu0 %v202_v41  ;;  %621 = vmatmul.f32.gmra.mxu1 %v202_v41 }
 0x1a5   :  { %v1530_v51 = vadd.f32 %v3652_v3, %v1166_v48 }
 0x1a6   :  { %1006 = vmatmul.f32.gmra.mxu2 %v736_v49  ;;  %1215 = vmatmul.f32.gmra.mxu3 %v737_v50 }
 0x1a7   :  { %v3749_v8 = vadd.f32 %v1530_v51, %v3587_v13 }
 0x1a9   :  { %1671 = vadd.xlane.f32.xlu1 %v3749_v8  ;;  %v368_v52 = vpop.f32.mrf.mxu0  ;;  %v577_v53 = vpop.f32.mrf.mxu1 }
 0x1aa   :  { %v369_v55 = vadd.f32 %v368_v52, %v3599_v17  ;;  %v578_v57 = vadd.f32 %v577_v53, %v3601_v18  ;;  %v959_v58 = vpop.f32.mrf.mxu2  ;;  %v1168_v59 = vpop.f32.mrf.mxu3  ;;  %v206_v53 = vld [vmem:[#allocation3 + $0x190] sm:$0xff] }
 0x1ab   :  { %v1169_v60 = vadd.f32 %v1168_v59, %v959_v58 }
 0x1ac   :  { %v738_v61 = vmax.f32 %v369_v55, 0.0  ;;  %v739_v62 = vmax.f32 %v578_v57, 0.0  ;;  %415 = vmatmul.f32.gmra.mxu0 %v203_v54  ;;  %624 = vmatmul.f32.gmra.mxu1 %v203_v54 }
 0x1ad   :  { %v1531_v63 = vadd.f32 %v3652_v3, %v1169_v60 }
 0x1ae   :  { %1009 = vmatmul.f32.gmra.mxu2 %v738_v61  ;;  %1218 = vmatmul.f32.gmra.mxu3 %v739_v62 }
 0x1af   :  { %v3756_v13 = vadd.f32 %v1531_v63, %v3591_v14 }
 0x1b1   :  { %1673 = vadd.xlane.f32.xlu2 %v3756_v13  ;;  %v371_v0 = vpop.f32.mrf.mxu0  ;;  %v580_v2 = vpop.f32.mrf.mxu1 }
 0x1b2   :  { %v372_v5 = vadd.f32 %v371_v0, %v3599_v17  ;;  %v581_v6 = vadd.f32 %v580_v2, %v3601_v18  ;;  %v962_v7 = vpop.f32.mrf.mxu2  ;;  %v1171_v9 = vpop.f32.mrf.mxu3 }
 0x1b3   :  { %v1172_v10 = vadd.f32 %v1171_v9, %v962_v7 }
 0x1b4   :  { %v740_v11 = vmax.f32 %v372_v5, 0.0  ;;  %v741_v12 = vmax.f32 %v581_v6, 0.0  ;;  %v1646_v19 = vpop.xlane.xlu0 %1645  ;;  %418 = vmatmul.f32.gmra.mxu0 %v204_v4  ;;  %627 = vmatmul.f32.gmra.mxu1 %v204_v4  ;;  %v207_v6 = vld [vmem:[#allocation3 + $0x198] sm:$0xff] }
 0x1b5   :  { %v1773_v20 = vmul.f32 0.0078125, %v1646_v19  ;;  %v1532_v14 = vadd.f32 %v3652_v3, %v1172_v10 }
 0x1b6   :  { %1012 = vmatmul.f32.gmra.mxu2 %v740_v11  ;;  %1221 = vmatmul.f32.gmra.mxu3 %v741_v12 }
 0x1b7   :  { %v3763_v22 = vsub.f32 %v3658_v16, %v1773_v20  ;;  %v3766_v23 = vadd.f32 %v1532_v14, %v3595_v15 }
 0x1b9   :  { %1675 = vadd.xlane.f32.xlu0 %v3766_v23  ;;  %v374_v24 = vpop.f32.mrf.mxu0  ;;  %v583_v25 = vpop.f32.mrf.mxu1  ;;  %v1901_v26 = vmul.f32 %v3763_v22, %v3763_v22 }
 0x1ba   :  { %v375_v29 = vadd.f32 %v374_v24, %v3599_v17  ;;  %v584_v30 = vadd.f32 %v583_v25, %v3601_v18  ;;  %v965_v31 = vpop.f32.mrf.mxu2  ;;  %v1174_v41 = vpop.f32.mrf.mxu3 }
 0x1bb   :  { %v1175_v42 = vadd.f32 %v1174_v41, %v965_v31  ;;  %1965 = vadd.xlane.f32.xlu1 %v1901_v26 }
 0x1bc   :  { %v742_v16 = vmax.f32 %v375_v29, 0.0  ;;  %v743_v43 = vmax.f32 %v584_v30, 0.0  ;;  %v1648_v15 = vpop.xlane.xlu0 %1647  ;;  %421 = vmatmul.f32.gmra.mxu0 %v205_v27  ;;  %630 = vmatmul.f32.gmra.mxu1 %v205_v27  ;;  %v208_v30 = vld [vmem:[#allocation3 + $0x1a0] sm:$0xff] }
 0x1bd   :  { %v1774_v45 = vmul.f32 0.0078125, %v1648_v15  ;;  %v1533_v46 = vadd.f32 %v3652_v3, %v1175_v42 }
 0x1be   :  { %1015 = vmatmul.f32.gmra.mxu2 %v742_v16  ;;  %1224 = vmatmul.f32.gmra.mxu3 %v743_v43 }
 0x1bf   :  { %v3775_v48 = vsub.f32 %v3665_v32, %v1774_v45  ;;  %v3780_v52 = vadd.f32 %v1533_v46, %v3603_v21 }
 0x1c1   :  { %v377_v49 = vpop.f32.mrf.mxu0  ;;  %v586_v50 = vpop.f32.mrf.mxu1  ;;  %v1902_v51 = vmul.f32 %v3775_v48, %v3775_v48 }
 0x1c2   :  { %v378_v54 = vadd.f32 %v377_v49, %v3599_v17  ;;  %v587_v55 = vadd.f32 %v586_v50, %v3601_v18  ;;  %v968_v57 = vpop.f32.mrf.mxu2  ;;  %v1177_v58 = vpop.f32.mrf.mxu3 }
 0x1c3   :  { %v1178_v59 = vadd.f32 %v1177_v58, %v968_v57  ;;  %1967 = vadd.xlane.f32.xlu2 %v1902_v51  ;;  %1677 = vadd.xlane.f32.xlu1 %v3780_v52  ;;  %v209_v57 = vld [vmem:[#allocation3 + $0x1a8] sm:$0xff] }
 0x1c4   :  { %v744_v32 = vmax.f32 %v378_v54, 0.0  ;;  %v745_v60 = vmax.f32 %v587_v55, 0.0  ;;  %v1650_v61 = vpop.xlane.xlu1 %1649  ;;  %424 = vmatmul.f32.gmra.mxu0 %v206_v53  ;;  %633 = vmatmul.f32.gmra.mxu1 %v206_v53  ;;  %v3286_v54 = vld [vmem:[#allocation3 + $0x98] sm:$0xff] }
 0x1c5   :  { %v1775_v62 = vmul.f32 0.0078125, %v1650_v61  ;;  %v1534_v21 = vadd.f32 %v3652_v3, %v1178_v59 }
 0x1c6   :  { %1018 = vmatmul.f32.gmra.mxu2 %v744_v32  ;;  %1227 = vmatmul.f32.gmra.mxu3 %v745_v60 }
 0x1c7   :  { %v3787_v63 = vsub.f32 %v3672_v33, %v1775_v62  ;;  %v3792_v5 = vadd.f32 %v1534_v21, %v3609_v28 }
 0x1c9   :  { %v380_v0 = vpop.f32.mrf.mxu0  ;;  %v589_v2 = vpop.f32.mrf.mxu1  ;;  %v1903_v4 = vmul.f32 %v3787_v63, %v3787_v63 }
 0x1ca   :  { %v381_v7 = vadd.f32 %v380_v0, %v3599_v17  ;;  %v590_v9 = vadd.f32 %v589_v2, %v3601_v18  ;;  %v971_v10 = vpop.f32.mrf.mxu2  ;;  %v1180_v11 = vpop.f32.mrf.mxu3 }
 0x1cb   :  { %v1181_v12 = vadd.f32 %v1180_v11, %v971_v10  ;;  %1969 = vadd.xlane.f32.xlu0 %v1903_v4  ;;  %1679 = vadd.xlane.f32.xlu2 %v3792_v5  ;;  %v3287_v10 = vld [vmem:[#allocation3 + $0xa0] sm:$0xff] }
 0x1cc   :  { %v746_v33 = vmax.f32 %v381_v7, 0.0  ;;  %v747_v19 = vmax.f32 %v590_v9, 0.0  ;;  %v1652_v20 = vpop.xlane.xlu1 %1651  ;;  %427 = vmatmul.f32.gmra.mxu0 %v207_v6  ;;  %636 = vmatmul.f32.gmra.mxu1 %v207_v6 }
 0x1cd   :  { %v1776_v14 = vmul.f32 0.0078125, %v1652_v20  ;;  %v1535_v28 = vadd.f32 %v3652_v3, %v1181_v12  ;;  %v210_v12 = vld [vmem:[#allocation3 + $0x1b0] sm:$0xff] }
 0x1ce   :  { %1021 = vmatmul.f32.gmra.mxu2 %v746_v33  ;;  %1230 = vmatmul.f32.gmra.mxu3 %v747_v19 }
 0x1cf   :  { %v3799_v24 = vsub.f32 %v3679_v34, %v1776_v14  ;;  %v3804_v29 = vadd.f32 %v1535_v28, %v3615_v44 }
 0x1d1   :  { %v383_v25 = vpop.f32.mrf.mxu0  ;;  %v592_v26 = vpop.f32.mrf.mxu1  ;;  %v1904_v27 = vmul.f32 %v3799_v24, %v3799_v24 }
 0x1d2   :  { %v384_v31 = vadd.f32 %v383_v25, %v3599_v17  ;;  %v593_v41 = vadd.f32 %v592_v26, %v3601_v18  ;;  %v974_v42 = vpop.f32.mrf.mxu2  ;;  %v1183_v16 = vpop.f32.mrf.mxu3 }
 0x1d3   :  { %v1184_v43 = vadd.f32 %v1183_v16, %v974_v42  ;;  %1971 = vadd.xlane.f32.xlu1 %v1904_v27  ;;  %1681 = vadd.xlane.f32.xlu0 %v3804_v29 }
 0x1d4   :  { %v748_v34 = vmax.f32 %v384_v31, 0.0  ;;  %v749_v15 = vmax.f32 %v593_v41, 0.0  ;;  %v1654_v45 = vpop.xlane.xlu2 %1653  ;;  %430 = vmatmul.f32.gmra.mxu0 %v208_v30  ;;  %639 = vmatmul.f32.gmra.mxu1 %v208_v30 }
 0x1d5   :  { %v1777_v46 = vmul.f32 0.0078125, %v1654_v45  ;;  %v1536_v44 = vadd.f32 %v3652_v3, %v1184_v43  ;;  %v3288_v43 = vld [vmem:[#allocation3 + $0xa8] sm:$0xff] }
 0x1d6   :  { %1024 = vmatmul.f32.gmra.mxu2 %v748_v34  ;;  %1233 = vmatmul.f32.gmra.mxu3 %v749_v15  ;;  %v211_v15 = vld [vmem:[#allocation3 + $0x1b8] sm:$0xff] }
 0x1d7   :  { %v3811_v49 = vsub.f32 %v3686_v35, %v1777_v46  ;;  %v3815_v55 = vadd.f32 %v3286_v54, %v1536_v44 }
 0x1d9   :  { %v386_v50 = vpop.f32.mrf.mxu0  ;;  %v595_v51 = vpop.f32.mrf.mxu1  ;;  %v1905_v53 = vmul.f32 %v3811_v49, %v3811_v49 }
 0x1da   :  { %v387_v58 = vadd.f32 %v386_v50, %v3599_v17  ;;  %v596_v59 = vadd.f32 %v595_v51, %v3601_v18  ;;  %v977_v32 = vpop.f32.mrf.mxu2  ;;  %v1186_v60 = vpop.f32.mrf.mxu3 }
 0x1db   :  { %v1187_v61 = vadd.f32 %v1186_v60, %v977_v32  ;;  %1973 = vadd.xlane.f32.xlu2 %v1905_v53  ;;  %1683 = vadd.xlane.f32.xlu1 %v3815_v55 }
 0x1dc   :  { %v750_v35 = vmax.f32 %v387_v58, 0.0  ;;  %v751_v62 = vmax.f32 %v596_v59, 0.0  ;;  %v1656_v21 = vpop.xlane.xlu2 %1655  ;;  %433 = vmatmul.f32.gmra.mxu0 %v209_v57  ;;  %642 = vmatmul.f32.gmra.mxu1 %v209_v57 }
 0x1dd   :  { %v1778_v0 = vmul.f32 0.0078125, %v1656_v21  ;;  %v1537_v2 = vadd.f32 %v3652_v3, %v1187_v61  ;;  %v212_v21 = vld [vmem:[#allocation3 + $0x1c0] sm:$0xff] }
 0x1de   :  { %1027 = vmatmul.f32.gmra.mxu2 %v750_v35  ;;  %1236 = vmatmul.f32.gmra.mxu3 %v751_v62  ;;  %v3289_v35 = vld [vmem:[#allocation3 + $0xb0] sm:$0xff] }
 0x1df   :  { %v3822_v4 = vsub.f32 %v3693_v36, %v1778_v0  ;;  %v3826_v11 = vadd.f32 %v3287_v10, %v1537_v2 }
 0x1e1   :  { %v389_v6 = vpop.f32.mrf.mxu0  ;;  %v598_v7 = vpop.f32.mrf.mxu1  ;;  %v1906_v9 = vmul.f32 %v3822_v4, %v3822_v4 }
 0x1e2   :  { %v390_v33 = vadd.f32 %v389_v6, %v3599_v17  ;;  %v599_v19 = vadd.f32 %v598_v7, %v3601_v18  ;;  %v980_v20 = vpop.f32.mrf.mxu2  ;;  %v1189_v14 = vpop.f32.mrf.mxu3 }
 0x1e3   :  { %v1190_v28 = vadd.f32 %v1189_v14, %v980_v20  ;;  %1975 = vadd.xlane.f32.xlu0 %v1906_v9  ;;  %1685 = vadd.xlane.f32.xlu2 %v3826_v11 }
 0x1e4   :  { %v752_v36 = vmax.f32 %v390_v33, 0.0  ;;  %v753_v25 = vmax.f32 %v599_v19, 0.0  ;;  %v1658_v26 = vpop.xlane.xlu0 %1657  ;;  %436 = vmatmul.f32.gmra.mxu0 %v210_v12  ;;  %645 = vmatmul.f32.gmra.mxu1 %v210_v12 }
 0x1e5   :  { %v1779_v27 = vmul.f32 0.0078125, %v1658_v26  ;;  %v1538_v30 = vadd.f32 %v3652_v3, %v1190_v28 }
 0x1e6   :  { %1030 = vmatmul.f32.gmra.mxu2 %v752_v36  ;;  %1239 = vmatmul.f32.gmra.mxu3 %v753_v25  ;;  %v3290_v25 = vld [vmem:[#allocation3 + $0xb8] sm:$0xff] }
 0x1e7   :  { %v3833_v31 = vsub.f32 %v3700_v37, %v1779_v27  ;;  %v3837_v34 = vadd.f32 %v3288_v43, %v1538_v30  ;;  %v213_v27 = vld [vmem:[#allocation3 + $0x1c8] sm:$0xff] }
 0x1e9   :  { %v392_v41 = vpop.f32.mrf.mxu0  ;;  %v601_v42 = vpop.f32.mrf.mxu1  ;;  %v1907_v16 = vmul.f32 %v3833_v31, %v3833_v31 }
 0x1ea   :  { %v393_v45 = vadd.f32 %v392_v41, %v3599_v17  ;;  %v602_v46 = vadd.f32 %v601_v42, %v3601_v18  ;;  %v983_v44 = vpop.f32.mrf.mxu2  ;;  %v1192_v50 = vpop.f32.mrf.mxu3 }
 0x1eb   :  { %v1193_v51 = vadd.f32 %v1192_v50, %v983_v44  ;;  %1977 = vadd.xlane.f32.xlu1 %v1907_v16  ;;  %1687 = vadd.xlane.f32.xlu0 %v3837_v34 }
 0x1ec   :  { %v754_v37 = vmax.f32 %v393_v45, 0.0  ;;  %v755_v53 = vmax.f32 %v602_v46, 0.0  ;;  %v1660_v54 = vpop.xlane.xlu1 %1659  ;;  %439 = vmatmul.f32.gmra.mxu0 %v211_v15  ;;  %648 = vmatmul.f32.gmra.mxu1 %v211_v15 }
 0x1ed   :  { %v1780_v57 = vmul.f32 0.0078125, %v1660_v54  ;;  %v1539_v58 = vadd.f32 %v3652_v3, %v1193_v51  ;;  %v3291_v54 = vld [vmem:[#allocation3 + $0xc0] sm:$0xff] }
 0x1ee   :  { %1033 = vmatmul.f32.gmra.mxu2 %v754_v37  ;;  %1242 = vmatmul.f32.gmra.mxu3 %v755_v53 }
 0x1ef   :  { %v3844_v59 = vsub.f32 %v3707_v38, %v1780_v57  ;;  %v3848_v62 = vadd.f32 %v3289_v35, %v1539_v58  ;;  %v214_v58 = vld [vmem:[#allocation3 + $0x1d0] sm:$0xff] }
 0x1f1   :  { %v395_v32 = vpop.f32.mrf.mxu0  ;;  %v604_v60 = vpop.f32.mrf.mxu1  ;;  %v1908_v61 = vmul.f32 %v3844_v59, %v3844_v59 }
 0x1f2   :  { %v396_v0 = vadd.f32 %v395_v32, %v3599_v17  ;;  %v605_v2 = vadd.f32 %v604_v60, %v3601_v18  ;;  %v986_v6 = vpop.f32.mrf.mxu2  ;;  %v1195_v7 = vpop.f32.mrf.mxu3 }
 0x1f3   :  { %v1196_v9 = vadd.f32 %v1195_v7, %v986_v6  ;;  %1979 = vadd.xlane.f32.xlu2 %v1908_v61  ;;  %1689 = vadd.xlane.f32.xlu1 %v3848_v62 }
 0x1f4   :  { %v756_v38 = vmax.f32 %v396_v0, 0.0  ;;  %v757_v10 = vmax.f32 %v605_v2, 0.0  ;;  %v1662_v12 = vpop.xlane.xlu2 %1661  ;;  %442 = vmatmul.f32.gmra.mxu0 %v212_v21  ;;  %651 = vmatmul.f32.gmra.mxu1 %v212_v21 }
 0x1f5   :  { %v1781_v33 = vmul.f32 0.0078125, %v1662_v12  ;;  %v1540_v19 = vadd.f32 %v3652_v3, %v1196_v9 }
 0x1f6   :  { %1036 = vmatmul.f32.gmra.mxu2 %v756_v38  ;;  %1245 = vmatmul.f32.gmra.mxu3 %v757_v10 }
 0x1f7   :  { %v3855_v20 = vsub.f32 %v3714_v39, %v1781_v33  ;;  %v3859_v26 = vadd.f32 %v3290_v25, %v1540_v19  ;;  %v3292_v33 = vld [vmem:[#allocation3 + $0xc8] sm:$0xff] }
 0x1f9   :  { %v398_v14 = vpop.f32.mrf.mxu0  ;;  %v607_v28 = vpop.f32.mrf.mxu1  ;;  %v1909_v36 = vmul.f32 %v3855_v20, %v3855_v20 }
 0x1fa   :  { %v399_v30 = vadd.f32 %v398_v14, %v3599_v17  ;;  %v608_v41 = vadd.f32 %v607_v28, %v3601_v18  ;;  %v989_v42 = vpop.f32.mrf.mxu2  ;;  %v1198_v16 = vpop.f32.mrf.mxu3  ;;  %v215_v14 = vld [vmem:[#allocation3 + $0x1d8] sm:$0xff] }
 0x1fb   :  { %v1199_v43 = vadd.f32 %v1198_v16, %v989_v42  ;;  %1981 = vadd.xlane.f32.xlu0 %v1909_v36  ;;  %1691 = vadd.xlane.f32.xlu2 %v3859_v26 }
 0x1fc   :  { %v758_v39 = vmax.f32 %v399_v30, 0.0  ;;  %v759_v15 = vmax.f32 %v608_v41, 0.0  ;;  %v1664_v45 = vpop.xlane.xlu0 %1663  ;;  %445 = vmatmul.f32.gmra.mxu0 %v213_v27  ;;  %654 = vmatmul.f32.gmra.mxu1 %v213_v27 }
 0x1fd   :  { %v1782_v46 = vmul.f32 0.0078125, %v1664_v45  ;;  %v1541_v44 = vadd.f32 %v3652_v3, %v1199_v43 }
 0x1fe   :  { %1039 = vmatmul.f32.gmra.mxu2 %v758_v39  ;;  %1248 = vmatmul.f32.gmra.mxu3 %v759_v15 }
 0x1ff   :  { %v3866_v50 = vsub.f32 %v3721_v40, %v1782_v46  ;;  %v3870_v57 = vadd.f32 %v3291_v54, %v1541_v44  ;;  %v3293_v44 = vld [vmem:[#allocation3 + $0xd0] sm:$0xff] }
 0x201   :  { %v401_v51 = vpop.f32.mrf.mxu0  ;;  %v610_v37 = vpop.f32.mrf.mxu1  ;;  %v1910_v53 = vmul.f32 %v3866_v50, %v3866_v50 }
 0x202   :  { %v402_v32 = vadd.f32 %v401_v51, %v3599_v17  ;;  %v611_v60 = vadd.f32 %v610_v37, %v3601_v18  ;;  %v992_v61 = vpop.f32.mrf.mxu2  ;;  %v1201_v35 = vpop.f32.mrf.mxu3  ;;  %v216_v37 = vld [vmem:[#allocation3 + $0x1e0] sm:$0xff] }
 0x203   :  { %v1202_v21 = vadd.f32 %v1201_v35, %v992_v61  ;;  %1983 = vadd.xlane.f32.xlu1 %v1910_v53  ;;  %1693 = vadd.xlane.f32.xlu0 %v3870_v57 }
 0x204   :  { %v760_v40 = vmax.f32 %v402_v32, 0.0  ;;  %v761_v0 = vmax.f32 %v611_v60, 0.0  ;;  %v1666_v2 = vpop.xlane.xlu1 %1665  ;;  %448 = vmatmul.f32.gmra.mxu0 %v214_v58  ;;  %657 = vmatmul.f32.gmra.mxu1 %v214_v58 }
 0x205   :  { %v1783_v6 = vmul.f32 0.0078125, %v1666_v2  ;;  %v1542_v7 = vadd.f32 %v3652_v3, %v1202_v21  ;;  %v3900_v21 = vld [vmem:[%s4757_s4] ss:$0 sm:$0xff] }
 0x206   :  { %1042 = vmatmul.f32.gmra.mxu2 %v760_v40  ;;  %1251 = vmatmul.f32.gmra.mxu3 %v761_v0 }
 0x207   :  { %v3877_v9 = vsub.f32 %v3728_v47, %v1783_v6  ;;  %v3881_v19 = vadd.f32 %v3292_v33, %v1542_v7 }
 0x209   :  { %v404_v38 = vpop.f32.mrf.mxu0  ;;  %v613_v10 = vpop.f32.mrf.mxu1  ;;  %v1911_v12 = vmul.f32 %v3877_v9, %v3877_v9 }
 0x20a   :  { %v405_v28 = vadd.f32 %v404_v38, %v3599_v17  ;;  %v614_v36 = vadd.f32 %v613_v10, %v3601_v18  ;;  %v995_v25 = vpop.f32.mrf.mxu2  ;;  %v1204_v27 = vpop.f32.mrf.mxu3  ;;  %v3295_v38 = vld [vmem:[#allocation3 + $0xd8] sm:$0xff] }
 0x20b   :  { %v1205_v30 = vadd.f32 %v1204_v27, %v995_v25  ;;  %1985 = vadd.xlane.f32.xlu2 %v1911_v12  ;;  %1695 = vadd.xlane.f32.xlu1 %v3881_v19  ;;  %v217_v12 = vld [vmem:[#allocation3 + $0x1e8] sm:$0xff] }
 0x20c   :  { %v762_v47 = vmax.f32 %v405_v28, 0.0  ;;  %v763_v41 = vmax.f32 %v614_v36, 0.0  ;;  %v1668_v42 = vpop.xlane.xlu2 %1667  ;;  %451 = vmatmul.f32.gmra.mxu0 %v215_v14  ;;  %660 = vmatmul.f32.gmra.mxu1 %v215_v14 }
 0x20d   :  { %v1784_v16 = vmul.f32 0.0078125, %v1668_v42  ;;  %v1543_v43 = vadd.f32 %v3652_v3, %v1205_v30 }
 0x20e   :  { %1045 = vmatmul.f32.gmra.mxu2 %v762_v47  ;;  %1254 = vmatmul.f32.gmra.mxu3 %v763_v41 }
 0x20f   :  { %v3888_v39 = vsub.f32 %v3735_v56, %v1784_v16  ;;  %v3892_v51 = vadd.f32 %v3293_v44, %v1543_v43  ;;  %v218_v44 = vld [vmem:[#allocation3 + $0x1f0] sm:$0xff] }
 0x211   :  { %v407_v15 = vpop.f32.mrf.mxu0  ;;  %v616_v45 = vpop.f32.mrf.mxu1  ;;  %v1912_v46 = vmul.f32 %v3888_v39, %v3888_v39 }
 0x212   :  { %v408_v53 = vadd.f32 %v407_v15, %v3599_v17  ;;  %v617_v54 = vadd.f32 %v616_v45, %v3601_v18  ;;  %v998_v58 = vpop.f32.mrf.mxu2  ;;  %v1207_v3 = vpop.f32.mrf.mxu3  ;;  %v3296_v45 = vld [vmem:[#allocation3 + $0xe0] sm:$0xff] }
 0x213   :  { %v1208_v32 = vadd.f32 %v1207_v3, %v998_v58  ;;  %1987 = vadd.xlane.f32.xlu0 %v1912_v46  ;;  %1697 = vadd.xlane.f32.xlu2 %v3892_v51 }
 0x214   :  { %v764_v56 = vmax.f32 %v408_v53, 0.0  ;;  %v765_v60 = vmax.f32 %v617_v54, 0.0  ;;  %v1670_v61 = vpop.xlane.xlu0 %1669  ;;  %454 = vmatmul.f32.gmra.mxu0 %v216_v37  ;;  %663 = vmatmul.f32.gmra.mxu1 %v216_v37 }
 0x215   :  { %v1785_v35 = vmul.f32 0.0078125, %v1670_v61  ;;  %v1544_v40 = vadd.f32 %v3900_v21, %v1208_v32 }
 0x216   :  { %1048 = vmatmul.f32.gmra.mxu2 %v764_v56  ;;  %1257 = vmatmul.f32.gmra.mxu3 %v765_v60 }
 0x217   :  { %v3904_v0 = vsub.f32 %v3742_v1, %v1785_v35  ;;  %v3908_v10 = vadd.f32 %v3295_v38, %v1544_v40 }
 0x219   :  { %v410_v2 = vpop.f32.mrf.mxu0  ;;  %v619_v6 = vpop.f32.mrf.mxu1  ;;  %v1913_v7 = vmul.f32 %v3904_v0, %v3904_v0 }
 0x21a   :  { %v411_v33 = vadd.f32 %v410_v2, %v3599_v17  ;;  %v620_v14 = vadd.f32 %v619_v6, %v3601_v18  ;;  %v1001_v28 = vpop.f32.mrf.mxu2  ;;  %v1210_v36 = vpop.f32.mrf.mxu3 }
 0x21b   :  { %v1211_v25 = vadd.f32 %v1210_v36, %v1001_v28  ;;  %1989 = vadd.xlane.f32.xlu1 %v1913_v7  ;;  %1699 = vadd.xlane.f32.xlu0 %v3908_v10  ;;  %v3297_v7 = vld [vmem:[#allocation3 + $0xe8] sm:$0xff] }
 0x21c   :  { %v766_v1 = vmax.f32 %v411_v33, 0.0  ;;  %v767_v27 = vmax.f32 %v620_v14, 0.0  ;;  %v1672_v30 = vpop.xlane.xlu1 %1671  ;;  %457 = vmatmul.f32.gmra.mxu0 %v217_v12  ;;  %666 = vmatmul.f32.gmra.mxu1 %v217_v12  ;;  %v219_v12 = vld [vmem:[#allocation3 + $0x1f8] sm:$0xff] }
 0x21d   :  { %v1786_v47 = vmul.f32 0.0078125, %v1672_v30  ;;  %v1545_v41 = vadd.f32 %v3900_v21, %v1211_v25 }
 0x21e   :  { %1051 = vmatmul.f32.gmra.mxu2 %v766_v1  ;;  %1260 = vmatmul.f32.gmra.mxu3 %v767_v27 }
 0x21f   :  { %v3915_v42 = vsub.f32 %v3749_v8, %v1786_v47  ;;  %v3919_v46 = vadd.f32 %v3296_v45, %v1545_v41 }
 0x221   :  { %v413_v16 = vpop.f32.mrf.mxu0  ;;  %v622_v43 = vpop.f32.mrf.mxu1  ;;  %v1914_v15 = vmul.f32 %v3915_v42, %v3915_v42 }
 0x222   :  { %v414_v37 = vadd.f32 %v413_v16, %v3599_v17  ;;  %v623_v53 = vadd.f32 %v622_v43, %v3601_v18  ;;  %v1004_v54 = vpop.f32.mrf.mxu2  ;;  %v1213_v58 = vpop.f32.mrf.mxu3 }
 0x223   :  { %v1214_v3 = vadd.f32 %v1213_v58, %v1004_v54  ;;  %1991 = vadd.xlane.f32.xlu2 %v1914_v15  ;;  %1701 = vadd.xlane.f32.xlu1 %v3919_v46 }
 0x224   :  { %v768_v8 = vmax.f32 %v414_v37, 0.0  ;;  %v769_v32 = vmax.f32 %v623_v53, 0.0  ;;  %v1674_v56 = vpop.xlane.xlu2 %1673  ;;  %460 = vmatmul.f32.gmra.mxu0 %v218_v44  ;;  %669 = vmatmul.f32.gmra.mxu1 %v218_v44  ;;  %v3298_v53 = vld [vmem:[#allocation3 + $0xf0] sm:$0xff] }
 0x225   :  { %v1787_v60 = vmul.f32 0.0078125, %v1674_v56  ;;  %v1546_v61 = vadd.f32 %v3900_v21, %v1214_v3 }
 0x226   :  { %1054 = vmatmul.f32.gmra.mxu2 %v768_v8  ;;  %1263 = vmatmul.f32.gmra.mxu3 %v769_v32 }
 0x227   :  { %v3926_v35 = vsub.f32 %v3756_v13, %v1787_v60  ;;  %v3930_v38 = vadd.f32 %v3297_v7, %v1546_v61 }
 0x229   :  { %v416_v40 = vpop.f32.mrf.mxu0  ;;  %v625_v2 = vpop.f32.mrf.mxu1  ;;  %v1915_v6 = vmul.f32 %v3926_v35, %v3926_v35 }
 0x22a   :  { %v417_v33 = vadd.f32 %v416_v40, %v3599_v17  ;;  %v626_v14 = vadd.f32 %v625_v2, %v3601_v18  ;;  %v1007_v28 = vpop.f32.mrf.mxu2  ;;  %v1216_v36 = vpop.f32.mrf.mxu3 }
 0x22b   :  { %v1217_v25 = vadd.f32 %v1216_v36, %v1007_v28  ;;  %1993 = vadd.xlane.f32.xlu0 %v1915_v6  ;;  %1703 = vadd.xlane.f32.xlu2 %v3930_v38 }
 0x22c   :  { %v770_v13 = vmax.f32 %v417_v33, 0.0  ;;  %v771_v1 = vmax.f32 %v626_v14, 0.0  ;;  %v1676_v27 = vpop.xlane.xlu0 %1675  ;;  %463 = vmatmul.f32.gmra.mxu0 %v219_v12  ;;  %672 = vmatmul.f32.gmra.mxu1 %v219_v12 }
 0x22d   :  { %v1788_v30 = vmul.f32 0.0078125, %v1676_v27  ;;  %v1547_v47 = vadd.f32 %v3900_v21, %v1217_v25  ;;  %v3299_v25 = vld [vmem:[#allocation3 + $0xf8] sm:$0xff] }
 0x22e   :  { %v1966_v41 = vpop.xlane.xlu1 %1965  ;;  %1057 = vmatmul.f32.gmra.mxu2 %v770_v13  ;;  %1266 = vmatmul.f32.gmra.mxu3 %v771_v1 }
 0x22f   :  { %v3937_v16 = vsub.f32 %v3766_v23, %v1788_v30  ;;  %v2093_v43 = vmul.f32 0.0078125, %v1966_v41  ;;  %v3943_v54 = vadd.f32 %v3298_v53, %v1547_v47 }
 0x231   :  { %v3939_v15 = vadd.f32 1e-05, %v2093_v43  ;;  %v419_v45 = vpop.f32.mrf.mxu0  ;;  %v628_v44 = vpop.f32.mrf.mxu1  ;;  %v1916_v37 = vmul.f32 %v3937_v16, %v3937_v16 }
 0x232   :  { %v420_v58 = vadd.f32 %v419_v45, %v3599_v17  ;;  %v629_v3 = vadd.f32 %v628_v44, %v3601_v18  ;;  %v1010_v8 = vpop.f32.mrf.mxu2  ;;  %v1219_v32 = vpop.f32.mrf.mxu3 }
 0x233   :  { %3158 = vrsqrt.f32 %v3939_v15  ;;  %v1220_v23 = vadd.f32 %v1219_v32, %v1010_v8  ;;  %1995 = vadd.xlane.f32.xlu1 %v1916_v37  ;;  %1705 = vadd.xlane.f32.xlu0 %v3943_v54  ;;  %vm2227_vm1 = vweird.f32 %v3939_v15 }
 0x234   :  { %v772_v56 = vmax.f32 %v420_v58, 0.0  ;;  %v773_v60 = vmax.f32 %v629_v3, 0.0 }
 0x235   :  { %v1548_v61 = vadd.f32 %v3900_v21, %v1220_v23 }
 0x236   :  { %v1968_v40 = vpop.xlane.xlu2 %1967  ;;  %v1678_v2 = vpop.xlane.xlu1 %1677  ;;  %1060 = vmatmul.f32.gmra.mxu2 %v772_v56  ;;  %1269 = vmatmul.f32.gmra.mxu3 %v773_v60 }
 0x237   :  { %v2094_v6 = vmul.f32 0.0078125, %v1968_v40  ;;  %v1789_v7 = vmul.f32 0.0078125, %v1678_v2  ;;  %v3955_v13 = vadd.f32 %v3299_v25, %v1548_v61 }
 0x239   :  { %v3159_v12 = vpop.eup %3158  ;;  %v3950_v33 = vadd.f32 1e-05, %v2094_v6  ;;  %v3953_v14 = vsub.f32 %v3780_v52, %v1789_v7  ;;  %v422_v28 = vpop.f32.mrf.mxu0 }
 0x23a   :  { %v631_v36 = vpop.f32.mrf.mxu1  ;;  %v2222_v1 = vmul.f32 %v3159_v12, %v3939_v15  ;;  %v423_v27 = vadd.f32 %v422_v28, %v3599_v17  ;;  %v1013_v47 = vpop.f32.mrf.mxu2  ;;  %vm2228_vm0 = vweird.f32 %v3159_v12 }
 0x23b   :  { %v632_v30 = vadd.f32 %v631_v36, %v3601_v18  ;;  %v1222_v41 = vpop.f32.mrf.mxu3  ;;  %3160 = vrsqrt.f32 %v3950_v33  ;;  %1707 = vadd.xlane.f32.xlu1 %v3955_v13  ;;  %v1917_v52 = vmul.f32 %v3953_v14, %v3953_v14  ;;  %vm2229_vm2 = vmor %vm2227_vm1, %vm2228_vm0  ;;  %vm2237_vm4 = vweird.f32 %v3950_v33 }
 0x23c   :  { %v1223_v43 = vadd.f32 %v1222_v41, %v1013_v47  ;;  %v2223_v45 = vmul.f32 %v3159_v12, %v2222_v1  ;;  %v774_v44 = vmax.f32 %v423_v27, 0.0  ;;  %v3976_v27 = vld [vmem:[%s4758_s5] ss:$0 sm:$0xff] }
 0x23d   :  { %v775_v37 = vmax.f32 %v632_v30, 0.0  ;;  %1997 = vadd.xlane.f32.xlu2 %v1917_v52  ;;  %v3300_v47 = vld [vmem:[#allocation3 + $0x100] sm:$0xff] }
 0x23e   :  { %v2224_v53 = vmul.f32 0.5, %v2223_v45  ;;  %v1970_v58 = vpop.xlane.xlu0 %1969  ;;  %v1680_v3 = vpop.xlane.xlu2 %1679  ;;  %1063 = vmatmul.f32.gmra.mxu2 %v774_v44  ;;  %v1549_v23 = vadd.f32 %v3900_v21, %v1223_v43  ;;  %v3987_v44 = vld [vmem:[%s4759_s6] ss:$0 sm:$0xff] }
 0x23f   :  { %1272 = vmatmul.f32.gmra.mxu3 %v775_v37  ;;  %v2095_v8 = vmul.f32 0.0078125, %v1970_v58  ;;  %v1790_v32 = vmul.f32 0.0078125, %v1680_v3 }
 0x240   :  { %v2225_v56 = vsub.f32 1.5, %v2224_v53  ;;  %v3980_v41 = vadd.f32 %v3300_v47, %v1549_v23 }
 0x241   :  { %v3161_v60 = vpop.eup %3160  ;;  %v3965_v61 = vadd.f32 1e-05, %v2095_v8  ;;  %v3968_v40 = vsub.f32 %v3792_v5, %v1790_v32  ;;  %v425_v2 = vpop.f32.mrf.mxu0 }
 0x242   :  { %v634_v6 = vpop.f32.mrf.mxu1  ;;  %v2226_v7 = vmul.f32 %v3159_v12, %v2225_v56  ;;  %v2232_v28 = vmul.f32 %v3161_v60, %v3950_v33  ;;  %v426_v36 = vadd.f32 %v425_v2, %v3599_v17  ;;  %v1016_v25 = vpop.f32.mrf.mxu2  ;;  %vm2238_vm3 = vweird.f32 %v3161_v60 }
 0x243   :  { %v1225_v1 = vpop.f32.mrf.mxu3  ;;  %3162 = vrsqrt.f32 %v3965_v61  ;;  %v635_v5 = vadd.f32 %v634_v6, %v3601_v18  ;;  %v1918_v45 = vmul.f32 %v3968_v40, %v3968_v40  ;;  %vm2239_vm5 = vmor %vm2237_vm4, %vm2238_vm3  ;;  %vm2247_vm7 = vweird.f32 %v3965_v61 }
 0x244   :  { %v1226_v30 = vadd.f32 %v1225_v1, %v1016_v25  ;;  %v2230_v15 = vsel %vm2229_vm2, %v3159_v12, %v2226_v7  ;;  %v2233_v43 = vmul.f32 %v3161_v60, %v2232_v28  ;;  %v776_v52 = vmax.f32 %v426_v36, 0.0 }
 0x245   :  { %v2861_v37 = vmul.f32 %v2230_v15, %v3763_v22  ;;  %v777_v53 = vmax.f32 %v635_v5, 0.0  ;;  %1709 = vadd.xlane.f32.xlu2 %v3980_v41  ;;  %1999 = vadd.xlane.f32.xlu0 %v1918_v45 }
 0x246   :  { %v2234_v58 = vmul.f32 0.5, %v2233_v43  ;;  %v1972_v3 = vpop.xlane.xlu1 %1971  ;;  %v1682_v8 = vpop.xlane.xlu0 %1681  ;;  %1066 = vmatmul.f32.gmra.mxu2 %v776_v52  ;;  %v1550_v56 = vadd.f32 %v3900_v21, %v1226_v30 }
 0x247   :  { %v2929_v12 = vmul.f32 %v3976_v27, %v2861_v37  ;;  %v2096_v32 = vmul.f32 0.0078125, %v1972_v3  ;;  %v1791_v23 = vmul.f32 0.0078125, %v1682_v8  ;;  %1275 = vmatmul.f32.gmra.mxu3 %v777_v53 }
 0x248   :  { %v2235_v2 = vsub.f32 1.5, %v2234_v58 }
 0x249   :  { %v3163_v6 = vpop.eup %3162  ;;  %v2997_v22 = vadd.f32 %v3987_v44, %v2929_v12  ;;  %v3994_v7 = vadd.f32 1e-05, %v2096_v32  ;;  %v3997_v28 = vsub.f32 %v3804_v29, %v1791_v23  ;;  %v428_v36 = vpop.f32.mrf.mxu0  ;;  %v3301_v29 = vld [vmem:[#allocation3 + $0x108] sm:$0xff] }
 0x24a   :  { %v637_v25 = vpop.f32.mrf.mxu1  ;;  %v2236_v1 = vmul.f32 %v3161_v60, %v2235_v2  ;;  %v2242_v5 = vmul.f32 %v3163_v6, %v3965_v61  ;;  %v429_v47 = vadd.f32 %v428_v36, %v3599_v17  ;;  %v1019_v30 = vpop.f32.mrf.mxu2  ;;  %v4004_v45 = vadd.f32 %v3301_v29, %v1550_v56 }
 0x24b   :  { %v1228_v15 = vpop.f32.mrf.mxu3  ;;  %3061 = vst [vmem:[#allocation11] sm:$0xff] %v2997_v22  ;;  %3164 = vrsqrt.f32 %v3994_v7  ;;  %v638_v43 = vadd.f32 %v637_v25, %v3601_v18  ;;  %v1919_v33 = vmul.f32 %v3997_v28, %v3997_v28  ;;  %vm2248_vm6 = vweird.f32 %v3163_v6 }
 0x24c   :  { %v1229_v52 = vadd.f32 %v1228_v15, %v1019_v30  ;;  %v2240_v37 = vsel %vm2239_vm5, %v3161_v60, %v2236_v1  ;;  %v2243_v53 = vmul.f32 %v3163_v6, %v2242_v5  ;;  %v778_v58 = vmax.f32 %v429_v47, 0.0  ;;  %vm2249_vm8 = vmor %vm2247_vm7, %vm2248_vm6 }
 0x24d   :  { %v2862_v3 = vmul.f32 %v2240_v37, %v3775_v48  ;;  %v779_v8 = vmax.f32 %v638_v43, 0.0  ;;  %2001 = vadd.xlane.f32.xlu1 %v1919_v33  ;;  %1711 = vadd.xlane.f32.xlu0 %v4004_v45  ;;  %vm2257_vm10 = vweird.f32 %v3994_v7 }
 0x24e   :  { %v2244_v12 = vmul.f32 0.5, %v2243_v53  ;;  %v1974_v32 = vpop.xlane.xlu2 %1973  ;;  %v1684_v23 = vpop.xlane.xlu1 %1683  ;;  %1069 = vmatmul.f32.gmra.mxu2 %v778_v58  ;;  %v1551_v60 = vadd.f32 %v3900_v21, %v1229_v52 }
 0x24f   :  { %v2930_v2 = vmul.f32 %v3976_v27, %v2862_v3  ;;  %v2097_v22 = vmul.f32 0.0078125, %v1974_v32  ;;  %v1792_v56 = vmul.f32 0.0078125, %v1684_v23  ;;  %1278 = vmatmul.f32.gmra.mxu3 %v779_v8 }
 0x250   :  { %v2245_v36 = vsub.f32 1.5, %v2244_v12 }
 0x251   :  { %v3165_v25 = vpop.eup %3164  ;;  %v2998_v48 = vadd.f32 %v3987_v44, %v2930_v2  ;;  %v4013_v1 = vadd.f32 1e-05, %v2097_v22  ;;  %v4016_v5 = vsub.f32 %v3815_v55, %v1792_v56  ;;  %v431_v47 = vpop.f32.mrf.mxu0  ;;  %v3302_v55 = vld [vmem:[#allocation3 + $0x110] sm:$0xff] }
 0x252   :  { %v640_v30 = vpop.f32.mrf.mxu1  ;;  %v2246_v15 = vmul.f32 %v3163_v6, %v2245_v36  ;;  %v2252_v43 = vmul.f32 %v3165_v25, %v3994_v7  ;;  %v432_v29 = vadd.f32 %v431_v47, %v3599_v17  ;;  %v1022_v52 = vpop.f32.mrf.mxu2  ;;  %v4023_v33 = vadd.f32 %v3302_v55, %v1551_v60 }
 0x253   :  { %v1231_v37 = vpop.f32.mrf.mxu3  ;;  %3062 = vst [vmem:[#allocation11 + $0x8] sm:$0xff] %v2998_v48  ;;  %3166 = vrsqrt.f32 %v4013_v1  ;;  %v641_v53 = vadd.f32 %v640_v30, %v3601_v18  ;;  %v1920_v61 = vmul.f32 %v4016_v5, %v4016_v5  ;;  %vm2258_vm9 = vweird.f32 %v3165_v25 }
 0x254   :  { %v1232_v58 = vadd.f32 %v1231_v37, %v1022_v52  ;;  %v2250_v3 = vsel %vm2249_vm8, %v3163_v6, %v2246_v15  ;;  %v2253_v8 = vmul.f32 %v3165_v25, %v2252_v43  ;;  %v780_v12 = vmax.f32 %v432_v29, 0.0  ;;  %vm2259_vm11 = vmor %vm2257_vm10, %vm2258_vm9 }
 0x255   :  { %v2863_v32 = vmul.f32 %v2250_v3, %v3787_v63  ;;  %v781_v23 = vmax.f32 %v641_v53, 0.0  ;;  %2003 = vadd.xlane.f32.xlu2 %v1920_v61  ;;  %1713 = vadd.xlane.f32.xlu1 %v4023_v33  ;;  %vm2267_vm13 = vweird.f32 %v4013_v1 }
 0x256   :  { %v2254_v2 = vmul.f32 0.5, %v2253_v8  ;;  %v1976_v22 = vpop.xlane.xlu0 %1975  ;;  %v1686_v56 = vpop.xlane.xlu2 %1685  ;;  %1072 = vmatmul.f32.gmra.mxu2 %v780_v12  ;;  %v1552_v6 = vadd.f32 %v3900_v21, %v1232_v58 }
 0x257   :  { %v2931_v36 = vmul.f32 %v3976_v27, %v2863_v32  ;;  %v2098_v48 = vmul.f32 0.0078125, %v1976_v22  ;;  %v1793_v60 = vmul.f32 0.0078125, %v1686_v56  ;;  %1281 = vmatmul.f32.gmra.mxu3 %v781_v23 }
 0x258   :  { %v2255_v47 = vsub.f32 1.5, %v2254_v2 }
 0x259   :  { %v3167_v30 = vpop.eup %3166  ;;  %v2999_v63 = vadd.f32 %v3987_v44, %v2931_v36  ;;  %v4032_v15 = vadd.f32 1e-05, %v2098_v48  ;;  %v4035_v43 = vsub.f32 %v3826_v11, %v1793_v60  ;;  %v434_v29 = vpop.f32.mrf.mxu0  ;;  %v3303_v11 = vld [vmem:[#allocation3 + $0x118] sm:$0xff] }
 0x25a   :  { %v643_v52 = vpop.f32.mrf.mxu1  ;;  %v2256_v37 = vmul.f32 %v3165_v25, %v2255_v47  ;;  %v2262_v53 = vmul.f32 %v3167_v30, %v4013_v1  ;;  %v435_v55 = vadd.f32 %v434_v29, %v3599_v17  ;;  %v1025_v58 = vpop.f32.mrf.mxu2  ;;  %v4042_v61 = vadd.f32 %v3303_v11, %v1552_v6 }
 0x25b   :  { %v1234_v3 = vpop.f32.mrf.mxu3  ;;  %3063 = vst [vmem:[#allocation11 + $0x10] sm:$0xff] %v2999_v63  ;;  %3168 = vrsqrt.f32 %v4032_v15  ;;  %v644_v8 = vadd.f32 %v643_v52, %v3601_v18  ;;  %v1921_v7 = vmul.f32 %v4035_v43, %v4035_v43  ;;  %vm2268_vm12 = vweird.f32 %v3167_v30 }
 0x25c   :  { %v1235_v12 = vadd.f32 %v1234_v3, %v1025_v58  ;;  %v2260_v32 = vsel %vm2259_vm11, %v3165_v25, %v2256_v37  ;;  %v2263_v23 = vmul.f32 %v3167_v30, %v2262_v53  ;;  %v782_v2 = vmax.f32 %v435_v55, 0.0  ;;  %vm2269_vm14 = vmor %vm2267_vm13, %vm2268_vm12 }
 0x25d   :  { %v2864_v22 = vmul.f32 %v2260_v32, %v3799_v24  ;;  %v783_v56 = vmax.f32 %v644_v8, 0.0  ;;  %2005 = vadd.xlane.f32.xlu0 %v1921_v7  ;;  %1715 = vadd.xlane.f32.xlu2 %v4042_v61  ;;  %vm2277_vm0 = vweird.f32 %v4032_v15 }
 0x25e   :  { %v2264_v36 = vmul.f32 0.5, %v2263_v23  ;;  %v1978_v48 = vpop.xlane.xlu1 %1977  ;;  %v1688_v60 = vpop.xlane.xlu0 %1687  ;;  %1075 = vmatmul.f32.gmra.mxu2 %v782_v2  ;;  %v1553_v25 = vadd.f32 %v3900_v21, %v1235_v12 }
 0x25f   :  { %v2932_v47 = vmul.f32 %v3976_v27, %v2864_v22  ;;  %v2099_v63 = vmul.f32 0.0078125, %v1978_v48  ;;  %v1794_v6 = vmul.f32 0.0078125, %v1688_v60  ;;  %1284 = vmatmul.f32.gmra.mxu3 %v783_v56 }
 0x260   :  { %v2265_v29 = vsub.f32 1.5, %v2264_v36 }
 0x261   :  { %v3169_v52 = vpop.eup %3168  ;;  %v3000_v24 = vadd.f32 %v3987_v44, %v2932_v47  ;;  %v4051_v37 = vadd.f32 1e-05, %v2099_v63  ;;  %v4054_v53 = vsub.f32 %v3837_v34, %v1794_v6  ;;  %v437_v55 = vpop.f32.mrf.mxu0  ;;  %v3304_v34 = vld [vmem:[#allocation3 + $0x120] sm:$0xff] }
 0x262   :  { %v646_v58 = vpop.f32.mrf.mxu1  ;;  %v2266_v3 = vmul.f32 %v3167_v30, %v2265_v29  ;;  %v2272_v8 = vmul.f32 %v3169_v52, %v4032_v15  ;;  %v438_v11 = vadd.f32 %v437_v55, %v3599_v17  ;;  %v1028_v12 = vpop.f32.mrf.mxu2  ;;  %v4061_v7 = vadd.f32 %v3304_v34, %v1553_v25 }
 0x263   :  { %v1237_v32 = vpop.f32.mrf.mxu3  ;;  %3064 = vst [vmem:[#allocation11 + $0x18] sm:$0xff] %v3000_v24  ;;  %3170 = vrsqrt.f32 %v4051_v37  ;;  %v647_v23 = vadd.f32 %v646_v58, %v3601_v18  ;;  %v1922_v1 = vmul.f32 %v4054_v53, %v4054_v53  ;;  %vm2278_vm15 = vweird.f32 %v3169_v52 }
 0x264   :  { %v1238_v2 = vadd.f32 %v1237_v32, %v1028_v12  ;;  %v2270_v22 = vsel %vm2269_vm14, %v3167_v30, %v2266_v3  ;;  %v2273_v56 = vmul.f32 %v3169_v52, %v2272_v8  ;;  %v784_v36 = vmax.f32 %v438_v11, 0.0  ;;  %vm2279_vm1 = vmor %vm2277_vm0, %vm2278_vm15 }
 0x265   :  { %v2865_v48 = vmul.f32 %v2270_v22, %v3811_v49  ;;  %v785_v60 = vmax.f32 %v647_v23, 0.0  ;;  %2007 = vadd.xlane.f32.xlu1 %v1922_v1  ;;  %1717 = vadd.xlane.f32.xlu0 %v4061_v7  ;;  %vm2287_vm3 = vweird.f32 %v4051_v37 }
 0x266   :  { %v2274_v47 = vmul.f32 0.5, %v2273_v56  ;;  %v1980_v63 = vpop.xlane.xlu2 %1979  ;;  %v1690_v6 = vpop.xlane.xlu1 %1689  ;;  %1078 = vmatmul.f32.gmra.mxu2 %v784_v36  ;;  %v1554_v30 = vadd.f32 %v3900_v21, %v1238_v2 }
 0x267   :  { %v2933_v29 = vmul.f32 %v3976_v27, %v2865_v48  ;;  %v2100_v24 = vmul.f32 0.0078125, %v1980_v63  ;;  %v1795_v25 = vmul.f32 0.0078125, %v1690_v6  ;;  %1287 = vmatmul.f32.gmra.mxu3 %v785_v60 }
 0x268   :  { %v2275_v55 = vsub.f32 1.5, %v2274_v47 }
 0x269   :  { %v3171_v58 = vpop.eup %3170  ;;  %v3001_v49 = vadd.f32 %v3987_v44, %v2933_v29  ;;  %v4070_v3 = vadd.f32 1e-05, %v2100_v24  ;;  %v4073_v8 = vsub.f32 %v3848_v62, %v1795_v25  ;;  %v440_v11 = vpop.f32.mrf.mxu0  ;;  %v3305_v62 = vld [vmem:[#allocation3 + $0x128] sm:$0xff] }
 0x26a   :  { %v649_v12 = vpop.f32.mrf.mxu1  ;;  %v2276_v32 = vmul.f32 %v3169_v52, %v2275_v55  ;;  %v2282_v23 = vmul.f32 %v3171_v58, %v4051_v37  ;;  %v441_v34 = vadd.f32 %v440_v11, %v3599_v17  ;;  %v1031_v2 = vpop.f32.mrf.mxu2  ;;  %v4080_v1 = vadd.f32 %v3305_v62, %v1554_v30 }
 0x26b   :  { %v1240_v22 = vpop.f32.mrf.mxu3  ;;  %3065 = vst [vmem:[#allocation11 + $0x20] sm:$0xff] %v3001_v49  ;;  %3172 = vrsqrt.f32 %v4070_v3  ;;  %v650_v56 = vadd.f32 %v649_v12, %v3601_v18  ;;  %v1923_v15 = vmul.f32 %v4073_v8, %v4073_v8  ;;  %vm2288_vm2 = vweird.f32 %v3171_v58 }
 0x26c   :  { %v1241_v36 = vadd.f32 %v1240_v22, %v1031_v2  ;;  %v2280_v48 = vsel %vm2279_vm1, %v3169_v52, %v2276_v32  ;;  %v2283_v60 = vmul.f32 %v3171_v58, %v2282_v23  ;;  %v786_v47 = vmax.f32 %v441_v34, 0.0  ;;  %vm2289_vm4 = vmor %vm2287_vm3, %vm2288_vm2 }
 0x26d   :  { %v2866_v63 = vmul.f32 %v2280_v48, %v3822_v4  ;;  %v787_v6 = vmax.f32 %v650_v56, 0.0  ;;  %2009 = vadd.xlane.f32.xlu2 %v1923_v15  ;;  %1719 = vadd.xlane.f32.xlu1 %v4080_v1  ;;  %vm2297_vm6 = vweird.f32 %v4070_v3 }
 0x26e   :  { %v2284_v29 = vmul.f32 0.5, %v2283_v60  ;;  %v1982_v24 = vpop.xlane.xlu0 %1981  ;;  %v1692_v25 = vpop.xlane.xlu2 %1691  ;;  %1081 = vmatmul.f32.gmra.mxu2 %v786_v47  ;;  %v1555_v52 = vadd.f32 %v3900_v21, %v1241_v36 }
 0x26f   :  { %v2934_v55 = vmul.f32 %v3976_v27, %v2866_v63  ;;  %v2101_v49 = vmul.f32 0.0078125, %v1982_v24  ;;  %v1796_v30 = vmul.f32 0.0078125, %v1692_v25  ;;  %1290 = vmatmul.f32.gmra.mxu3 %v787_v6 }
 0x270   :  { %v2285_v11 = vsub.f32 1.5, %v2284_v29 }
 0x271   :  { %v3173_v12 = vpop.eup %3172  ;;  %v3002_v4 = vadd.f32 %v3987_v44, %v2934_v55  ;;  %v4089_v32 = vadd.f32 1e-05, %v2101_v49  ;;  %v4092_v23 = vsub.f32 %v3859_v26, %v1796_v30  ;;  %v443_v34 = vpop.f32.mrf.mxu0  ;;  %v3306_v26 = vld [vmem:[#allocation3 + $0x130] sm:$0xff] }
 0x272   :  { %v652_v2 = vpop.f32.mrf.mxu1  ;;  %v2286_v22 = vmul.f32 %v3171_v58, %v2285_v11  ;;  %v2292_v56 = vmul.f32 %v3173_v12, %v4070_v3  ;;  %v444_v62 = vadd.f32 %v443_v34, %v3599_v17  ;;  %v1034_v36 = vpop.f32.mrf.mxu2  ;;  %v4099_v15 = vadd.f32 %v3306_v26, %v1555_v52 }
 0x273   :  { %v1243_v48 = vpop.f32.mrf.mxu3  ;;  %3066 = vst [vmem:[#allocation11 + $0x28] sm:$0xff] %v3002_v4  ;;  %3174 = vrsqrt.f32 %v4089_v32  ;;  %v653_v60 = vadd.f32 %v652_v2, %v3601_v18  ;;  %v1924_v37 = vmul.f32 %v4092_v23, %v4092_v23  ;;  %vm2298_vm5 = vweird.f32 %v3173_v12 }
 0x274   :  { %v1244_v47 = vadd.f32 %v1243_v48, %v1034_v36  ;;  %v2290_v63 = vsel %vm2289_vm4, %v3171_v58, %v2286_v22  ;;  %v2293_v6 = vmul.f32 %v3173_v12, %v2292_v56  ;;  %v788_v29 = vmax.f32 %v444_v62, 0.0  ;;  %vm2299_vm7 = vmor %vm2297_vm6, %vm2298_vm5 }
 0x275   :  { %v2867_v24 = vmul.f32 %v2290_v63, %v3833_v31  ;;  %v789_v25 = vmax.f32 %v653_v60, 0.0  ;;  %2011 = vadd.xlane.f32.xlu0 %v1924_v37  ;;  %1721 = vadd.xlane.f32.xlu2 %v4099_v15  ;;  %vm2307_vm9 = vweird.f32 %v4089_v32 }
 0x276   :  { %v2294_v55 = vmul.f32 0.5, %v2293_v6  ;;  %v1984_v49 = vpop.xlane.xlu1 %1983  ;;  %v1694_v30 = vpop.xlane.xlu0 %1693  ;;  %1084 = vmatmul.f32.gmra.mxu2 %v788_v29  ;;  %v1556_v58 = vadd.f32 %v3900_v21, %v1244_v47 }
 0x277   :  { %v2935_v11 = vmul.f32 %v3976_v27, %v2867_v24  ;;  %v2102_v4 = vmul.f32 0.0078125, %v1984_v49  ;;  %v1797_v52 = vmul.f32 0.0078125, %v1694_v30  ;;  %1293 = vmatmul.f32.gmra.mxu3 %v789_v25 }
 0x278   :  { %v2295_v34 = vsub.f32 1.5, %v2294_v55 }
 0x279   :  { %v3175_v2 = vpop.eup %3174  ;;  %v3003_v31 = vadd.f32 %v3987_v44, %v2935_v11  ;;  %v4108_v22 = vadd.f32 1e-05, %v2102_v4  ;;  %v4111_v56 = vsub.f32 %v3870_v57, %v1797_v52  ;;  %v446_v62 = vpop.f32.mrf.mxu0  ;;  %v3307_v57 = vld [vmem:[#allocation3 + $0x138] sm:$0xff] }
 0x27a   :  { %v655_v36 = vpop.f32.mrf.mxu1  ;;  %v2296_v48 = vmul.f32 %v3173_v12, %v2295_v34  ;;  %v2302_v60 = vmul.f32 %v3175_v2, %v4089_v32  ;;  %v447_v26 = vadd.f32 %v446_v62, %v3599_v17  ;;  %v1037_v47 = vpop.f32.mrf.mxu2  ;;  %v4118_v37 = vadd.f32 %v3307_v57, %v1556_v58 }
 0x27b   :  { %v1246_v63 = vpop.f32.mrf.mxu3  ;;  %3067 = vst [vmem:[#allocation11 + $0x30] sm:$0xff] %v3003_v31  ;;  %3176 = vrsqrt.f32 %v4108_v22  ;;  %v656_v6 = vadd.f32 %v655_v36, %v3601_v18  ;;  %v1925_v3 = vmul.f32 %v4111_v56, %v4111_v56  ;;  %vm2308_vm8 = vweird.f32 %v3175_v2 }
 0x27c   :  { %v1247_v29 = vadd.f32 %v1246_v63, %v1037_v47  ;;  %v2300_v24 = vsel %vm2299_vm7, %v3173_v12, %v2296_v48  ;;  %v2303_v25 = vmul.f32 %v3175_v2, %v2302_v60  ;;  %v790_v55 = vmax.f32 %v447_v26, 0.0  ;;  %vm2309_vm10 = vmor %vm2307_vm9, %vm2308_vm8 }
 0x27d   :  { %v2868_v49 = vmul.f32 %v2300_v24, %v3844_v59  ;;  %v791_v30 = vmax.f32 %v656_v6, 0.0  ;;  %2013 = vadd.xlane.f32.xlu1 %v1925_v3  ;;  %1723 = vadd.xlane.f32.xlu0 %v4118_v37  ;;  %vm2317_vm12 = vweird.f32 %v4108_v22 }
 0x27e   :  { %v2304_v11 = vmul.f32 0.5, %v2303_v25  ;;  %v1986_v4 = vpop.xlane.xlu2 %1985  ;;  %v1696_v52 = vpop.xlane.xlu1 %1695  ;;  %v1557_v58 = vadd.f32 %v3900_v21, %v1247_v29  ;;  %1087 = vmatmul.f32.gmra.mxu2 %v790_v55 }
 0x27f   :  { %v2936_v34 = vmul.f32 %v3976_v27, %v2868_v49  ;;  %v2103_v31 = vmul.f32 0.0078125, %v1986_v4  ;;  %v1798_v12 = vmul.f32 0.0078125, %v1696_v52  ;;  %1296 = vmatmul.f32.gmra.mxu3 %v791_v30 }
 0x280   :  { %v2305_v62 = vsub.f32 1.5, %v2304_v11 }
 0x281   :  { %v3177_v36 = vpop.eup %3176  ;;  %v3004_v59 = vadd.f32 %v3987_v44, %v2936_v34  ;;  %v4127_v48 = vadd.f32 1e-05, %v2103_v31  ;;  %v4130_v60 = vsub.f32 %v3881_v19, %v1798_v12  ;;  %v449_v26 = vpop.f32.mrf.mxu0  ;;  %v3308_v19 = vld [vmem:[#allocation3 + $0x140] sm:$0xff] }
 0x282   :  { %v658_v47 = vpop.f32.mrf.mxu1  ;;  %v2306_v63 = vmul.f32 %v3175_v2, %v2305_v62  ;;  %v2312_v6 = vmul.f32 %v3177_v36, %v4108_v22  ;;  %v450_v29 = vadd.f32 %v449_v26, %v3599_v17  ;;  %v1040_v57 = vpop.f32.mrf.mxu2  ;;  %v4137_v3 = vadd.f32 %v3308_v19, %v1557_v58 }
 0x283   :  { %v1249_v24 = vpop.f32.mrf.mxu3  ;;  %3068 = vst [vmem:[#allocation11 + $0x38] sm:$0xff] %v3004_v59  ;;  %3178 = vrsqrt.f32 %v4127_v48  ;;  %v659_v25 = vadd.f32 %v658_v47, %v3601_v18  ;;  %v1926_v32 = vmul.f32 %v4130_v60, %v4130_v60  ;;  %vm2318_vm11 = vweird.f32 %v3177_v36 }
 0x284   :  { %v1250_v55 = vadd.f32 %v1249_v24, %v1040_v57  ;;  %v2310_v49 = vsel %vm2309_vm10, %v3175_v2, %v2306_v63  ;;  %v2313_v30 = vmul.f32 %v3177_v36, %v2312_v6  ;;  %v792_v11 = vmax.f32 %v450_v29, 0.0  ;;  %vm2319_vm13 = vmor %vm2317_vm12, %vm2318_vm11 }
 0x285   :  { %v2869_v4 = vmul.f32 %v2310_v49, %v3855_v20  ;;  %v793_v52 = vmax.f32 %v659_v25, 0.0  ;;  %2015 = vadd.xlane.f32.xlu2 %v1926_v32  ;;  %1725 = vadd.xlane.f32.xlu1 %v4137_v3  ;;  %vm2327_vm15 = vweird.f32 %v4127_v48 }
 0x286   :  { %v2314_v34 = vmul.f32 0.5, %v2313_v30  ;;  %v1988_v31 = vpop.xlane.xlu0 %1987  ;;  %v1698_v12 = vpop.xlane.xlu2 %1697  ;;  %v1558_v58 = vadd.f32 %v3900_v21, %v1250_v55  ;;  %1090 = vmatmul.f32.gmra.mxu2 %v792_v11 }
 0x287   :  { %v2937_v62 = vmul.f32 %v3976_v27, %v2869_v4  ;;  %v2104_v59 = vmul.f32 0.0078125, %v1988_v31  ;;  %v1799_v2 = vmul.f32 0.0078125, %v1698_v12  ;;  %1299 = vmatmul.f32.gmra.mxu3 %v793_v52 }
 0x288   :  { %v2315_v26 = vsub.f32 1.5, %v2314_v34 }
 0x289   :  { %v3179_v47 = vpop.eup %3178  ;;  %v3005_v20 = vadd.f32 %v3987_v44, %v2937_v62  ;;  %v4146_v63 = vadd.f32 1e-05, %v2104_v59  ;;  %v4149_v6 = vsub.f32 %v3892_v51, %v1799_v2  ;;  %v452_v29 = vpop.f32.mrf.mxu0  ;;  %v3309_v51 = vld [vmem:[#allocation3 + $0x148] sm:$0xff] }
 0x28a   :  { %v661_v57 = vpop.f32.mrf.mxu1  ;;  %v2316_v24 = vmul.f32 %v3177_v36, %v2315_v26  ;;  %v2322_v25 = vmul.f32 %v3179_v47, %v4127_v48  ;;  %v453_v55 = vadd.f32 %v452_v29, %v3599_v17  ;;  %v1043_v19 = vpop.f32.mrf.mxu2  ;;  %v4156_v32 = vadd.f32 %v3309_v51, %v1558_v58 }
 0x28b   :  { %v1252_v49 = vpop.f32.mrf.mxu3  ;;  %3069 = vst [vmem:[#allocation11 + $0x40] sm:$0xff] %v3005_v20  ;;  %3180 = vrsqrt.f32 %v4146_v63  ;;  %v662_v30 = vadd.f32 %v661_v57, %v3601_v18  ;;  %v1927_v22 = vmul.f32 %v4149_v6, %v4149_v6  ;;  %vm2328_vm14 = vweird.f32 %v3179_v47 }
 0x28c   :  { %v1253_v11 = vadd.f32 %v1252_v49, %v1043_v19  ;;  %v2320_v4 = vsel %vm2319_vm13, %v3177_v36, %v2316_v24  ;;  %v2323_v52 = vmul.f32 %v3179_v47, %v2322_v25  ;;  %v794_v34 = vmax.f32 %v453_v55, 0.0  ;;  %vm2329_vm0 = vmor %vm2327_vm15, %vm2328_vm14 }
 0x28d   :  { %v2870_v31 = vmul.f32 %v2320_v4, %v3866_v50  ;;  %v795_v12 = vmax.f32 %v662_v30, 0.0  ;;  %2017 = vadd.xlane.f32.xlu0 %v1927_v22  ;;  %1727 = vadd.xlane.f32.xlu2 %v4156_v32  ;;  %vm2337_vm2 = vweird.f32 %v4146_v63 }
 0x28e   :  { %v2324_v62 = vmul.f32 0.5, %v2323_v52  ;;  %v1990_v59 = vpop.xlane.xlu1 %1989  ;;  %v1700_v2 = vpop.xlane.xlu0 %1699  ;;  %v1559_v58 = vadd.f32 %v3900_v21, %v1253_v11  ;;  %1093 = vmatmul.f32.gmra.mxu2 %v794_v34  ;;  %v3310_v52 = vld [vmem:[#allocation3 + $0x150] sm:$0xff] }
 0x28f   :  { %v2938_v26 = vmul.f32 %v3976_v27, %v2870_v31  ;;  %v2105_v20 = vmul.f32 0.0078125, %v1990_v59  ;;  %v1800_v36 = vmul.f32 0.0078125, %v1700_v2  ;;  %1302 = vmatmul.f32.gmra.mxu3 %v795_v12 }
 0x290   :  { %v2325_v29 = vsub.f32 1.5, %v2324_v62  ;;  %v4178_v34 = vadd.f32 %v3310_v52, %v1559_v58 }
 0x291   :  { %v4164_v57 = vpop.eup %3180  ;;  %v3006_v50 = vadd.f32 %v3987_v44, %v2938_v26  ;;  %v4167_v24 = vadd.f32 1e-05, %v2105_v20  ;;  %v4170_v25 = vsub.f32 %v3908_v10, %v1800_v36  ;;  %v455_v55 = vpop.f32.mrf.mxu0 }
 0x292   :  { %v664_v19 = vpop.f32.mrf.mxu1  ;;  %v2326_v49 = vmul.f32 %v3179_v47, %v2325_v29  ;;  %v2332_v21 = vmul.f32 %v4164_v57, %v4146_v63  ;;  %v456_v30 = vadd.f32 %v455_v55, %v3599_v17  ;;  %v1046_v11 = vpop.f32.mrf.mxu2  ;;  %vm2338_vm1 = vweird.f32 %v4164_v57 }
 0x293   :  { %v1255_v51 = vpop.f32.mrf.mxu3  ;;  %3070 = vst [vmem:[#allocation11 + $0x48] sm:$0xff] %v3006_v50  ;;  %3182 = vrsqrt.f32 %v4167_v24  ;;  %v665_v4 = vadd.f32 %v664_v19, %v3601_v18  ;;  %v1928_v12 = vmul.f32 %v4170_v25, %v4170_v25  ;;  %vm2339_vm3 = vmor %vm2337_vm2, %vm2338_vm1  ;;  %vm2347_vm5 = vweird.f32 %v4167_v24 }
 0x294   :  { %v1256_v10 = vadd.f32 %v1255_v51, %v1046_v11  ;;  %v2330_v22 = vsel %vm2329_vm0, %v3179_v47, %v2326_v49  ;;  %v2333_v48 = vmul.f32 %v4164_v57, %v2332_v21  ;;  %v796_v31 = vmax.f32 %v456_v30, 0.0  ;;  %v4189_v47 = vld [vmem:[%s4757_s4] ss:$0 sm:$0xff] }
 0x295   :  { %v2871_v62 = vmul.f32 %v2330_v22, %v3877_v9  ;;  %v797_v59 = vmax.f32 %v665_v4, 0.0  ;;  %2019 = vadd.xlane.f32.xlu1 %v1928_v12  ;;  %1729 = vadd.xlane.f32.xlu0 %v4178_v34 }
 0x296   :  { %v2334_v2 = vmul.f32 0.5, %v2333_v48  ;;  %v1992_v26 = vpop.xlane.xlu2 %1991  ;;  %v1702_v20 = vpop.xlane.xlu1 %1701  ;;  %v1560_v58 = vadd.f32 %v4189_v47, %v1256_v10  ;;  %1096 = vmatmul.f32.gmra.mxu2 %v796_v31  ;;  %v3312_v31 = vld [vmem:[#allocation3 + $0x158] sm:$0xff] }
 0x297   :  { %v2939_v36 = vmul.f32 %v3976_v27, %v2871_v62  ;;  %v2106_v29 = vmul.f32 0.0078125, %v1992_v26  ;;  %v1801_v50 = vmul.f32 0.0078125, %v1702_v20  ;;  %1305 = vmatmul.f32.gmra.mxu3 %v797_v59 }
 0x298   :  { %v2335_v9 = vsub.f32 1.5, %v2334_v2  ;;  %v4205_v12 = vadd.f32 %v3312_v31, %v1560_v58 }
 0x299   :  { %v3183_v55 = vpop.eup %3182  ;;  %v3007_v19 = vadd.f32 %v3987_v44, %v2939_v36  ;;  %v4194_v49 = vadd.f32 1e-05, %v2106_v29  ;;  %v4197_v21 = vsub.f32 %v3919_v46, %v1801_v50  ;;  %v458_v30 = vpop.f32.mrf.mxu0 }
 0x29a   :  { %v667_v11 = vpop.f32.mrf.mxu1  ;;  %v2336_v51 = vmul.f32 %v4164_v57, %v2335_v9  ;;  %v2342_v4 = vmul.f32 %v3183_v55, %v4167_v24  ;;  %v459_v10 = vadd.f32 %v458_v30, %v3599_v17  ;;  %v1049_v52 = vpop.f32.mrf.mxu2  ;;  %vm2348_vm4 = vweird.f32 %v3183_v55 }
 0x29b   :  { %v1258_v22 = vpop.f32.mrf.mxu3  ;;  %3071 = vst [vmem:[#allocation11 + $0x50] sm:$0xff] %v3007_v19  ;;  %3184 = vrsqrt.f32 %v4194_v49  ;;  %v668_v48 = vadd.f32 %v667_v11, %v3601_v18  ;;  %v1929_v2 = vmul.f32 %v4197_v21, %v4197_v21  ;;  %vm2349_vm6 = vmor %vm2347_vm5, %vm2348_vm4  ;;  %vm2357_vm8 = vweird.f32 %v4194_v49 }
 0x29c   :  { %v1259_v46 = vadd.f32 %v1258_v22, %v1049_v52  ;;  %v2340_v62 = vsel %vm2339_vm3, %v4164_v57, %v2336_v51  ;;  %v2343_v59 = vmul.f32 %v3183_v55, %v2342_v4  ;;  %v798_v63 = vmax.f32 %v459_v10, 0.0 }
 0x29d   :  { %v2872_v26 = vmul.f32 %v2340_v62, %v3888_v39  ;;  %v799_v20 = vmax.f32 %v668_v48, 0.0  ;;  %2021 = vadd.xlane.f32.xlu2 %v1929_v2  ;;  %1731 = vadd.xlane.f32.xlu1 %v4205_v12 }
 0x29e   :  { %v2344_v36 = vmul.f32 0.5, %v2343_v59  ;;  %v1994_v29 = vpop.xlane.xlu0 %1993  ;;  %v1704_v50 = vpop.xlane.xlu2 %1703  ;;  %v1561_v58 = vadd.f32 %v4189_v47, %v1259_v46  ;;  %1099 = vmatmul.f32.gmra.mxu2 %v798_v63 }
 0x29f   :  { %v2940_v9 = vmul.f32 %v3976_v27, %v2872_v26  ;;  %v2107_v19 = vmul.f32 0.0078125, %v1994_v29  ;;  %v1802_v57 = vmul.f32 0.0078125, %v1704_v50  ;;  %1308 = vmatmul.f32.gmra.mxu3 %v799_v20 }
 0x2a0   :  { %v2345_v30 = vsub.f32 1.5, %v2344_v36 }
 0x2a1   :  { %v3185_v11 = vpop.eup %3184  ;;  %v3008_v39 = vadd.f32 %v3987_v44, %v2940_v9  ;;  %v4215_v51 = vadd.f32 1e-05, %v2107_v19  ;;  %v4218_v4 = vsub.f32 %v3930_v38, %v1802_v57  ;;  %v461_v10 = vpop.f32.mrf.mxu0  ;;  %v3313_v38 = vld [vmem:[#allocation3 + $0x160] sm:$0xff] }
 0x2a2   :  { %v670_v52 = vpop.f32.mrf.mxu1  ;;  %v2346_v22 = vmul.f32 %v3183_v55, %v2345_v30  ;;  %v2352_v48 = vmul.f32 %v3185_v11, %v4194_v49  ;;  %v462_v46 = vadd.f32 %v461_v10, %v3599_v17  ;;  %v1052_v31 = vpop.f32.mrf.mxu2  ;;  %v4225_v2 = vadd.f32 %v3313_v38, %v1561_v58 }
 0x2a3   :  { %v1261_v62 = vpop.f32.mrf.mxu3  ;;  %3072 = vst [vmem:[#allocation11 + $0x58] sm:$0xff] %v3008_v39  ;;  %3186 = vrsqrt.f32 %v4215_v51  ;;  %v671_v59 = vadd.f32 %v670_v52, %v3601_v18  ;;  %v1930_v24 = vmul.f32 %v4218_v4, %v4218_v4  ;;  %vm2358_vm7 = vweird.f32 %v3185_v11 }
 0x2a4   :  { %v1262_v63 = vadd.f32 %v1261_v62, %v1052_v31  ;;  %v2350_v26 = vsel %vm2349_vm6, %v3183_v55, %v2346_v22  ;;  %v2353_v20 = vmul.f32 %v3185_v11, %v2352_v48  ;;  %v800_v36 = vmax.f32 %v462_v46, 0.0  ;;  %vm2359_vm9 = vmor %vm2357_vm8, %vm2358_vm7 }
 0x2a5   :  { %v2873_v29 = vmul.f32 %v2350_v26, %v3904_v0  ;;  %v801_v50 = vmax.f32 %v671_v59, 0.0  ;;  %2023 = vadd.xlane.f32.xlu0 %v1930_v24  ;;  %1733 = vadd.xlane.f32.xlu2 %v4225_v2  ;;  %vm2367_vm11 = vweird.f32 %v4215_v51 }
 0x2a6   :  { %v2354_v9 = vmul.f32 0.5, %v2353_v20  ;;  %v1996_v19 = vpop.xlane.xlu1 %1995  ;;  %v1706_v57 = vpop.xlane.xlu0 %1705  ;;  %v1562_v58 = vadd.f32 %v4189_v47, %v1262_v63  ;;  %1102 = vmatmul.f32.gmra.mxu2 %v800_v36 }
 0x2a7   :  { %v2941_v30 = vmul.f32 %v3976_v27, %v2873_v29  ;;  %v2108_v39 = vmul.f32 0.0078125, %v1996_v19  ;;  %v1803_v55 = vmul.f32 0.0078125, %v1706_v57  ;;  %1311 = vmatmul.f32.gmra.mxu3 %v801_v50 }
 0x2a8   :  { %v2355_v10 = vsub.f32 1.5, %v2354_v9 }
 0x2a9   :  { %v3187_v52 = vpop.eup %3186  ;;  %v3009_v0 = vadd.f32 %v3987_v44, %v2941_v30  ;;  %v4234_v22 = vadd.f32 1e-05, %v2108_v39  ;;  %v4237_v48 = vsub.f32 %v3943_v54, %v1803_v55  ;;  %v464_v46 = vpop.f32.mrf.mxu0  ;;  %v3314_v54 = vld [vmem:[#allocation3 + $0x168] sm:$0xff] }
 0x2aa   :  { %v673_v31 = vpop.f32.mrf.mxu1  ;;  %v2356_v62 = vmul.f32 %v3185_v11, %v2355_v10  ;;  %v2362_v59 = vmul.f32 %v3187_v52, %v4215_v51  ;;  %v465_v63 = vadd.f32 %v464_v46, %v3599_v17  ;;  %v1055_v38 = vpop.f32.mrf.mxu2  ;;  %v4244_v24 = vadd.f32 %v3314_v54, %v1562_v58 }
 0x2ab   :  { %v1264_v26 = vpop.f32.mrf.mxu3  ;;  %3073 = vst [vmem:[#allocation11 + $0x60] sm:$0xff] %v3009_v0  ;;  %3188 = vrsqrt.f32 %v4234_v22  ;;  %v674_v20 = vadd.f32 %v673_v31, %v3601_v18  ;;  %v1931_v49 = vmul.f32 %v4237_v48, %v4237_v48  ;;  %vm2368_vm10 = vweird.f32 %v3187_v52 }
 0x2ac   :  { %v1265_v36 = vadd.f32 %v1264_v26, %v1055_v38  ;;  %v2360_v29 = vsel %vm2359_vm9, %v3185_v11, %v2356_v62  ;;  %v2363_v50 = vmul.f32 %v3187_v52, %v2362_v59  ;;  %v802_v9 = vmax.f32 %v465_v63, 0.0  ;;  %vm2369_vm12 = vmor %vm2367_vm11, %vm2368_vm10 }
 0x2ad   :  { %v2874_v17 = vmul.f32 %v2360_v29, %v3915_v42  ;;  %v803_v19 = vmax.f32 %v674_v20, 0.0  ;;  %2025 = vadd.xlane.f32.xlu1 %v1931_v49  ;;  %1735 = vadd.xlane.f32.xlu0 %v4244_v24  ;;  %v4267_v29 = vld [vmem:[%s4758_s5] ss:$0 sm:$0xff]  ;;  %vm2377_vm14 = vweird.f32 %v4234_v22 }
 0x2ae   :  { %v2364_v57 = vmul.f32 0.5, %v2363_v50  ;;  %v1708_v30 = vpop.xlane.xlu1 %1707  ;;  %1105 = vmatmul.f32.gmra.mxu2 %v802_v9  ;;  %v1563_v11 = vadd.f32 %v4189_v47, %v1265_v36  ;;  %v3315_v36 = vld [vmem:[#allocation3 + $0x170] sm:$0xff] }
 0x2af   :  { %v2942_v18 = vmul.f32 %v3976_v27, %v2874_v17  ;;  %v1804_v39 = vmul.f32 0.0078125, %v1708_v30  ;;  %1314 = vmatmul.f32.gmra.mxu3 %v803_v19 }
 0x2b0   :  { %v2365_v58 = vsub.f32 1.5, %v2364_v57  ;;  %v1998_v55 = vpop.xlane.xlu2 %1997 }
 0x2b1   :  { %v3189_v10 = vpop.eup %3188  ;;  %v3010_v0 = vadd.f32 %v3987_v44, %v2942_v18  ;;  %v4254_v42 = vsub.f32 %v3955_v13, %v1804_v39  ;;  %v2109_v46 = vmul.f32 0.0078125, %v1998_v55  ;;  %v4260_v13 = vadd.f32 %v3315_v36, %v1563_v11 }
 0x2b2   :  { %v2366_v31 = vmul.f32 %v3187_v52, %v2365_v58  ;;  %v2372_v27 = vmul.f32 %v3189_v10, %v4234_v22  ;;  %v1058_v62 = vpop.f32.mrf.mxu2  ;;  %vm2378_vm13 = vweird.f32 %v3189_v10 }
 0x2b3   :  { %v1267_v59 = vpop.f32.mrf.mxu3  ;;  %3074 = vst [vmem:[#allocation11 + $0x68] sm:$0xff] %v3010_v0  ;;  %v2173_v63 = vadd.f32 1e-05, %v2109_v46  ;;  %v1932_v26 = vmul.f32 %v4254_v42, %v4254_v42  ;;  %vm2379_vm15 = vmor %vm2377_vm14, %vm2378_vm13  ;;  %v3318_v0 = vld [vmem:[#allocation3 + $0x178] sm:$0xff] }
 0x2b4   :  { %v1268_v38 = vadd.f32 %v1267_v59, %v1058_v62  ;;  %v2370_v20 = vsel %vm2369_vm12, %v3187_v52, %v2366_v31  ;;  %v2373_v44 = vmul.f32 %v3189_v10, %v2372_v27 }
 0x2b5   :  { %v2875_v54 = vmul.f32 %v2370_v20, %v3926_v35  ;;  %3190 = vrsqrt.f32 %v2173_v63  ;;  %2027 = vadd.xlane.f32.xlu2 %v1932_v26  ;;  %1737 = vadd.xlane.f32.xlu1 %v4260_v13  ;;  %v4274_v35 = vld [vmem:[%s4759_s6] ss:$0 sm:$0xff]  ;;  %vm2387_vm1 = vweird.f32 %v2173_v63 }
 0x2b6   :  { %v2374_v51 = vmul.f32 0.5, %v2373_v44  ;;  %v1564_v52 = vadd.f32 %v4189_v47, %v1268_v38 }
 0x2b7   :  { %v2943_v50 = vmul.f32 %v4267_v29, %v2875_v54 }
 0x2b8   :  { %v2375_v9 = vsub.f32 1.5, %v2374_v51  ;;  %v1710_v49 = vpop.xlane.xlu2 %1709  ;;  %v2000_v19 = vpop.xlane.xlu0 %1999  ;;  %v4281_v46 = vadd.f32 %v3318_v0, %v1564_v52 }
 0x2b9   :  { %v3011_v17 = vadd.f32 %v4274_v35, %v2943_v50  ;;  %v1805_v57 = vmul.f32 0.0078125, %v1710_v49  ;;  %v2110_v18 = vmul.f32 0.0078125, %v2000_v19 }
 0x2ba   :  { %v2376_v30 = vmul.f32 %v3189_v10, %v2375_v9  ;;  %v1061_v39 = vpop.f32.mrf.mxu2 }
 0x2bb   :  { %v1270_v58 = vpop.f32.mrf.mxu3  ;;  %v3191_v11 = vpop.eup %3190  ;;  %3075 = vst [vmem:[#allocation11 + $0x70] sm:$0xff] %v3011_v17  ;;  %v4279_v55 = vsub.f32 %v3980_v41, %v1805_v57  ;;  %v2174_v62 = vadd.f32 1e-05, %v2110_v18  ;;  %v3319_v18 = vld [vmem:[#allocation3 + $0x180] sm:$0xff] }
 0x2bc   :  { %v2380_v31 = vsel %vm2379_vm15, %v3189_v10, %v2376_v30  ;;  %v2382_v27 = vmul.f32 %v3191_v11, %v2173_v63  ;;  %v1271_v38 = vadd.f32 %v1270_v58, %v1061_v39  ;;  %vm2388_vm0 = vweird.f32 %v3191_v11 }
 0x2bd   :  { %v2876_v59 = vmul.f32 %v2380_v31, %v3937_v16  ;;  %1739 = vadd.xlane.f32.xlu2 %v4281_v46  ;;  %v1933_v22 = vmul.f32 %v4279_v55, %v4279_v55  ;;  %3192 = vrsqrt.f32 %v2174_v62  ;;  %vm2389_vm2 = vmor %vm2387_vm1, %vm2388_vm0  ;;  %vm2397_vm4 = vweird.f32 %v2174_v62 }
 0x2be   :  { %v2383_v26 = vmul.f32 %v3191_v11, %v2382_v27  ;;  %v1565_v10 = vadd.f32 %v4189_v47, %v1271_v38 }
 0x2bf   :  { %v2944_v20 = vmul.f32 %v4267_v29, %v2876_v59  ;;  %2029 = vadd.xlane.f32.xlu0 %v1933_v22 }
 0x2c0   :  { %v2384_v41 = vmul.f32 0.5, %v2383_v26  ;;  %v2002_v36 = vpop.xlane.xlu1 %2001  ;;  %v1712_v54 = vpop.xlane.xlu0 %1711  ;;  %v4295_v39 = vadd.f32 %v3319_v18, %v1565_v10 }
 0x2c1   :  { %v3012_v44 = vadd.f32 %v4274_v35, %v2944_v20  ;;  %v2111_v16 = vmul.f32 0.0078125, %v2002_v36  ;;  %v1806_v50 = vmul.f32 0.0078125, %v1712_v54 }
 0x2c2   :  { %v2385_v51 = vsub.f32 1.5, %v2384_v41  ;;  %v1064_v52 = vpop.f32.mrf.mxu2 }
 0x2c3   :  { %v1273_v9 = vpop.f32.mrf.mxu3  ;;  %3076 = vst [vmem:[#allocation11 + $0x78] sm:$0xff] %v3012_v44  ;;  %v3193_v49 = vpop.eup %3192  ;;  %v4290_v19 = vadd.f32 1e-05, %v2111_v16  ;;  %v4293_v57 = vsub.f32 %v4004_v45, %v1806_v50 }
 0x2c4   :  { %v2386_v17 = vmul.f32 %v3191_v11, %v2385_v51  ;;  %v2392_v30 = vmul.f32 %v3193_v49, %v2174_v62  ;;  %v1274_v0 = vadd.f32 %v1273_v9, %v1064_v52  ;;  %vm2398_vm3 = vweird.f32 %v3193_v49 }
 0x2c5   :  { %3194 = vrsqrt.f32 %v4290_v19  ;;  %v1934_v31 = vmul.f32 %v4293_v57, %v4293_v57  ;;  %vm2399_vm5 = vmor %vm2397_vm4, %vm2398_vm3  ;;  %vm2407_vm7 = vweird.f32 %v4290_v19 }
 0x2c6   :  { %v2390_v58 = vsel %vm2389_vm2, %v3191_v11, %v2386_v17  ;;  %v2393_v63 = vmul.f32 %v3193_v49, %v2392_v30  ;;  %v1566_v26 = vadd.f32 %v4189_v47, %v1274_v0  ;;  %v3320_v17 = vld [vmem:[#allocation3 + $0x188] sm:$0xff] }
 0x2c7   :  { %v2877_v27 = vmul.f32 %v2390_v58, %v3953_v14  ;;  %1741 = vadd.xlane.f32.xlu0 %v4295_v39  ;;  %2031 = vadd.xlane.f32.xlu1 %v1934_v31 }
 0x2c8   :  { %v2394_v59 = vmul.f32 0.5, %v2393_v63  ;;  %v2004_v38 = vpop.xlane.xlu2 %2003  ;;  %v1714_v22 = vpop.xlane.xlu1 %1713  ;;  %v4314_v30 = vadd.f32 %v3320_v17, %v1566_v26 }
 0x2c9   :  { %v2945_v45 = vmul.f32 %v4267_v29, %v2877_v27  ;;  %v2112_v11 = vmul.f32 0.0078125, %v2004_v38  ;;  %v1807_v20 = vmul.f32 0.0078125, %v1714_v22 }
 0x2ca   :  { %v1067_v41 = vpop.f32.mrf.mxu2  ;;  %v2395_v36 = vsub.f32 1.5, %v2394_v59 }
 0x2cb   :  { %v1276_v44 = vpop.f32.mrf.mxu3  ;;  %v3013_v10 = vadd.f32 %v4274_v35, %v2945_v45  ;;  %v3195_v14 = vpop.eup %3194  ;;  %v4305_v54 = vadd.f32 1e-05, %v2112_v11  ;;  %v4308_v51 = vsub.f32 %v4023_v33, %v1807_v20 }
 0x2cc   :  { %v2396_v16 = vmul.f32 %v3193_v49, %v2395_v36  ;;  %v2402_v50 = vmul.f32 %v3195_v14, %v4290_v19  ;;  %v1277_v52 = vadd.f32 %v1276_v44, %v1067_v41  ;;  %vm2408_vm6 = vweird.f32 %v3195_v14 }
 0x2cd   :  { %3077 = vst [vmem:[#allocation11 + $0x80] sm:$0xff] %v3013_v10  ;;  %3196 = vrsqrt.f32 %v4305_v54  ;;  %v1935_v9 = vmul.f32 %v4308_v51, %v4308_v51  ;;  %vm2409_vm8 = vmor %vm2407_vm7, %vm2408_vm6  ;;  %vm2417_vm10 = vweird.f32 %v4305_v54 }
 0x2ce   :  { %v2400_v18 = vsel %vm2399_vm5, %v3193_v49, %v2396_v16  ;;  %v2403_v58 = vmul.f32 %v3195_v14, %v2402_v50  ;;  %v1567_v63 = vadd.f32 %v4189_v47, %v1277_v52  ;;  %v3321_v16 = vld [vmem:[#allocation3 + $0x190] sm:$0xff] }
 0x2cf   :  { %v2878_v33 = vmul.f32 %v2400_v18, %v3968_v40  ;;  %2033 = vadd.xlane.f32.xlu2 %v1935_v9  ;;  %1743 = vadd.xlane.f32.xlu1 %v4314_v30 }
 0x2d0   :  { %v2404_v62 = vmul.f32 0.5, %v2403_v58  ;;  %v2006_v0 = vpop.xlane.xlu0 %2005  ;;  %v1716_v31 = vpop.xlane.xlu2 %1715  ;;  %v4331_v50 = vadd.f32 %v3321_v16, %v1567_v63 }
 0x2d1   :  { %v2946_v27 = vmul.f32 %v4267_v29, %v2878_v33  ;;  %v2113_v45 = vmul.f32 0.0078125, %v2006_v0  ;;  %v1808_v59 = vmul.f32 0.0078125, %v1716_v31 }
 0x2d2   :  { %v1070_v38 = vpop.f32.mrf.mxu2  ;;  %v2405_v26 = vsub.f32 1.5, %v2404_v62 }
 0x2d3   :  { %v1279_v22 = vpop.f32.mrf.mxu3  ;;  %v3197_v49 = vpop.eup %3196  ;;  %v3014_v11 = vadd.f32 %v4274_v35, %v2946_v27  ;;  %v4321_v40 = vadd.f32 1e-05, %v2113_v45  ;;  %v4324_v20 = vsub.f32 %v4042_v61, %v1808_v59 }
 0x2d4   :  { %v2406_v41 = vmul.f32 %v3195_v14, %v2405_v26  ;;  %v2412_v44 = vmul.f32 %v3197_v49, %v4305_v54  ;;  %v1280_v10 = vadd.f32 %v1279_v22, %v1070_v38  ;;  %vm2418_vm9 = vweird.f32 %v3197_v49 }
 0x2d5   :  { %3078 = vst [vmem:[#allocation11 + $0x88] sm:$0xff] %v3014_v11  ;;  %3198 = vrsqrt.f32 %v4321_v40  ;;  %v1936_v36 = vmul.f32 %v4324_v20, %v4324_v20  ;;  %vm2419_vm11 = vmor %vm2417_vm10, %vm2418_vm9  ;;  %vm2427_vm13 = vweird.f32 %v4321_v40 }
 0x2d6   :  { %v2410_v52 = vsel %vm2409_vm8, %v3195_v14, %v2406_v41  ;;  %v2413_v9 = vmul.f32 %v3197_v49, %v2412_v44  ;;  %v1568_v33 = vadd.f32 %v4189_v47, %v1280_v10  ;;  %v3322_v41 = vld [vmem:[#allocation3 + $0x198] sm:$0xff] }
 0x2d7   :  { %v2879_v61 = vmul.f32 %v2410_v52, %v3997_v28  ;;  %2035 = vadd.xlane.f32.xlu0 %v1936_v36  ;;  %1745 = vadd.xlane.f32.xlu2 %v4331_v50 }
 0x2d8   :  { %v2414_v19 = vmul.f32 0.5, %v2413_v9  ;;  %v2008_v17 = vpop.xlane.xlu1 %2007  ;;  %v1718_v18 = vpop.xlane.xlu0 %1717  ;;  %v4348_v44 = vadd.f32 %v3322_v41, %v1568_v33 }
 0x2d9   :  { %v2947_v58 = vmul.f32 %v4267_v29, %v2879_v61  ;;  %v2114_v62 = vmul.f32 0.0078125, %v2008_v17  ;;  %v1809_v0 = vmul.f32 0.0078125, %v1718_v18 }
 0x2da   :  { %v1073_v31 = vpop.f32.mrf.mxu2  ;;  %v2415_v63 = vsub.f32 1.5, %v2414_v19 }
 0x2db   :  { %v1282_v27 = vpop.f32.mrf.mxu3  ;;  %v3199_v14 = vpop.eup %3198  ;;  %v3015_v45 = vadd.f32 %v4274_v35, %v2947_v58  ;;  %v4338_v28 = vadd.f32 1e-05, %v2114_v62  ;;  %v4341_v59 = vsub.f32 %v4061_v7, %v1809_v0 }
 0x2dc   :  { %v2416_v38 = vmul.f32 %v3197_v49, %v2415_v63  ;;  %v2422_v22 = vmul.f32 %v3199_v14, %v4321_v40  ;;  %v1283_v26 = vadd.f32 %v1282_v27, %v1073_v31  ;;  %vm2428_vm12 = vweird.f32 %v3199_v14 }
 0x2dd   :  { %3079 = vst [vmem:[#allocation11 + $0x90] sm:$0xff] %v3015_v45  ;;  %3200 = vrsqrt.f32 %v4338_v28  ;;  %v1937_v11 = vmul.f32 %v4341_v59, %v4341_v59  ;;  %vm2429_vm14 = vmor %vm2427_vm13, %vm2428_vm12  ;;  %vm2437_vm0 = vweird.f32 %v4338_v28 }
 0x2de   :  { %v2420_v10 = vsel %vm2419_vm11, %v3197_v49, %v2416_v38  ;;  %v2423_v36 = vmul.f32 %v3199_v14, %v2422_v22  ;;  %v1569_v61 = vadd.f32 %v4189_v47, %v1283_v26  ;;  %v3323_v38 = vld [vmem:[#allocation3 + $0x1a0] sm:$0xff] }
 0x2df   :  { %v2880_v7 = vmul.f32 %v2420_v10, %v4016_v5  ;;  %2037 = vadd.xlane.f32.xlu1 %v1937_v11  ;;  %1747 = vadd.xlane.f32.xlu0 %v4348_v44 }
 0x2e0   :  { %v2424_v54 = vmul.f32 0.5, %v2423_v36  ;;  %v2010_v16 = vpop.xlane.xlu2 %2009  ;;  %v1720_v52 = vpop.xlane.xlu1 %1719  ;;  %v4365_v22 = vadd.f32 %v3323_v38, %v1569_v61 }
 0x2e1   :  { %v2948_v9 = vmul.f32 %v4267_v29, %v2880_v7  ;;  %v2115_v19 = vmul.f32 0.0078125, %v2010_v16  ;;  %v1810_v17 = vmul.f32 0.0078125, %v1720_v52 }
 0x2e2   :  { %v1076_v18 = vpop.f32.mrf.mxu2  ;;  %v2425_v33 = vsub.f32 1.5, %v2424_v54 }
 0x2e3   :  { %v1285_v58 = vpop.f32.mrf.mxu3  ;;  %v3201_v49 = vpop.eup %3200  ;;  %v3016_v62 = vadd.f32 %v4274_v35, %v2948_v9  ;;  %v4355_v5 = vadd.f32 1e-05, %v2115_v19  ;;  %v4358_v0 = vsub.f32 %v4080_v1, %v1810_v17 }
 0x2e4   :  { %v2426_v31 = vmul.f32 %v3199_v14, %v2425_v33  ;;  %v2432_v27 = vmul.f32 %v3201_v49, %v4338_v28  ;;  %v1286_v63 = vadd.f32 %v1285_v58, %v1076_v18  ;;  %vm2438_vm15 = vweird.f32 %v3201_v49 }
 0x2e5   :  { %3080 = vst [vmem:[#allocation11 + $0x98] sm:$0xff] %v3016_v62  ;;  %3202 = vrsqrt.f32 %v4355_v5  ;;  %v1938_v45 = vmul.f32 %v4358_v0, %v4358_v0  ;;  %vm2439_vm1 = vmor %vm2437_vm0, %vm2438_vm15  ;;  %vm2447_vm3 = vweird.f32 %v4355_v5 }
 0x2e6   :  { %v2430_v26 = vsel %vm2429_vm14, %v3199_v14, %v2426_v31  ;;  %v2433_v11 = vmul.f32 %v3201_v49, %v2432_v27  ;;  %v1570_v7 = vadd.f32 %v4189_v47, %v1286_v63  ;;  %v3324_v31 = vld [vmem:[#allocation3 + $0x1a8] sm:$0xff] }
 0x2e7   :  { %v2881_v1 = vmul.f32 %v2430_v26, %v4035_v43  ;;  %2039 = vadd.xlane.f32.xlu2 %v1938_v45  ;;  %1749 = vadd.xlane.f32.xlu1 %v4365_v22 }
 0x2e8   :  { %v2434_v40 = vmul.f32 0.5, %v2433_v11  ;;  %v2012_v41 = vpop.xlane.xlu0 %2011  ;;  %v1722_v10 = vpop.xlane.xlu2 %1721  ;;  %v4382_v27 = vadd.f32 %v3324_v31, %v1570_v7 }
 0x2e9   :  { %v2949_v36 = vmul.f32 %v4267_v29, %v2881_v1  ;;  %v2116_v54 = vmul.f32 0.0078125, %v2012_v41  ;;  %v1811_v16 = vmul.f32 0.0078125, %v1722_v10 }
 0x2ea   :  { %v1079_v52 = vpop.f32.mrf.mxu2  ;;  %v2435_v61 = vsub.f32 1.5, %v2434_v40 }
 0x2eb   :  { %v1288_v9 = vpop.f32.mrf.mxu3  ;;  %v3203_v14 = vpop.eup %3202  ;;  %v3017_v19 = vadd.f32 %v4274_v35, %v2949_v36  ;;  %v4372_v43 = vadd.f32 1e-05, %v2116_v54  ;;  %v4375_v17 = vsub.f32 %v4099_v15, %v1811_v16 }
 0x2ec   :  { %v2436_v18 = vmul.f32 %v3201_v49, %v2435_v61  ;;  %v2442_v58 = vmul.f32 %v3203_v14, %v4355_v5  ;;  %v1289_v33 = vadd.f32 %v1288_v9, %v1079_v52  ;;  %vm2448_vm2 = vweird.f32 %v3203_v14 }
 0x2ed   :  { %3081 = vst [vmem:[#allocation11 + $0xa0] sm:$0xff] %v3017_v19  ;;  %3204 = vrsqrt.f32 %v4372_v43  ;;  %v1939_v62 = vmul.f32 %v4375_v17, %v4375_v17  ;;  %vm2449_vm4 = vmor %vm2447_vm3, %vm2448_vm2  ;;  %vm2457_vm6 = vweird.f32 %v4372_v43 }
 0x2ee   :  { %v2440_v63 = vsel %vm2439_vm1, %v3201_v49, %v2436_v18  ;;  %v2443_v45 = vmul.f32 %v3203_v14, %v2442_v58  ;;  %v1571_v1 = vadd.f32 %v4189_v47, %v1289_v33  ;;  %v3325_v18 = vld [vmem:[#allocation3 + $0x1b0] sm:$0xff] }
 0x2ef   :  { %v2882_v15 = vmul.f32 %v2440_v63, %v4054_v53  ;;  %2041 = vadd.xlane.f32.xlu0 %v1939_v62  ;;  %1751 = vadd.xlane.f32.xlu2 %v4382_v27 }
 0x2f0   :  { %v2444_v28 = vmul.f32 0.5, %v2443_v45  ;;  %v2014_v38 = vpop.xlane.xlu1 %2013  ;;  %v1724_v26 = vpop.xlane.xlu0 %1723  ;;  %v4399_v58 = vadd.f32 %v3325_v18, %v1571_v1 }
 0x2f1   :  { %v2950_v11 = vmul.f32 %v4267_v29, %v2882_v15  ;;  %v2117_v40 = vmul.f32 0.0078125, %v2014_v38  ;;  %v1812_v41 = vmul.f32 0.0078125, %v1724_v26 }
 0x2f2   :  { %v1082_v10 = vpop.f32.mrf.mxu2  ;;  %v2445_v7 = vsub.f32 1.5, %v2444_v28 }
 0x2f3   :  { %v1291_v36 = vpop.f32.mrf.mxu3  ;;  %v3205_v49 = vpop.eup %3204  ;;  %v3018_v54 = vadd.f32 %v4274_v35, %v2950_v11  ;;  %v4389_v53 = vadd.f32 1e-05, %v2117_v40  ;;  %v4392_v16 = vsub.f32 %v4118_v37, %v1812_v41 }
 0x2f4   :  { %v2446_v52 = vmul.f32 %v3203_v14, %v2445_v7  ;;  %v2452_v9 = vmul.f32 %v3205_v49, %v4372_v43  ;;  %v1292_v61 = vadd.f32 %v1291_v36, %v1082_v10  ;;  %vm2458_vm5 = vweird.f32 %v3205_v49 }
 0x2f5   :  { %3082 = vst [vmem:[#allocation11 + $0xa8] sm:$0xff] %v3018_v54  ;;  %3206 = vrsqrt.f32 %v4389_v53  ;;  %v1940_v19 = vmul.f32 %v4392_v16, %v4392_v16  ;;  %vm2459_vm7 = vmor %vm2457_vm6, %vm2458_vm5  ;;  %vm2467_vm9 = vweird.f32 %v4389_v53 }
 0x2f6   :  { %v2450_v33 = vsel %vm2449_vm4, %v3203_v14, %v2446_v52  ;;  %v2453_v62 = vmul.f32 %v3205_v49, %v2452_v9  ;;  %v1572_v15 = vadd.f32 %v4189_v47, %v1292_v61  ;;  %v3326_v52 = vld [vmem:[#allocation3 + $0x1b8] sm:$0xff] }
 0x2f7   :  { %v2883_v37 = vmul.f32 %v2450_v33, %v4073_v8  ;;  %2043 = vadd.xlane.f32.xlu1 %v1940_v19  ;;  %1753 = vadd.xlane.f32.xlu0 %v4399_v58 }
 0x2f8   :  { %v2454_v5 = vmul.f32 0.5, %v2453_v62  ;;  %v2016_v31 = vpop.xlane.xlu2 %2015  ;;  %v1726_v63 = vpop.xlane.xlu1 %1725  ;;  %v4416_v9 = vadd.f32 %v3326_v52, %v1572_v15 }
 0x2f9   :  { %v2951_v45 = vmul.f32 %v4267_v29, %v2883_v37  ;;  %v2118_v28 = vmul.f32 0.0078125, %v2016_v31  ;;  %v1813_v38 = vmul.f32 0.0078125, %v1726_v63 }
 0x2fa   :  { %v1085_v26 = vpop.f32.mrf.mxu2  ;;  %v2455_v1 = vsub.f32 1.5, %v2454_v5 }
 0x2fb   :  { %v1294_v11 = vpop.f32.mrf.mxu3  ;;  %v3207_v14 = vpop.eup %3206  ;;  %v3019_v40 = vadd.f32 %v4274_v35, %v2951_v45  ;;  %v4406_v8 = vadd.f32 1e-05, %v2118_v28  ;;  %v4409_v41 = vsub.f32 %v4137_v3, %v1813_v38 }
 0x2fc   :  { %v2456_v10 = vmul.f32 %v3205_v49, %v2455_v1  ;;  %v2462_v36 = vmul.f32 %v3207_v14, %v4389_v53  ;;  %v1295_v7 = vadd.f32 %v1294_v11, %v1085_v26  ;;  %vm2468_vm8 = vweird.f32 %v3207_v14 }
 0x2fd   :  { %3083 = vst [vmem:[#allocation11 + $0xb0] sm:$0xff] %v3019_v40  ;;  %3208 = vrsqrt.f32 %v4406_v8  ;;  %v1941_v54 = vmul.f32 %v4409_v41, %v4409_v41  ;;  %vm2469_vm10 = vmor %vm2467_vm9, %vm2468_vm8  ;;  %vm2477_vm12 = vweird.f32 %v4406_v8 }
 0x2fe   :  { %v2460_v61 = vsel %vm2459_vm7, %v3205_v49, %v2456_v10  ;;  %v2463_v19 = vmul.f32 %v3207_v14, %v2462_v36  ;;  %v1573_v37 = vadd.f32 %v4189_v47, %v1295_v7  ;;  %v3327_v10 = vld [vmem:[#allocation3 + $0x1c0] sm:$0xff] }
 0x2ff   :  { %v2884_v3 = vmul.f32 %v2460_v61, %v4092_v23  ;;  %2045 = vadd.xlane.f32.xlu2 %v1941_v54  ;;  %1755 = vadd.xlane.f32.xlu1 %v4416_v9 }
 0x300   :  { %v2464_v43 = vmul.f32 0.5, %v2463_v19  ;;  %v2018_v18 = vpop.xlane.xlu0 %2017  ;;  %v1728_v33 = vpop.xlane.xlu2 %1727  ;;  %v4433_v36 = vadd.f32 %v3327_v10, %v1573_v37 }
 0x301   :  { %v2952_v62 = vmul.f32 %v4267_v29, %v2884_v3  ;;  %v2119_v5 = vmul.f32 0.0078125, %v2018_v18  ;;  %v1814_v31 = vmul.f32 0.0078125, %v1728_v33 }
 0x302   :  { %v1088_v63 = vpop.f32.mrf.mxu2  ;;  %v2465_v15 = vsub.f32 1.5, %v2464_v43 }
 0x303   :  { %v1297_v45 = vpop.f32.mrf.mxu3  ;;  %v3209_v49 = vpop.eup %3208  ;;  %v3020_v28 = vadd.f32 %v4274_v35, %v2952_v62  ;;  %v4423_v23 = vadd.f32 1e-05, %v2119_v5  ;;  %v4426_v38 = vsub.f32 %v4156_v32, %v1814_v31 }
 0x304   :  { %v2466_v26 = vmul.f32 %v3207_v14, %v2465_v15  ;;  %v2472_v11 = vmul.f32 %v3209_v49, %v4406_v8  ;;  %v1298_v1 = vadd.f32 %v1297_v45, %v1088_v63  ;;  %vm2478_vm11 = vweird.f32 %v3209_v49 }
 0x305   :  { %3084 = vst [vmem:[#allocation11 + $0xb8] sm:$0xff] %v3020_v28  ;;  %3210 = vrsqrt.f32 %v4423_v23  ;;  %v1942_v40 = vmul.f32 %v4426_v38, %v4426_v38  ;;  %vm2479_vm13 = vmor %vm2477_vm12, %vm2478_vm11  ;;  %vm2487_vm15 = vweird.f32 %v4423_v23 }
 0x306   :  { %v2470_v7 = vsel %vm2469_vm10, %v3207_v14, %v2466_v26  ;;  %v2473_v54 = vmul.f32 %v3209_v49, %v2472_v11  ;;  %v1574_v3 = vadd.f32 %v4189_v47, %v1298_v1  ;;  %v3328_v26 = vld [vmem:[#allocation3 + $0x1c8] sm:$0xff] }
 0x307   :  { %v2885_v32 = vmul.f32 %v2470_v7, %v4111_v56  ;;  %2047 = vadd.xlane.f32.xlu0 %v1942_v40  ;;  %1757 = vadd.xlane.f32.xlu2 %v4433_v36 }
 0x308   :  { %v2474_v53 = vmul.f32 0.5, %v2473_v54  ;;  %v2020_v52 = vpop.xlane.xlu1 %2019  ;;  %v1730_v61 = vpop.xlane.xlu0 %1729  ;;  %v4450_v11 = vadd.f32 %v3328_v26, %v1574_v3 }
 0x309   :  { %v2953_v19 = vmul.f32 %v4267_v29, %v2885_v32  ;;  %v2120_v43 = vmul.f32 0.0078125, %v2020_v52  ;;  %v1815_v18 = vmul.f32 0.0078125, %v1730_v61 }
 0x30a   :  { %v1091_v33 = vpop.f32.mrf.mxu2  ;;  %v2475_v37 = vsub.f32 1.5, %v2474_v53 }
 0x30b   :  { %v1300_v62 = vpop.f32.mrf.mxu3  ;;  %v3211_v14 = vpop.eup %3210  ;;  %v3021_v5 = vadd.f32 %v4274_v35, %v2953_v19  ;;  %v4440_v56 = vadd.f32 1e-05, %v2120_v43  ;;  %v4443_v31 = vsub.f32 %v4178_v34, %v1815_v18 }
 0x30c   :  { %v2476_v63 = vmul.f32 %v3209_v49, %v2475_v37  ;;  %v2482_v45 = vmul.f32 %v3211_v14, %v4423_v23  ;;  %v1301_v15 = vadd.f32 %v1300_v62, %v1091_v33  ;;  %vm2488_vm14 = vweird.f32 %v3211_v14 }
 0x30d   :  { %3085 = vst [vmem:[#allocation11 + $0xc0] sm:$0xff] %v3021_v5  ;;  %3212 = vrsqrt.f32 %v4440_v56  ;;  %v1943_v28 = vmul.f32 %v4443_v31, %v4443_v31  ;;  %vm2489_vm0 = vmor %vm2487_vm15, %vm2488_vm14  ;;  %vm2497_vm2 = vweird.f32 %v4440_v56 }
 0x30e   :  { %v2480_v1 = vsel %vm2479_vm13, %v3209_v49, %v2476_v63  ;;  %v2483_v40 = vmul.f32 %v3211_v14, %v2482_v45  ;;  %v1575_v32 = vadd.f32 %v4189_v47, %v1301_v15  ;;  %v3329_v63 = vld [vmem:[#allocation3 + $0x1d0] sm:$0xff] }
 0x30f   :  { %v2886_v34 = vmul.f32 %v2480_v1, %v4130_v60  ;;  %2049 = vadd.xlane.f32.xlu1 %v1943_v28  ;;  %1759 = vadd.xlane.f32.xlu0 %v4450_v11 }
 0x310   :  { %v2484_v8 = vmul.f32 0.5, %v2483_v40  ;;  %v2022_v10 = vpop.xlane.xlu2 %2021  ;;  %v1732_v7 = vpop.xlane.xlu1 %1731  ;;  %v4467_v45 = vadd.f32 %v3329_v63, %v1575_v32 }
 0x311   :  { %v2954_v54 = vmul.f32 %v4267_v29, %v2886_v34  ;;  %v2121_v53 = vmul.f32 0.0078125, %v2022_v10  ;;  %v1816_v52 = vmul.f32 0.0078125, %v1732_v7 }
 0x312   :  { %v1094_v61 = vpop.f32.mrf.mxu2  ;;  %v2485_v3 = vsub.f32 1.5, %v2484_v8 }
 0x313   :  { %v1303_v19 = vpop.f32.mrf.mxu3  ;;  %v3213_v49 = vpop.eup %3212  ;;  %v3022_v43 = vadd.f32 %v4274_v35, %v2954_v54  ;;  %v4457_v60 = vadd.f32 1e-05, %v2121_v53  ;;  %v4460_v18 = vsub.f32 %v4205_v12, %v1816_v52 }
 0x314   :  { %v2486_v33 = vmul.f32 %v3211_v14, %v2485_v3  ;;  %v2492_v62 = vmul.f32 %v3213_v49, %v4440_v56  ;;  %v1304_v37 = vadd.f32 %v1303_v19, %v1094_v61  ;;  %vm2498_vm1 = vweird.f32 %v3213_v49 }
 0x315   :  { %3086 = vst [vmem:[#allocation11 + $0xc8] sm:$0xff] %v3022_v43  ;;  %3214 = vrsqrt.f32 %v4457_v60  ;;  %v1944_v5 = vmul.f32 %v4460_v18, %v4460_v18  ;;  %vm2499_vm3 = vmor %vm2497_vm2, %vm2498_vm1  ;;  %v3330_v43 = vld [vmem:[#allocation3 + $0x1d8] sm:$0xff]  ;;  %vm2507_vm5 = vweird.f32 %v4457_v60 }
 0x316   :  { %v2490_v15 = vsel %vm2489_vm0, %v3211_v14, %v2486_v33  ;;  %v2493_v28 = vmul.f32 %v3213_v49, %v2492_v62  ;;  %v1576_v34 = vadd.f32 %v4189_v47, %v1304_v37 }
 0x317   :  { %v2887_v12 = vmul.f32 %v2490_v15, %v4149_v6  ;;  %2051 = vadd.xlane.f32.xlu2 %v1944_v5  ;;  %1761 = vadd.xlane.f32.xlu1 %v4467_v45 }
 0x318   :  { %v2494_v23 = vmul.f32 0.5, %v2493_v28  ;;  %v2024_v26 = vpop.xlane.xlu0 %2023  ;;  %v1734_v1 = vpop.xlane.xlu2 %1733  ;;  %v4484_v33 = vadd.f32 %v3330_v43, %v1576_v34  ;;  %v4492_v28 = vld [vmem:[%s4757_s4] ss:$0 sm:$0xff] }
 0x319   :  { %v2955_v40 = vmul.f32 %v4267_v29, %v2887_v12  ;;  %v2122_v8 = vmul.f32 0.0078125, %v2024_v26  ;;  %v1817_v10 = vmul.f32 0.0078125, %v1734_v1 }
 0x31a   :  { %v1097_v7 = vpop.f32.mrf.mxu2  ;;  %v2495_v32 = vsub.f32 1.5, %v2494_v23 }
 0x31b   :  { %v1306_v54 = vpop.f32.mrf.mxu3  ;;  %v3215_v14 = vpop.eup %3214  ;;  %v3023_v53 = vadd.f32 %v4274_v35, %v2955_v40  ;;  %v4474_v6 = vadd.f32 1e-05, %v2122_v8  ;;  %v4477_v52 = vsub.f32 %v4225_v2, %v1817_v10 }
 0x31c   :  { %v2496_v61 = vmul.f32 %v3213_v49, %v2495_v32  ;;  %v2502_v19 = vmul.f32 %v3215_v14, %v4457_v60  ;;  %v1307_v47 = vadd.f32 %v1306_v54, %v1097_v7  ;;  %vm2508_vm4 = vweird.f32 %v3215_v14 }
 0x31d   :  { %3087 = vst [vmem:[#allocation11 + $0xd0] sm:$0xff] %v3023_v53  ;;  %3216 = vrsqrt.f32 %v4474_v6  ;;  %v1945_v3 = vmul.f32 %v4477_v52, %v4477_v52  ;;  %vm2509_vm6 = vmor %vm2507_vm5, %vm2508_vm4  ;;  %vm2517_vm8 = vweird.f32 %v4474_v6 }
 0x31e   :  { %v2500_v62 = vsel %vm2499_vm3, %v3213_v49, %v2496_v61  ;;  %v2503_v37 = vmul.f32 %v3215_v14, %v2502_v19  ;;  %v1577_v12 = vadd.f32 %v4492_v28, %v1307_v47  ;;  %v3332_v61 = vld [vmem:[#allocation3 + $0x1e0] sm:$0xff] }
 0x31f   :  { %v2888_v2 = vmul.f32 %v2500_v62, %v4170_v25  ;;  %2053 = vadd.xlane.f32.xlu0 %v1945_v3  ;;  %1763 = vadd.xlane.f32.xlu2 %v4484_v33 }
 0x320   :  { %v2504_v56 = vmul.f32 0.5, %v2503_v37  ;;  %v2026_v5 = vpop.xlane.xlu1 %2025  ;;  %v1736_v63 = vpop.xlane.xlu0 %1735  ;;  %v4506_v19 = vadd.f32 %v3332_v61, %v1577_v12  ;;  %v3334_v61 = vld [vmem:[#allocation3 + $0x1f0] sm:$0xff] }
 0x321   :  { %v2956_v15 = vmul.f32 %v4267_v29, %v2888_v2  ;;  %v2123_v23 = vmul.f32 0.0078125, %v2026_v5  ;;  %v1818_v49 = vmul.f32 0.0078125, %v1736_v63 }
 0x322   :  { %v1100_v26 = vpop.f32.mrf.mxu2  ;;  %v2505_v25 = vsub.f32 1.5, %v2504_v56 }
 0x323   :  { %v1309_v1 = vpop.f32.mrf.mxu3  ;;  %v3217_v40 = vpop.eup %3216  ;;  %v3024_v34 = vadd.f32 %v4274_v35, %v2956_v15  ;;  %v4496_v8 = vadd.f32 1e-05, %v2123_v23  ;;  %v4499_v10 = vsub.f32 %v4244_v24, %v1818_v49 }
 0x324   :  { %v2506_v7 = vmul.f32 %v3215_v14, %v2505_v25  ;;  %v2512_v54 = vmul.f32 %v3217_v40, %v4474_v6  ;;  %v1310_v32 = vadd.f32 %v1309_v1, %v1100_v26  ;;  %vm2518_vm7 = vweird.f32 %v3217_v40  ;;  %v3333_v25 = vld [vmem:[#allocation3 + $0x1e8] sm:$0xff] }
 0x325   :  { %3088 = vst [vmem:[#allocation11 + $0xd8] sm:$0xff] %v3024_v34  ;;  %3218 = vrsqrt.f32 %v4496_v8  ;;  %v1946_v53 = vmul.f32 %v4499_v10, %v4499_v10  ;;  %vm2519_vm9 = vmor %vm2517_vm8, %vm2518_vm7  ;;  %vm2527_vm11 = vweird.f32 %v4496_v8 }
 0x326   :  { %v2510_v47 = vsel %vm2509_vm6, %v3215_v14, %v2506_v7  ;;  %v2513_v3 = vmul.f32 %v3217_v40, %v2512_v54  ;;  %v1578_v2 = vadd.f32 %v4492_v28, %v1310_v32 }
 0x327   :  { %v2889_v24 = vmul.f32 %v2510_v47, %v4197_v21  ;;  %2055 = vadd.xlane.f32.xlu1 %v1946_v53  ;;  %1765 = vadd.xlane.f32.xlu0 %v4506_v19 }
 0x328   :  { %v2028_v60 = vpop.xlane.xlu2 %2027  ;;  %v2514_v43 = vmul.f32 0.5, %v2513_v3  ;;  %v1738_v23 = vpop.xlane.xlu1 %1737  ;;  %v4519_v34 = vadd.f32 %v3333_v25, %v1578_v2 }
 0x329   :  { %v2124_v62 = vmul.f32 0.0078125, %v2028_v60  ;;  %v2957_v37 = vmul.f32 %v4267_v29, %v2889_v24  ;;  %v1819_v32 = vmul.f32 0.0078125, %v1738_v23 }
 0x32a   :  { %v1103_v56 = vpop.f32.mrf.mxu2  ;;  %v2515_v63 = vsub.f32 1.5, %v2514_v43 }
 0x32b   :  { %v1312_v5 = vpop.f32.mrf.mxu3  ;;  %v4512_v15 = vadd.f32 1e-05, %v2124_v62  ;;  %v3219_v12 = vpop.eup %3218  ;;  %v3025_v21 = vadd.f32 %v4274_v35, %v2957_v37 }
 0x32c   :  { %v1313_v14 = vadd.f32 %v1312_v5, %v1103_v56  ;;  %v2516_v49 = vmul.f32 %v3217_v40, %v2515_v63  ;;  %v2522_v26 = vmul.f32 %v3219_v12, %v4496_v8  ;;  %vm2528_vm10 = vweird.f32 %v3219_v12 }
 0x32d   :  { %3220 = vrsqrt.f32 %v4512_v15  ;;  %3089 = vst [vmem:[#allocation11 + $0xe0] sm:$0xff] %v3025_v21  ;;  %vm2529_vm12 = vmor %vm2527_vm11, %vm2528_vm10  ;;  %vm2537_vm14 = vweird.f32 %v4512_v15 }
 0x32e   :  { %v1579_v1 = vadd.f32 %v4492_v28, %v1313_v14  ;;  %v2520_v7 = vsel %vm2519_vm9, %v3217_v40, %v2516_v49  ;;  %v2523_v54 = vmul.f32 %v3219_v12, %v2522_v26  ;;  %v4528_v40 = vsub.f32 %v4260_v13, %v1819_v32 }
 0x32f   :  { %v2890_v53 = vmul.f32 %v2520_v7, %v4218_v4  ;;  %1767 = vadd.xlane.f32.xlu1 %v4519_v34 }
 0x330   :  { %v4523_v6 = vadd.f32 %v3334_v61, %v1579_v1  ;;  %v2524_v47 = vmul.f32 0.5, %v2523_v54  ;;  %v1740_v14 = vpop.xlane.xlu2 %1739  ;;  %v1947_v13 = vmul.f32 %v4528_v40, %v4528_v40  ;;  %v3335_v54 = vld [vmem:[#allocation3 + $0x1f8] sm:$0xff] }
 0x331   :  { %v2958_v3 = vmul.f32 %v4267_v29, %v2890_v53  ;;  %v1820_v7 = vmul.f32 0.0078125, %v1740_v14 }
 0x332   :  { %1769 = vadd.xlane.f32.xlu2 %v4523_v6  ;;  %v2030_v60 = vpop.xlane.xlu0 %2029  ;;  %v2525_v62 = vsub.f32 1.5, %v2524_v47  ;;  %v1106_v4 = vpop.f32.mrf.mxu2 }
 0x333   :  { %v1315_v24 = vpop.f32.mrf.mxu3  ;;  %v3221_v43 = vpop.eup %3220  ;;  %v2125_v37 = vmul.f32 0.0078125, %v2030_v60  ;;  %v3026_v2 = vadd.f32 %v4274_v35, %v2958_v3  ;;  %v4544_v3 = vsub.f32 %v4281_v46, %v1820_v7 }
 0x334   :  { %v2532_v56 = vmul.f32 %v3221_v43, %v4512_v15  ;;  %v1316_v5 = vadd.f32 %v1315_v24, %v1106_v4  ;;  %v2526_v63 = vmul.f32 %v3219_v12, %v2525_v62  ;;  %vm2538_vm13 = vweird.f32 %v3221_v43 }
 0x335   :  { %v2189_v21 = vadd.f32 1e-05, %v2125_v37  ;;  %3090 = vst [vmem:[#allocation11 + $0xe8] sm:$0xff] %v3026_v2  ;;  %vm2539_vm15 = vmor %vm2537_vm14, %vm2538_vm13  ;;  %v1948_v46 = vmul.f32 %v4544_v3, %v4544_v3 }
 0x336   :  { %v2533_v23 = vmul.f32 %v3221_v43, %v2532_v56  ;;  %v1580_v49 = vadd.f32 %v4492_v28, %v1316_v5  ;;  %v2530_v26 = vsel %vm2529_vm12, %v3219_v12, %v2526_v63 }
 0x337   :  { %3222 = vrsqrt.f32 %v2189_v21  ;;  %v2891_v1 = vmul.f32 %v2530_v26, %v4237_v48  ;;  %vm2547_vm1 = vweird.f32 %v2189_v21 }
 0x338   :  { %v2534_v25 = vmul.f32 0.5, %v2533_v23  ;;  %v4537_v32 = vadd.f32 %v3335_v54, %v1580_v49 }
 0x339   :  { %v2959_v8 = vmul.f32 %v4267_v29, %v2891_v1 }
 0x33a   :  { %v2535_v53 = vsub.f32 1.5, %v2534_v25  ;;  %2057 = vadd.xlane.f32.xlu2 %v1947_v13  ;;  %1771 = vadd.xlane.f32.xlu0 %v4537_v32  ;;  %v1742_v28 = vpop.xlane.xlu0 %1741  ;;  %v2032_v12 = vpop.xlane.xlu1 %2031 }
 0x33b   :  { %v1821_v61 = vmul.f32 0.0078125, %v1742_v28  ;;  %v3027_v47 = vadd.f32 %v4274_v35, %v2959_v8  ;;  %v2126_v24 = vmul.f32 0.0078125, %v2032_v12  ;;  %v4565_v28 = vld [vmem:[%s4758_s5] ss:$0 sm:$0xff] }
 0x33c   :  { %v2536_v48 = vmul.f32 %v3221_v43, %v2535_v53 }
 0x33d   :  { %v3223_v60 = vpop.eup %3222  ;;  %v4547_v62 = vsub.f32 %v4295_v39, %v1821_v61  ;;  %3091 = vst [vmem:[#allocation11 + $0xf0] sm:$0xff] %v3027_v47  ;;  %v2190_v2 = vadd.f32 1e-05, %v2126_v24  ;;  %v4571_v24 = vld [vmem:[%s4759_s6] ss:$0 sm:$0xff] }
 0x33e   :  { %v2540_v37 = vsel %vm2539_vm15, %v3221_v43, %v2536_v48  ;;  %v2542_v4 = vmul.f32 %v3223_v60, %v2189_v21  ;;  %vm2548_vm0 = vweird.f32 %v3223_v60 }
 0x33f   :  { %v2892_v15 = vmul.f32 %v2540_v37, %v4254_v42  ;;  %v1949_v56 = vmul.f32 %v4547_v62, %v4547_v62  ;;  %3224 = vrsqrt.f32 %v2190_v2  ;;  %vm2549_vm2 = vmor %vm2547_vm1, %vm2548_vm0  ;;  %vm2557_vm4 = vweird.f32 %v2190_v2 }
 0x340   :  { %v2543_v5 = vmul.f32 %v3223_v60, %v2542_v4 }
 0x341   :  { %v2960_v63 = vmul.f32 %v4267_v29, %v2892_v15  ;;  %2061 = vadd.xlane.f32.xlu1 %v1949_v56 }
 0x342   :  { %v2544_v14 = vmul.f32 0.5, %v2543_v5  ;;  %2059 = vadd.xlane.f32.xlu0 %v1948_v46  ;;  %v2034_v43 = vpop.xlane.xlu2 %2033  ;;  %v1744_v23 = vpop.xlane.xlu1 %1743 }
 0x343   :  { %v3028_v39 = vadd.f32 %v4274_v35, %v2960_v63  ;;  %v2127_v42 = vmul.f32 0.0078125, %v2034_v43  ;;  %v1822_v26 = vmul.f32 0.0078125, %v1744_v23 }
 0x344   :  { %v2545_v49 = vsub.f32 1.5, %v2544_v14 }
 0x345   :  { %3092 = vst [vmem:[#allocation11 + $0xf8] sm:$0xff] %v3028_v39  ;;  %v3225_v13 = vpop.eup %3224  ;;  %v2191_v25 = vadd.f32 1e-05, %v2127_v42  ;;  %v4557_v7 = vsub.f32 %v4314_v30, %v1822_v26 }
 0x346   :  { %v2546_v1 = vmul.f32 %v3223_v60, %v2545_v49  ;;  %v2552_v29 = vmul.f32 %v3225_v13, %v2190_v2  ;;  %vm2558_vm3 = vweird.f32 %v3225_v13 }
 0x347   :  { %3226 = vrsqrt.f32 %v2191_v25  ;;  %v1950_v35 = vmul.f32 %v4557_v7, %v4557_v7  ;;  %vm2559_vm5 = vmor %vm2557_vm4, %vm2558_vm3  ;;  %vm2567_vm7 = vweird.f32 %v2191_v25 }
 0x348   :  { %v2550_v54 = vsel %vm2549_vm2, %v3223_v60, %v2546_v1  ;;  %v2553_v53 = vmul.f32 %v3225_v13, %v2552_v29 }
 0x349   :  { %v2893_v8 = vmul.f32 %v2550_v54, %v4279_v55  ;;  %2063 = vadd.xlane.f32.xlu2 %v1950_v35 }
 0x34a   :  { %v2554_v30 = vmul.f32 0.5, %v2553_v53  ;;  %v2036_v12 = vpop.xlane.xlu0 %2035  ;;  %v1746_v61 = vpop.xlane.xlu2 %1745 }
 0x34b   :  { %v2961_v21 = vmul.f32 %v4565_v28, %v2893_v8  ;;  %v2128_v47 = vmul.f32 0.0078125, %v2036_v12  ;;  %v1823_v48 = vmul.f32 0.0078125, %v1746_v61 }
 0x34c   :  { %v2555_v60 = vsub.f32 1.5, %v2554_v30 }
 0x34d   :  { %v3029_v55 = vadd.f32 %v4571_v24, %v2961_v21  ;;  %v3227_v37 = vpop.eup %3226  ;;  %v2192_v4 = vadd.f32 1e-05, %v2128_v47  ;;  %v4575_v15 = vsub.f32 %v4331_v50, %v1823_v48 }
 0x34e   :  { %v2556_v56 = vmul.f32 %v3225_v13, %v2555_v60  ;;  %v2562_v5 = vmul.f32 %v3227_v37, %v2191_v25  ;;  %vm2568_vm6 = vweird.f32 %v3227_v37 }
 0x34f   :  { %3093 = vst [vmem:[#allocation11 + $0x100] sm:$0xff] %v3029_v55  ;;  %3228 = vrsqrt.f32 %v2192_v4  ;;  %v1951_v46 = vmul.f32 %v4575_v15, %v4575_v15  ;;  %vm2569_vm8 = vmor %vm2567_vm7, %vm2568_vm6  ;;  %vm2577_vm10 = vweird.f32 %v2192_v4 }
 0x350   :  { %v2560_v63 = vsel %vm2559_vm5, %v3225_v13, %v2556_v56  ;;  %v2563_v14 = vmul.f32 %v3227_v37, %v2562_v5 }
 0x351   :  { %v2894_v39 = vmul.f32 %v2560_v63, %v4293_v57  ;;  %2065 = vadd.xlane.f32.xlu0 %v1951_v46 }
 0x352   :  { %v2564_v43 = vmul.f32 0.5, %v2563_v14  ;;  %v2038_v23 = vpop.xlane.xlu1 %2037  ;;  %v1748_v49 = vpop.xlane.xlu0 %1747 }
 0x353   :  { %v2962_v50 = vmul.f32 %v4565_v28, %v2894_v39  ;;  %v2129_v42 = vmul.f32 0.0078125, %v2038_v23  ;;  %v1824_v26 = vmul.f32 0.0078125, %v1748_v49 }
 0x354   :  { %v2565_v1 = vsub.f32 1.5, %v2564_v43 }
 0x355   :  { %v3229_v2 = vpop.eup %3228  ;;  %v3030_v29 = vadd.f32 %v4571_v24, %v2962_v50  ;;  %v2193_v54 = vadd.f32 1e-05, %v2129_v42  ;;  %v4583_v35 = vsub.f32 %v4348_v44, %v1824_v26 }
 0x356   :  { %v2566_v13 = vmul.f32 %v3227_v37, %v2565_v1  ;;  %v2572_v57 = vmul.f32 %v3229_v2, %v2192_v4  ;;  %vm2578_vm9 = vweird.f32 %v3229_v2 }
 0x357   :  { %3094 = vst [vmem:[#allocation11 + $0x108] sm:$0xff] %v3030_v29  ;;  %3230 = vrsqrt.f32 %v2193_v54  ;;  %v1952_v8 = vmul.f32 %v4583_v35, %v4583_v35  ;;  %vm2579_vm11 = vmor %vm2577_vm10, %vm2578_vm9  ;;  %vm2587_vm13 = vweird.f32 %v2193_v54 }
 0x358   :  { %v2570_v53 = vsel %vm2569_vm8, %v3227_v37, %v2566_v13  ;;  %v2573_v21 = vmul.f32 %v3229_v2, %v2572_v57 }
 0x359   :  { %v2895_v30 = vmul.f32 %v2570_v53, %v4308_v51  ;;  %2067 = vadd.xlane.f32.xlu1 %v1952_v8 }
 0x35a   :  { %v2574_v12 = vmul.f32 0.5, %v2573_v21  ;;  %v2040_v61 = vpop.xlane.xlu2 %2039  ;;  %v1750_v47 = vpop.xlane.xlu1 %1749 }
 0x35b   :  { %v2963_v44 = vmul.f32 %v4565_v28, %v2895_v30  ;;  %v2130_v48 = vmul.f32 0.0078125, %v2040_v61  ;;  %v1825_v55 = vmul.f32 0.0078125, %v1750_v47 }
 0x35c   :  { %v2575_v25 = vsub.f32 1.5, %v2574_v12 }
 0x35d   :  { %v3231_v60 = vpop.eup %3230  ;;  %v3031_v56 = vadd.f32 %v4571_v24, %v2963_v44  ;;  %v2194_v5 = vadd.f32 1e-05, %v2130_v48  ;;  %v4591_v46 = vsub.f32 %v4365_v22, %v1825_v55 }
 0x35e   :  { %v2576_v37 = vmul.f32 %v3229_v2, %v2575_v25  ;;  %v2582_v51 = vmul.f32 %v3231_v60, %v2193_v54  ;;  %vm2588_vm12 = vweird.f32 %v3231_v60 }
 0x35f   :  { %3095 = vst [vmem:[#allocation11 + $0x110] sm:$0xff] %v3031_v56  ;;  %3232 = vrsqrt.f32 %v2194_v5  ;;  %v1953_v63 = vmul.f32 %v4591_v46, %v4591_v46  ;;  %vm2589_vm14 = vmor %vm2587_vm13, %vm2588_vm12  ;;  %vm2597_vm0 = vweird.f32 %v2194_v5 }
 0x360   :  { %v2580_v14 = vsel %vm2579_vm11, %v3229_v2, %v2576_v37  ;;  %v2583_v39 = vmul.f32 %v3231_v60, %v2582_v51 }
 0x361   :  { %v2896_v43 = vmul.f32 %v2580_v14, %v4324_v20  ;;  %2069 = vadd.xlane.f32.xlu2 %v1953_v63 }
 0x362   :  { %v2584_v23 = vmul.f32 0.5, %v2583_v39  ;;  %v2042_v49 = vpop.xlane.xlu0 %2041  ;;  %v1752_v50 = vpop.xlane.xlu2 %1751 }
 0x363   :  { %v2964_v22 = vmul.f32 %v4565_v28, %v2896_v43  ;;  %v2131_v42 = vmul.f32 0.0078125, %v2042_v49  ;;  %v1826_v26 = vmul.f32 0.0078125, %v1752_v50 }
 0x364   :  { %v2585_v4 = vsub.f32 1.5, %v2584_v23 }
 0x365   :  { %v3233_v1 = vpop.eup %3232  ;;  %v3032_v29 = vadd.f32 %v4571_v24, %v2964_v22  ;;  %v2195_v13 = vadd.f32 1e-05, %v2131_v42  ;;  %v4599_v57 = vsub.f32 %v4382_v27, %v1826_v26 }
 0x366   :  { %v2586_v2 = vmul.f32 %v3231_v60, %v2585_v4  ;;  %v2592_v20 = vmul.f32 %v3233_v1, %v2194_v5  ;;  %vm2598_vm15 = vweird.f32 %v3233_v1 }
 0x367   :  { %3096 = vst [vmem:[#allocation11 + $0x118] sm:$0xff] %v3032_v29  ;;  %3234 = vrsqrt.f32 %v2195_v13  ;;  %v1954_v8 = vmul.f32 %v4599_v57, %v4599_v57  ;;  %vm2599_vm1 = vmor %vm2597_vm0, %vm2598_vm15  ;;  %vm2607_vm3 = vweird.f32 %v2195_v13 }
 0x368   :  { %v2590_v53 = vsel %vm2589_vm14, %v3231_v60, %v2586_v2  ;;  %v2593_v21 = vmul.f32 %v3233_v1, %v2592_v20 }
 0x369   :  { %v2897_v30 = vmul.f32 %v2590_v53, %v4341_v59  ;;  %2071 = vadd.xlane.f32.xlu0 %v1954_v8 }
 0x36a   :  { %v2594_v12 = vmul.f32 0.5, %v2593_v21  ;;  %v2044_v61 = vpop.xlane.xlu1 %2043  ;;  %v1754_v47 = vpop.xlane.xlu0 %1753 }
 0x36b   :  { %v2965_v27 = vmul.f32 %v4565_v28, %v2897_v30  ;;  %v2132_v44 = vmul.f32 0.0078125, %v2044_v61  ;;  %v1827_v48 = vmul.f32 0.0078125, %v1754_v47 }
 0x36c   :  { %v2595_v54 = vsub.f32 1.5, %v2594_v12 }
 0x36d   :  { %v3235_v55 = vpop.eup %3234  ;;  %v3033_v25 = vadd.f32 %v4571_v24, %v2965_v27  ;;  %v2196_v56 = vadd.f32 1e-05, %v2132_v44  ;;  %v4607_v37 = vsub.f32 %v4399_v58, %v1827_v48 }
 0x36e   :  { %v2596_v60 = vmul.f32 %v3233_v1, %v2595_v54  ;;  %v2602_v59 = vmul.f32 %v3235_v55, %v2195_v13  ;;  %vm2608_vm2 = vweird.f32 %v3235_v55 }
 0x36f   :  { %3097 = vst [vmem:[#allocation11 + $0x120] sm:$0xff] %v3033_v25  ;;  %3236 = vrsqrt.f32 %v2196_v56  ;;  %v1955_v51 = vmul.f32 %v4607_v37, %v4607_v37  ;;  %vm2609_vm4 = vmor %vm2607_vm3, %vm2608_vm2  ;;  %vm2617_vm6 = vweird.f32 %v2196_v56 }
 0x370   :  { %v2600_v63 = vsel %vm2599_vm1, %v3233_v1, %v2596_v60  ;;  %v2603_v14 = vmul.f32 %v3235_v55, %v2602_v59 }
 0x371   :  { %v2898_v39 = vmul.f32 %v2600_v63, %v4358_v0  ;;  %2073 = vadd.xlane.f32.xlu1 %v1955_v51 }
 0x372   :  { %v2604_v43 = vmul.f32 0.5, %v2603_v14  ;;  %v2046_v23 = vpop.xlane.xlu2 %2045  ;;  %v1756_v49 = vpop.xlane.xlu1 %1755 }
 0x373   :  { %v2966_v58 = vmul.f32 %v4565_v28, %v2898_v39  ;;  %v2133_v50 = vmul.f32 0.0078125, %v2046_v23  ;;  %v1828_v22 = vmul.f32 0.0078125, %v1756_v49 }
 0x374   :  { %v2605_v5 = vsub.f32 1.5, %v2604_v43 }
 0x375   :  { %v3237_v42 = vpop.eup %3236  ;;  %v3034_v26 = vadd.f32 %v4571_v24, %v2966_v58  ;;  %v2197_v4 = vadd.f32 1e-05, %v2133_v50  ;;  %v4615_v29 = vsub.f32 %v4416_v9, %v1828_v22 }
 0x376   :  { %v2606_v1 = vmul.f32 %v3235_v55, %v2605_v5  ;;  %v2612_v0 = vmul.f32 %v3237_v42, %v2196_v56  ;;  %vm2618_vm5 = vweird.f32 %v3237_v42 }
 0x377   :  { %3098 = vst [vmem:[#allocation11 + $0x128] sm:$0xff] %v3034_v26  ;;  %3238 = vrsqrt.f32 %v2197_v4  ;;  %v1956_v2 = vmul.f32 %v4615_v29, %v4615_v29  ;;  %vm2619_vm7 = vmor %vm2617_vm6, %vm2618_vm5  ;;  %vm2627_vm9 = vweird.f32 %v2197_v4 }
 0x378   :  { %v2610_v20 = vsel %vm2609_vm4, %v3235_v55, %v2606_v1  ;;  %v2613_v8 = vmul.f32 %v3237_v42, %v2612_v0 }
 0x379   :  { %v2899_v53 = vmul.f32 %v2610_v20, %v4375_v17  ;;  %2075 = vadd.xlane.f32.xlu2 %v1956_v2 }
 0x37a   :  { %v2614_v21 = vmul.f32 0.5, %v2613_v8  ;;  %v2048_v30 = vpop.xlane.xlu0 %2047  ;;  %v1758_v12 = vpop.xlane.xlu2 %1757 }
 0x37b   :  { %v2967_v9 = vmul.f32 %v4565_v28, %v2899_v53  ;;  %v2134_v61 = vmul.f32 0.0078125, %v2048_v30  ;;  %v1829_v47 = vmul.f32 0.0078125, %v1758_v12 }
 0x37c   :  { %v2615_v13 = vsub.f32 1.5, %v2614_v21 }
 0x37d   :  { %v3239_v27 = vpop.eup %3238  ;;  %v3035_v44 = vadd.f32 %v4571_v24, %v2967_v9  ;;  %v2198_v48 = vadd.f32 1e-05, %v2134_v61  ;;  %v4623_v54 = vsub.f32 %v4433_v36, %v1829_v47 }
 0x37e   :  { %v2616_v55 = vmul.f32 %v3237_v42, %v2615_v13  ;;  %v2622_v17 = vmul.f32 %v3239_v27, %v2197_v4  ;;  %vm2628_vm8 = vweird.f32 %v3239_v27 }
 0x37f   :  { %3099 = vst [vmem:[#allocation11 + $0x130] sm:$0xff] %v3035_v44  ;;  %3240 = vrsqrt.f32 %v2198_v48  ;;  %v1957_v25 = vmul.f32 %v4623_v54, %v4623_v54  ;;  %vm2629_vm10 = vmor %vm2627_vm9, %vm2628_vm8  ;;  %vm2637_vm12 = vweird.f32 %v2198_v48 }
 0x380   :  { %v2620_v60 = vsel %vm2619_vm7, %v3237_v42, %v2616_v55  ;;  %v2623_v59 = vmul.f32 %v3239_v27, %v2622_v17 }
 0x381   :  { %v2900_v51 = vmul.f32 %v2620_v60, %v4392_v16  ;;  %2077 = vadd.xlane.f32.xlu0 %v1957_v25 }
 0x382   :  { %v2624_v63 = vmul.f32 0.5, %v2623_v59  ;;  %v2050_v14 = vpop.xlane.xlu1 %2049  ;;  %v1760_v39 = vpop.xlane.xlu0 %1759 }
 0x383   :  { %v2968_v36 = vmul.f32 %v4565_v28, %v2900_v51  ;;  %v2135_v43 = vmul.f32 0.0078125, %v2050_v14  ;;  %v1830_v23 = vmul.f32 0.0078125, %v1760_v39 }
 0x384   :  { %v2625_v56 = vsub.f32 1.5, %v2624_v63 }
 0x385   :  { %v3241_v49 = vpop.eup %3240  ;;  %v3036_v58 = vadd.f32 %v4571_v24, %v2968_v36  ;;  %v2199_v50 = vadd.f32 1e-05, %v2135_v43  ;;  %v4631_v22 = vsub.f32 %v4450_v11, %v1830_v23 }
 0x386   :  { %v2626_v5 = vmul.f32 %v3239_v27, %v2625_v56  ;;  %v2632_v16 = vmul.f32 %v3241_v49, %v2198_v48  ;;  %vm2638_vm11 = vweird.f32 %v3241_v49 }
 0x387   :  { %3100 = vst [vmem:[#allocation11 + $0x138] sm:$0xff] %v3036_v58  ;;  %3242 = vrsqrt.f32 %v2199_v50  ;;  %v1958_v42 = vmul.f32 %v4631_v22, %v4631_v22  ;;  %vm2639_vm13 = vmor %vm2637_vm12, %vm2638_vm11  ;;  %vm2647_vm15 = vweird.f32 %v2199_v50 }
 0x388   :  { %v2630_v26 = vsel %vm2629_vm10, %v3239_v27, %v2626_v5  ;;  %v2633_v1 = vmul.f32 %v3241_v49, %v2632_v16 }
 0x389   :  { %v2901_v0 = vmul.f32 %v2630_v26, %v4409_v41  ;;  %2079 = vadd.xlane.f32.xlu1 %v1958_v42 }
 0x38a   :  { %v2634_v2 = vmul.f32 0.5, %v2633_v1  ;;  %v2052_v20 = vpop.xlane.xlu2 %2051  ;;  %v1762_v8 = vpop.xlane.xlu1 %1761 }
 0x38b   :  { %v2969_v11 = vmul.f32 %v4565_v28, %v2901_v0  ;;  %v2136_v53 = vmul.f32 0.0078125, %v2052_v20  ;;  %v1831_v21 = vmul.f32 0.0078125, %v1762_v8 }
 0x38c   :  { %v2635_v4 = vsub.f32 1.5, %v2634_v2 }
 0x38d   :  { %v3243_v30 = vpop.eup %3242  ;;  %v3037_v12 = vadd.f32 %v4571_v24, %v2969_v11  ;;  %v2200_v9 = vadd.f32 1e-05, %v2136_v53  ;;  %v4639_v61 = vsub.f32 %v4467_v45, %v1831_v21 }
 0x38e   :  { %v2636_v47 = vmul.f32 %v3241_v49, %v2635_v4  ;;  %v2642_v41 = vmul.f32 %v3243_v30, %v2199_v50  ;;  %vm2648_vm14 = vweird.f32 %v3243_v30 }
 0x38f   :  { %3101 = vst [vmem:[#allocation11 + $0x140] sm:$0xff] %v3037_v12  ;;  %3244 = vrsqrt.f32 %v2200_v9  ;;  %v1959_v13 = vmul.f32 %v4639_v61, %v4639_v61  ;;  %vm2649_vm0 = vmor %vm2647_vm15, %vm2648_vm14  ;;  %vm2657_vm2 = vweird.f32 %v2200_v9 }
 0x390   :  { %v2640_v27 = vsel %vm2639_vm13, %v3241_v49, %v2636_v47  ;;  %v2643_v44 = vmul.f32 %v3243_v30, %v2642_v41 }
 0x391   :  { %v2902_v55 = vmul.f32 %v2640_v27, %v4426_v38  ;;  %2081 = vadd.xlane.f32.xlu2 %v1959_v13 }
 0x392   :  { %v2644_v17 = vmul.f32 0.5, %v2643_v44  ;;  %v2054_v25 = vpop.xlane.xlu0 %2053  ;;  %v1764_v60 = vpop.xlane.xlu2 %1763 }
 0x393   :  { %v2970_v45 = vmul.f32 %v4565_v28, %v2902_v55  ;;  %v2137_v59 = vmul.f32 0.0078125, %v2054_v25  ;;  %v1832_v51 = vmul.f32 0.0078125, %v1764_v60 }
 0x394   :  { %v2645_v48 = vsub.f32 1.5, %v2644_v17 }
 0x395   :  { %v3245_v63 = vpop.eup %3244  ;;  %v3038_v14 = vadd.f32 %v4571_v24, %v2970_v45  ;;  %v2201_v39 = vadd.f32 1e-05, %v2137_v59  ;;  %v4647_v36 = vsub.f32 %v4484_v33, %v1832_v51 }
 0x396   :  { %v2646_v43 = vmul.f32 %v3243_v30, %v2645_v48  ;;  %v2652_v38 = vmul.f32 %v3245_v63, %v2200_v9  ;;  %vm2658_vm1 = vweird.f32 %v3245_v63 }
 0x397   :  { %3102 = vst [vmem:[#allocation11 + $0x148] sm:$0xff] %v3038_v14  ;;  %3246 = vrsqrt.f32 %v2201_v39  ;;  %v1960_v23 = vmul.f32 %v4647_v36, %v4647_v36  ;;  %vm2659_vm3 = vmor %vm2657_vm2, %vm2658_vm1  ;;  %vm2667_vm5 = vweird.f32 %v2201_v39 }
 0x398   :  { %v2650_v56 = vsel %vm2649_vm0, %v3243_v30, %v2646_v43  ;;  %v2653_v49 = vmul.f32 %v3245_v63, %v2652_v38 }
 0x399   :  { %v2903_v58 = vmul.f32 %v2650_v56, %v4443_v31  ;;  %2083 = vadd.xlane.f32.xlu0 %v1960_v23 }
 0x39a   :  { %v2654_v5 = vmul.f32 0.5, %v2653_v49  ;;  %v2056_v16 = vpop.xlane.xlu1 %2055  ;;  %v1766_v42 = vpop.xlane.xlu0 %1765 }
 0x39b   :  { %v2971_v33 = vmul.f32 %v4565_v28, %v2903_v58  ;;  %v2138_v26 = vmul.f32 0.0078125, %v2056_v16  ;;  %v1833_v1 = vmul.f32 0.0078125, %v1766_v42 }
 0x39c   :  { %v2655_v50 = vsub.f32 1.5, %v2654_v5 }
 0x39d   :  { %v3247_v0 = vpop.eup %3246  ;;  %v3039_v2 = vadd.f32 %v4571_v24, %v2971_v33  ;;  %v2202_v20 = vadd.f32 1e-05, %v2138_v26  ;;  %v4655_v8 = vsub.f32 %v4506_v19, %v1833_v1 }
 0x39e   :  { %v2656_v11 = vmul.f32 %v3245_v63, %v2655_v50  ;;  %v2662_v31 = vmul.f32 %v3247_v0, %v2201_v39  ;;  %vm2668_vm4 = vweird.f32 %v3247_v0 }
 0x39f   :  { %3103 = vst [vmem:[#allocation11 + $0x150] sm:$0xff] %v3039_v2  ;;  %3248 = vrsqrt.f32 %v2202_v20  ;;  %v1961_v53 = vmul.f32 %v4655_v8, %v4655_v8  ;;  %vm2669_vm6 = vmor %vm2667_vm5, %vm2668_vm4  ;;  %vm2677_vm8 = vweird.f32 %v2202_v20 }
 0x3a0   :  { %v2660_v21 = vsel %vm2659_vm3, %v3245_v63, %v2656_v11  ;;  %v2663_v4 = vmul.f32 %v3247_v0, %v2662_v31 }
 0x3a1   :  { %v2904_v30 = vmul.f32 %v2660_v21, %v4460_v18  ;;  %2085 = vadd.xlane.f32.xlu1 %v1961_v53 }
 0x3a2   :  { %v2664_v12 = vmul.f32 0.5, %v2663_v4  ;;  %v1768_v47 = vpop.xlane.xlu1 %1767 }
 0x3a3   :  { %v2972_v41 = vmul.f32 %v4565_v28, %v2904_v30  ;;  %v1834_v19 = vmul.f32 0.0078125, %v1768_v47 }
 0x3a4   :  { %v2665_v13 = vsub.f32 1.5, %v2664_v12 }
 0x3a5   :  { %v1770_v9 = vpop.xlane.xlu2 %1769  ;;  %v3249_v27 = vpop.eup %3248  ;;  %v3040_v44 = vadd.f32 %v4571_v24, %v2972_v41  ;;  %v4663_v55 = vsub.f32 %v4519_v34, %v1834_v19 }
 0x3a6   :  { %v1835_v17 = vmul.f32 0.0078125, %v1770_v9  ;;  %v2666_v25 = vmul.f32 %v3247_v0, %v2665_v13  ;;  %v2672_v60 = vmul.f32 %v3249_v27, %v2202_v20  ;;  %vm2678_vm7 = vweird.f32 %v3249_v27 }
 0x3a7   :  { %3104 = vst [vmem:[#allocation11 + $0x158] sm:$0xff] %v3040_v44  ;;  %v1962_v45 = vmul.f32 %v4663_v55, %v4663_v55  ;;  %vm2679_vm9 = vmor %vm2677_vm8, %vm2678_vm7 }
 0x3a8   :  { %v4666_v18 = vsub.f32 %v4523_v6, %v1835_v17  ;;  %v2670_v59 = vsel %vm2669_vm6, %v3247_v0, %v2666_v25  ;;  %v2673_v51 = vmul.f32 %v3249_v27, %v2672_v60 }
 0x3a9   :  { %v2905_v48 = vmul.f32 %v2670_v59, %v4477_v52  ;;  %2087 = vadd.xlane.f32.xlu2 %v1962_v45 }
 0x3aa   :  { %v1963_v34 = vmul.f32 %v4666_v18, %v4666_v18  ;;  %v2674_v63 = vmul.f32 0.5, %v2673_v51 }
 0x3ab   :  { %v2973_v14 = vmul.f32 %v4565_v28, %v2905_v48 }
 0x3ac   :  { %2089 = vadd.xlane.f32.xlu0 %v1963_v34  ;;  %v2675_v39 = vsub.f32 1.5, %v2674_v63 }
 0x3ad   :  { %v2058_v43 = vpop.xlane.xlu2 %2057  ;;  %v1772_v6 = vpop.xlane.xlu0 %1771  ;;  %v3041_v38 = vadd.f32 %v4571_v24, %v2973_v14 }
 0x3ae   :  { %v2139_v23 = vmul.f32 0.0078125, %v2058_v43  ;;  %v1836_v56 = vmul.f32 0.0078125, %v1772_v6  ;;  %v2676_v49 = vmul.f32 %v3249_v27, %v2675_v39 }
 0x3af   :  { %3105 = vst [vmem:[#allocation11 + $0x160] sm:$0xff] %v3041_v38 }
 0x3b0   :  { %v2203_v52 = vadd.f32 1e-05, %v2139_v23  ;;  %v4676_v58 = vsub.f32 %v4537_v32, %v1836_v56  ;;  %v2680_v5 = vsel %vm2679_vm9, %v3249_v27, %v2676_v49 }
 0x3b1   :  { %v2906_v16 = vmul.f32 %v2680_v5, %v4499_v10 }
 0x3b2   :  { %3250 = vrsqrt.f32 %v2203_v52  ;;  %v1964_v42 = vmul.f32 %v4676_v58, %v4676_v58  ;;  %vm2687_vm11 = vweird.f32 %v2203_v52 }
 0x3b3   :  { %v2974_v33 = vmul.f32 %v4565_v28, %v2906_v16 }
 0x3b4   :  { %2091 = vadd.xlane.f32.xlu1 %v1964_v42  ;;  %v2062_v26 = vpop.xlane.xlu1 %2061 }
 0x3b5   :  { %v2141_v1 = vmul.f32 0.0078125, %v2062_v26  ;;  %v2060_v50 = vpop.xlane.xlu0 %2059  ;;  %v3042_v0 = vadd.f32 %v4571_v24, %v2974_v33 }
 0x3b6   :  { %v2140_v2 = vmul.f32 0.0078125, %v2060_v50 }
 0x3b7   :  { %v2205_v20 = vadd.f32 1e-05, %v2141_v1  ;;  %3106 = vst [vmem:[#allocation11 + $0x168] sm:$0xff] %v3042_v0 }
 0x3b8   :  { %v3251_v11 = vpop.eup %3250  ;;  %v2204_v32 = vadd.f32 1e-05, %v2140_v2 }
 0x3b9   :  { %v2682_v31 = vmul.f32 %v3251_v11, %v2203_v52  ;;  %3252 = vrsqrt.f32 %v2205_v20  ;;  %vm2688_vm10 = vweird.f32 %v3251_v11  ;;  %vm2707_vm15 = vweird.f32 %v2205_v20 }
 0x3ba   :  { %3254 = vrsqrt.f32 %v2204_v32  ;;  %vm2689_vm12 = vmor %vm2687_vm11, %vm2688_vm10  ;;  %vm2697_vm1 = vweird.f32 %v2204_v32 }
 0x3bb   :  { %v2683_v10 = vmul.f32 %v3251_v11, %v2682_v31 }
 0x3bc   :  { %v2064_v21 = vpop.xlane.xlu2 %2063 }
 0x3bd   :  { %v2684_v53 = vmul.f32 0.5, %v2683_v10  ;;  %v2142_v4 = vmul.f32 0.0078125, %v2064_v21 }
 0x3bf   :  { %v3253_v30 = vpop.eup %3252  ;;  %v2685_v12 = vsub.f32 1.5, %v2684_v53  ;;  %v2206_v19 = vadd.f32 1e-05, %v2142_v4 }
 0x3c0   :  { %v3255_v47 = vpop.eup %3254  ;;  %v2702_v41 = vmul.f32 %v3253_v30, %v2205_v20  ;;  %vm2708_vm13 = vweird.f32 %v3253_v30 }
 0x3c1   :  { %v2686_v13 = vmul.f32 %v3251_v11, %v2685_v12  ;;  %v2692_v9 = vmul.f32 %v3255_v47, %v2204_v32  ;;  %3256 = vrsqrt.f32 %v2206_v19  ;;  %vm2698_vm14 = vweird.f32 %v3255_v47  ;;  %vm2709_vm0 = vmor %vm2707_vm15, %vm2708_vm13 }
 0x3c2   :  { %v2703_v27 = vmul.f32 %v3253_v30, %v2702_v41  ;;  %vm2699_vm2 = vmor %vm2697_vm1, %vm2698_vm14  ;;  %vm2717_vm4 = vweird.f32 %v2206_v19 }
 0x3c3   :  { %v2690_v44 = vsel %vm2689_vm12, %v3251_v11, %v2686_v13  ;;  %v2693_v17 = vmul.f32 %v3255_v47, %v2692_v9 }
 0x3c4   :  { %v2907_v25 = vmul.f32 %v2690_v44, %v4528_v40  ;;  %v2704_v60 = vmul.f32 0.5, %v2703_v27  ;;  %v2066_v59 = vpop.xlane.xlu0 %2065 }
 0x3c5   :  { %v2694_v45 = vmul.f32 0.5, %v2693_v17  ;;  %v2143_v34 = vmul.f32 0.0078125, %v2066_v59 }
 0x3c6   :  { %v2975_v51 = vmul.f32 %v4565_v28, %v2907_v25  ;;  %v2705_v48 = vsub.f32 1.5, %v2704_v60 }
 0x3c7   :  { %v2695_v63 = vsub.f32 1.5, %v2694_v45  ;;  %v3257_v14 = vpop.eup %3256  ;;  %v2207_v6 = vadd.f32 1e-05, %v2143_v34 }
 0x3c8   :  { %v3043_v39 = vadd.f32 %v4571_v24, %v2975_v51  ;;  %v2706_v43 = vmul.f32 %v3253_v30, %v2705_v48  ;;  %v2712_v40 = vmul.f32 %v3257_v14, %v2206_v19  ;;  %vm2718_vm3 = vweird.f32 %v3257_v14 }
 0x3c9   :  { %v2696_v38 = vmul.f32 %v3255_v47, %v2695_v63  ;;  %3258 = vrsqrt.f32 %v2207_v6  ;;  %vm2719_vm5 = vmor %vm2717_vm4, %vm2718_vm3  ;;  %vm2727_vm7 = vweird.f32 %v2207_v6 }
 0x3ca   :  { %3107 = vst [vmem:[#allocation11 + $0x170] sm:$0xff] %v3043_v39  ;;  %v2710_v23 = vsel %vm2709_vm0, %v3253_v30, %v2706_v43  ;;  %v2713_v52 = vmul.f32 %v3257_v14, %v2712_v40 }
 0x3cb   :  { %v2909_v56 = vmul.f32 %v2710_v23, %v4547_v62  ;;  %v2700_v49 = vsel %vm2699_vm2, %v3255_v47, %v2696_v38 }
 0x3cc   :  { %v2908_v5 = vmul.f32 %v2700_v49, %v4544_v3  ;;  %v2714_v42 = vmul.f32 0.5, %v2713_v52  ;;  %v2068_v33 = vpop.xlane.xlu1 %2067 }
 0x3cd   :  { %v2977_v16 = vmul.f32 %v4565_v28, %v2909_v56  ;;  %v2144_v1 = vmul.f32 0.0078125, %v2068_v33 }
 0x3ce   :  { %v2976_v26 = vmul.f32 %v4565_v28, %v2908_v5  ;;  %v2715_v0 = vsub.f32 1.5, %v2714_v42 }
 0x3cf   :  { %v3045_v50 = vadd.f32 %v4571_v24, %v2977_v16  ;;  %v3259_v2 = vpop.eup %3258  ;;  %v2208_v11 = vadd.f32 1e-05, %v2144_v1 }
 0x3d0   :  { %v3044_v20 = vadd.f32 %v4571_v24, %v2976_v26  ;;  %v2716_v62 = vmul.f32 %v3257_v14, %v2715_v0  ;;  %v2722_v32 = vmul.f32 %v3259_v2, %v2207_v6  ;;  %vm2728_vm6 = vweird.f32 %v3259_v2 }
 0x3d1   :  { %3109 = vst [vmem:[#allocation11 + $0x180] sm:$0xff] %v3045_v50  ;;  %3260 = vrsqrt.f32 %v2208_v11  ;;  %vm2729_vm8 = vmor %vm2727_vm7, %vm2728_vm6  ;;  %vm2737_vm10 = vweird.f32 %v2208_v11 }
 0x3d2   :  { %3108 = vst [vmem:[#allocation11 + $0x178] sm:$0xff] %v3044_v20  ;;  %v2720_v3 = vsel %vm2719_vm5, %v3257_v14, %v2716_v62  ;;  %v2723_v31 = vmul.f32 %v3259_v2, %v2722_v32 }
 0x3d3   :  { %v2910_v10 = vmul.f32 %v2720_v3, %v4557_v7 }
 0x3d4   :  { %v2724_v53 = vmul.f32 0.5, %v2723_v31  ;;  %v2070_v21 = vpop.xlane.xlu2 %2069 }
 0x3d5   :  { %v2978_v4 = vmul.f32 %v4565_v28, %v2910_v10  ;;  %v2145_v30 = vmul.f32 0.0078125, %v2070_v21 }
 0x3d6   :  { %v2725_v12 = vsub.f32 1.5, %v2724_v53 }
 0x3d7   :  { %v3261_v47 = vpop.eup %3260  ;;  %v3046_v41 = vadd.f32 %v4571_v24, %v2978_v4  ;;  %v2209_v13 = vadd.f32 1e-05, %v2145_v30 }
 0x3d8   :  { %v2726_v19 = vmul.f32 %v3259_v2, %v2725_v12  ;;  %v2732_v9 = vmul.f32 %v3261_v47, %v2208_v11  ;;  %vm2738_vm9 = vweird.f32 %v3261_v47 }
 0x3d9   :  { %3110 = vst [vmem:[#allocation11 + $0x188] sm:$0xff] %v3046_v41  ;;  %3262 = vrsqrt.f32 %v2209_v13  ;;  %vm2739_vm11 = vmor %vm2737_vm10, %vm2738_vm9  ;;  %vm2747_vm13 = vweird.f32 %v2209_v13 }
 0x3da   :  { %v2730_v27 = vsel %vm2729_vm8, %v3259_v2, %v2726_v19  ;;  %v2733_v44 = vmul.f32 %v3261_v47, %v2732_v9 }
 0x3db   :  { %v2911_v7 = vmul.f32 %v2730_v27, %v4575_v15 }
 0x3dc   :  { %v2734_v17 = vmul.f32 0.5, %v2733_v44  ;;  %v2072_v25 = vpop.xlane.xlu0 %2071 }
 0x3dd   :  { %v2979_v60 = vmul.f32 %v4565_v28, %v2911_v7  ;;  %v2146_v45 = vmul.f32 0.0078125, %v2072_v25 }
 0x3de   :  { %v2735_v59 = vsub.f32 1.5, %v2734_v17 }
 0x3df   :  { %v3263_v51 = vpop.eup %3262  ;;  %v3047_v48 = vadd.f32 %v4571_v24, %v2979_v60  ;;  %v2210_v34 = vadd.f32 1e-05, %v2146_v45 }
 0x3e0   :  { %v2736_v63 = vmul.f32 %v3261_v47, %v2735_v59  ;;  %v2742_v14 = vmul.f32 %v3263_v51, %v2209_v13  ;;  %vm2748_vm12 = vweird.f32 %v3263_v51 }
 0x3e1   :  { %3111 = vst [vmem:[#allocation11 + $0x190] sm:$0xff] %v3047_v48  ;;  %3264 = vrsqrt.f32 %v2210_v34  ;;  %vm2749_vm14 = vmor %vm2747_vm13, %vm2748_vm12  ;;  %vm2757_vm0 = vweird.f32 %v2210_v34 }
 0x3e2   :  { %v2740_v39 = vsel %vm2739_vm11, %v3261_v47, %v2736_v63  ;;  %v2743_v43 = vmul.f32 %v3263_v51, %v2742_v14 }
 0x3e3   :  { %v2912_v15 = vmul.f32 %v2740_v39, %v4583_v35 }
 0x3e4   :  { %v2744_v6 = vmul.f32 0.5, %v2743_v43  ;;  %v2074_v38 = vpop.xlane.xlu1 %2073 }
 0x3e5   :  { %v2980_v40 = vmul.f32 %v4565_v28, %v2912_v15  ;;  %v2147_v23 = vmul.f32 0.0078125, %v2074_v38 }
 0x3e6   :  { %v2745_v56 = vsub.f32 1.5, %v2744_v6 }
 0x3e7   :  { %v3265_v49 = vpop.eup %3264  ;;  %v3048_v52 = vadd.f32 %v4571_v24, %v2980_v40  ;;  %v2211_v5 = vadd.f32 1e-05, %v2147_v23 }
 0x3e8   :  { %v2746_v16 = vmul.f32 %v3263_v51, %v2745_v56  ;;  %v2752_v42 = vmul.f32 %v3265_v49, %v2210_v34  ;;  %vm2758_vm15 = vweird.f32 %v3265_v49 }
 0x3e9   :  { %3112 = vst [vmem:[#allocation11 + $0x198] sm:$0xff] %v3048_v52  ;;  %3266 = vrsqrt.f32 %v2211_v5  ;;  %vm2759_vm1 = vmor %vm2757_vm0, %vm2758_vm15  ;;  %vm2767_vm3 = vweird.f32 %v2211_v5 }
 0x3ea   :  { %v2750_v33 = vsel %vm2749_vm14, %v3263_v51, %v2746_v16  ;;  %v2753_v26 = vmul.f32 %v3265_v49, %v2752_v42 }
 0x3eb   :  { %v2913_v35 = vmul.f32 %v2750_v33, %v4591_v46 }
 0x3ec   :  { %v2754_v1 = vmul.f32 0.5, %v2753_v26  ;;  %v2076_v50 = vpop.xlane.xlu2 %2075 }
 0x3ed   :  { %v2981_v0 = vmul.f32 %v4565_v28, %v2913_v35  ;;  %v2148_v2 = vmul.f32 0.0078125, %v2076_v50 }
 0x3ee   :  { %v2755_v20 = vsub.f32 1.5, %v2754_v1 }
 0x3ef   :  { %v3267_v11 = vpop.eup %3266  ;;  %v3049_v62 = vadd.f32 %v4571_v24, %v2981_v0  ;;  %v2212_v32 = vadd.f32 1e-05, %v2148_v2 }
 0x3f0   :  { %v2756_v3 = vmul.f32 %v3265_v49, %v2755_v20  ;;  %v2762_v31 = vmul.f32 %v3267_v11, %v2211_v5  ;;  %vm2768_vm2 = vweird.f32 %v3267_v11 }
 0x3f1   :  { %3113 = vst [vmem:[#allocation11 + $0x1a0] sm:$0xff] %v3049_v62  ;;  %3268 = vrsqrt.f32 %v2212_v32  ;;  %vm2769_vm4 = vmor %vm2767_vm3, %vm2768_vm2  ;;  %vm2777_vm6 = vweird.f32 %v2212_v32 }
 0x3f2   :  { %v2760_v10 = vsel %vm2759_vm1, %v3265_v49, %v2756_v3  ;;  %v2763_v53 = vmul.f32 %v3267_v11, %v2762_v31 }
 0x3f3   :  { %v2914_v46 = vmul.f32 %v2760_v10, %v4599_v57 }
 0x3f4   :  { %v2764_v21 = vmul.f32 0.5, %v2763_v53  ;;  %v2078_v4 = vpop.xlane.xlu0 %2077 }
 0x3f5   :  { %v2982_v30 = vmul.f32 %v4565_v28, %v2914_v46  ;;  %v2149_v12 = vmul.f32 0.0078125, %v2078_v4 }
 0x3f6   :  { %v2765_v47 = vsub.f32 1.5, %v2764_v21 }
 0x3f7   :  { %v3269_v41 = vpop.eup %3268  ;;  %v3050_v13 = vadd.f32 %v4571_v24, %v2982_v30  ;;  %v2213_v19 = vadd.f32 1e-05, %v2149_v12  ;;  %v4726_v30 = vld [vmem:[%s4759_s6] ss:$0 sm:$0xff] }
 0x3f8   :  { %v2766_v9 = vmul.f32 %v3267_v11, %v2765_v47  ;;  %v2772_v27 = vmul.f32 %v3269_v41, %v2212_v32  ;;  %vm2778_vm5 = vweird.f32 %v3269_v41 }
 0x3f9   :  { %3114 = vst [vmem:[#allocation11 + $0x1a8] sm:$0xff] %v3050_v13  ;;  %3270 = vrsqrt.f32 %v2213_v19  ;;  %vm2779_vm7 = vmor %vm2777_vm6, %vm2778_vm5  ;;  %vm2787_vm9 = vweird.f32 %v2213_v19 }
 0x3fa   :  { %v2770_v44 = vsel %vm2769_vm4, %v3267_v11, %v2766_v9  ;;  %v2773_v7 = vmul.f32 %v3269_v41, %v2772_v27 }
 0x3fb   :  { %v2915_v57 = vmul.f32 %v2770_v44, %v4607_v37 }
 0x3fc   :  { %v2774_v17 = vmul.f32 0.5, %v2773_v7  ;;  %v2080_v25 = vpop.xlane.xlu1 %2079 }
 0x3fd   :  { %v2983_v60 = vmul.f32 %v4565_v28, %v2915_v57  ;;  %v2150_v45 = vmul.f32 0.0078125, %v2080_v25 }
 0x3fe   :  { %v2775_v59 = vsub.f32 1.5, %v2774_v17 }
 0x3ff   :  { %v3271_v51 = vpop.eup %3270  ;;  %v3051_v48 = vadd.f32 %v4571_v24, %v2983_v60  ;;  %v2214_v34 = vadd.f32 1e-05, %v2150_v45 }
 0x400   :  { %v2776_v63 = vmul.f32 %v3269_v41, %v2775_v59  ;;  %v2782_v14 = vmul.f32 %v3271_v51, %v2213_v19  ;;  %vm2788_vm8 = vweird.f32 %v3271_v51 }
 0x401   :  { %3115 = vst [vmem:[#allocation11 + $0x1b0] sm:$0xff] %v3051_v48  ;;  %3272 = vrsqrt.f32 %v2214_v34  ;;  %vm2789_vm10 = vmor %vm2787_vm9, %vm2788_vm8  ;;  %vm2797_vm12 = vweird.f32 %v2214_v34 }
 0x402   :  { %v2780_v39 = vsel %vm2779_vm7, %v3269_v41, %v2776_v63  ;;  %v2783_v43 = vmul.f32 %v3271_v51, %v2782_v14 }
 0x403   :  { %v2916_v37 = vmul.f32 %v2780_v39, %v4615_v29 }
 0x404   :  { %v2784_v15 = vmul.f32 0.5, %v2783_v43  ;;  %v2082_v6 = vpop.xlane.xlu2 %2081 }
 0x405   :  { %v2984_v38 = vmul.f32 %v4565_v28, %v2916_v37  ;;  %v2151_v40 = vmul.f32 0.0078125, %v2082_v6 }
 0x406   :  { %v2785_v23 = vsub.f32 1.5, %v2784_v15 }
 0x407   :  { %v3273_v56 = vpop.eup %3272  ;;  %v3052_v49 = vadd.f32 %v4571_v24, %v2984_v38  ;;  %v2215_v52 = vadd.f32 1e-05, %v2151_v40 }
 0x408   :  { %v2786_v5 = vmul.f32 %v3271_v51, %v2785_v23  ;;  %v2792_v16 = vmul.f32 %v3273_v56, %v2214_v34  ;;  %vm2798_vm11 = vweird.f32 %v3273_v56 }
 0x409   :  { %3116 = vst [vmem:[#allocation11 + $0x1b8] sm:$0xff] %v3052_v49  ;;  %3274 = vrsqrt.f32 %v2215_v52  ;;  %vm2799_vm13 = vmor %vm2797_vm12, %vm2798_vm11  ;;  %vm2807_vm15 = vweird.f32 %v2215_v52 }
 0x40a   :  { %v2790_v42 = vsel %vm2789_vm10, %v3271_v51, %v2786_v5  ;;  %v2793_v33 = vmul.f32 %v3273_v56, %v2792_v16 }
 0x40b   :  { %v2917_v29 = vmul.f32 %v2790_v42, %v4623_v54 }
 0x40c   :  { %v2794_v26 = vmul.f32 0.5, %v2793_v33  ;;  %v2084_v35 = vpop.xlane.xlu0 %2083 }
 0x40d   :  { %v2985_v1 = vmul.f32 %v4565_v28, %v2917_v29  ;;  %v2152_v50 = vmul.f32 0.0078125, %v2084_v35  ;;  %v4720_v28 = vld [vmem:[%s4758_s5] ss:$0 sm:$0xff]  ;;  %s3476_s5 = smov [#allocation11]  }
 0x40e   :  { %v2795_v0 = vsub.f32 1.5, %v2794_v26  ;;  %s3129_s6 = sshll.u32 %s3476_s5, 4  ;;  %s3130_s6 = int_to_ptr.vmem [resolvable:$true] %s3129_s6 }
 0x40f   :  { %v3275_v2 = vpop.eup %3274  ;;  %v3053_v20 = vadd.f32 %v4571_v24, %v2985_v1  ;;  %v2216_v11 = vadd.f32 1e-05, %v2152_v50 }
 0x410   :  { %v2796_v62 = vmul.f32 %v3273_v56, %v2795_v0  ;;  %v2802_v32 = vmul.f32 %v3275_v2, %v2215_v52  ;;  %vm2808_vm14 = vweird.f32 %v3275_v2 }
 0x411   :  { %3117 = vst [vmem:[#allocation11 + $0x1c0] sm:$0xff] %v3053_v20  ;;  %3276 = vrsqrt.f32 %v2216_v11  ;;  %vm2809_vm0 = vmor %vm2807_vm15, %vm2808_vm14  ;;  %vm2817_vm2 = vweird.f32 %v2216_v11 }
 0x412   :  { %v2800_v3 = vsel %vm2799_vm13, %v3273_v56, %v2796_v62  ;;  %v2803_v31 = vmul.f32 %v3275_v2, %v2802_v32 }
 0x413   :  { %v2918_v54 = vmul.f32 %v2800_v3, %v4631_v22 }
 0x414   :  { %v2804_v10 = vmul.f32 0.5, %v2803_v31  ;;  %v2086_v53 = vpop.xlane.xlu1 %2085 }
 0x415   :  { %v2986_v24 = vmul.f32 %v4720_v28, %v2918_v54  ;;  %v2153_v46 = vmul.f32 0.0078125, %v2086_v53 }
 0x416   :  { %v2805_v21 = vsub.f32 1.5, %v2804_v10 }
 0x417   :  { %v3277_v4 = vpop.eup %3276  ;;  %v3054_v22 = vadd.f32 %v4726_v30, %v2986_v24  ;;  %v2217_v12 = vadd.f32 1e-05, %v2153_v46 }
 0x418   :  { %v2806_v47 = vmul.f32 %v3275_v2, %v2805_v21  ;;  %v2812_v41 = vmul.f32 %v3277_v4, %v2216_v11  ;;  %vm2818_vm1 = vweird.f32 %v3277_v4 }
 0x419   :  { %3118 = vst [vmem:[#allocation11 + $0x1c8] sm:$0xff] %v3054_v22  ;;  %3278 = vrsqrt.f32 %v2217_v12  ;;  %vm2819_vm3 = vmor %vm2817_vm2, %vm2818_vm1  ;;  %vm2827_vm5 = vweird.f32 %v2217_v12 }
 0x41a   :  { %v2810_v13 = vsel %vm2809_vm0, %v3275_v2, %v2806_v47  ;;  %v2813_v19 = vmul.f32 %v3277_v4, %v2812_v41 }
 0x41b   :  { %v2919_v9 = vmul.f32 %v2810_v13, %v4639_v61 }
 0x41c   :  { %v2814_v27 = vmul.f32 0.5, %v2813_v19  ;;  %v2088_v44 = vpop.xlane.xlu2 %2087 }
 0x41d   :  { %v2987_v7 = vmul.f32 %v4720_v28, %v2919_v9  ;;  %v2154_v57 = vmul.f32 0.0078125, %v2088_v44 }
 0x41e   :  { %v2815_v17 = vsub.f32 1.5, %v2814_v27 }
 0x41f   :  { %v2090_v25 = vpop.xlane.xlu0 %2089  ;;  %v3279_v60 = vpop.eup %3278  ;;  %v3055_v45 = vadd.f32 %v4726_v30, %v2987_v7  ;;  %v2218_v59 = vadd.f32 1e-05, %v2154_v57 }
 0x420   :  { %v2155_v51 = vmul.f32 0.0078125, %v2090_v25  ;;  %v2816_v48 = vmul.f32 %v3277_v4, %v2815_v17  ;;  %v2822_v34 = vmul.f32 %v3279_v60, %v2217_v12  ;;  %vm2828_vm4 = vweird.f32 %v3279_v60 }
 0x421   :  { %3119 = vst [vmem:[#allocation11 + $0x1d0] sm:$0xff] %v3055_v45  ;;  %3280 = vrsqrt.f32 %v2218_v59  ;;  %vm2829_vm6 = vmor %vm2827_vm5, %vm2828_vm4  ;;  %vm2837_vm8 = vweird.f32 %v2218_v59 }
 0x422   :  { %v2219_v61 = vadd.f32 1e-05, %v2155_v51  ;;  %v2820_v63 = vsel %vm2819_vm3, %v3277_v4, %v2816_v48  ;;  %v2823_v14 = vmul.f32 %v3279_v60, %v2822_v34 }
 0x423   :  { %v2920_v39 = vmul.f32 %v2820_v63, %v4647_v36 }
 0x424   :  { %3282 = vrsqrt.f32 %v2219_v61  ;;  %v2824_v43 = vmul.f32 0.5, %v2823_v14  ;;  %vm2847_vm11 = vweird.f32 %v2219_v61 }
 0x425   :  { %v2988_v37 = vmul.f32 %v4720_v28, %v2920_v39 }
 0x426   :  { %v2825_v15 = vsub.f32 1.5, %v2824_v43 }
 0x427   :  { %v2092_v6 = vpop.xlane.xlu1 %2091  ;;  %v3281_v38 = vpop.eup %3280  ;;  %v3056_v40 = vadd.f32 %v4726_v30, %v2988_v37 }
 0x428   :  { %v2156_v23 = vmul.f32 0.0078125, %v2092_v6  ;;  %v2826_v56 = vmul.f32 %v3279_v60, %v2825_v15  ;;  %v2832_v49 = vmul.f32 %v3281_v38, %v2218_v59  ;;  %vm2838_vm7 = vweird.f32 %v3281_v38 }
 0x429   :  { %3120 = vst [vmem:[#allocation11 + $0x1d8] sm:$0xff] %v3056_v40  ;;  %vm2839_vm10 = vmor %vm2837_vm8, %vm2838_vm7 }
 0x42a   :  { %v3283_v52 = vpop.eup %3282  ;;  %v2220_v5 = vadd.f32 1e-05, %v2156_v23  ;;  %v2830_v16 = vsel %vm2829_vm6, %v3279_v60, %v2826_v56  ;;  %v2833_v36 = vmul.f32 %v3281_v38, %v2832_v49 }
 0x42b   :  { %v2842_v42 = vmul.f32 %v3283_v52, %v2219_v61  ;;  %v2921_v33 = vmul.f32 %v2830_v16, %v4655_v8  ;;  %vm2848_vm9 = vweird.f32 %v3283_v52 }
 0x42c   :  { %3284 = vrsqrt.f32 %v2220_v5  ;;  %v2834_v29 = vmul.f32 0.5, %v2833_v36  ;;  %vm2849_vm12 = vmor %vm2847_vm11, %vm2848_vm9  ;;  %vm2857_vm14 = vweird.f32 %v2220_v5 }
 0x42d   :  { %v2843_v26 = vmul.f32 %v3283_v52, %v2842_v42  ;;  %v2989_v35 = vmul.f32 %v4720_v28, %v2921_v33 }
 0x42e   :  { %v2835_v1 = vsub.f32 1.5, %v2834_v29 }
 0x42f   :  { %v2844_v50 = vmul.f32 0.5, %v2843_v26  ;;  %v3057_v0 = vadd.f32 %v4726_v30, %v2989_v35 }
 0x430   :  { %v2836_v2 = vmul.f32 %v3281_v38, %v2835_v1 }
 0x431   :  { %v2845_v20 = vsub.f32 1.5, %v2844_v50  ;;  %3121 = vst [vmem:[#allocation11 + $0x1e0] sm:$0xff] %v3057_v0 }
 0x432   :  { %v3285_v11 = vpop.eup %3284  ;;  %v2840_v62 = vsel %vm2839_vm10, %v3281_v38, %v2836_v2 }
 0x433   :  { %v2846_v32 = vmul.f32 %v3283_v52, %v2845_v20  ;;  %v2852_v8 = vmul.f32 %v3285_v11, %v2220_v5  ;;  %v2922_v3 = vmul.f32 %v2840_v62, %v4663_v55  ;;  %vm2858_vm13 = vweird.f32 %v3285_v11 }
 0x434   :  { %vm2859_vm15 = vmor %vm2857_vm14, %vm2858_vm13 }
 0x435   :  { %v2850_v31 = vsel %vm2849_vm12, %v3283_v52, %v2846_v32  ;;  %v2853_v54 = vmul.f32 %v3285_v11, %v2852_v8  ;;  %v2990_v10 = vmul.f32 %v4720_v28, %v2922_v3 }
 0x436   :  { %v2923_v53 = vmul.f32 %v2850_v31, %v4666_v18 }
 0x437   :  { %v2854_v24 = vmul.f32 0.5, %v2853_v54  ;;  %v3058_v46 = vadd.f32 %v4726_v30, %v2990_v10 }
 0x438   :  { %v2991_v21 = vmul.f32 %v4720_v28, %v2923_v53 }
 0x439   :  { %v2855_v4 = vsub.f32 1.5, %v2854_v24  ;;  %3122 = vst [vmem:[#allocation11 + $0x1e8] sm:$0xff] %v3058_v46 }
 0x43a   :  { %v3059_v22 = vadd.f32 %v4726_v30, %v2991_v21 }
 0x43b   :  { %v2856_v12 = vmul.f32 %v3285_v11, %v2855_v4 }
 0x43c   :  { %3123 = vst [vmem:[#allocation11 + $0x1f0] sm:$0xff] %v3059_v22 }
 0x43d   :  { %v2860_v55 = vsel %vm2859_vm15, %v3285_v11, %v2856_v12 }
 0x43e   :  { %v2924_v47 = vmul.f32 %v2860_v55, %v4676_v58 }
 0x440   :  { %v2992_v18 = vmul.f32 %v4720_v28, %v2924_v47 }
 0x442   :  { %v3060_v41 = vadd.f32 %v4726_v30, %v2992_v18 }
 0x444   :  { %3124 = vst [vmem:[#allocation11 + $0x1f8] sm:$0xff] %v3060_v41 }
 0x445   :  { %3137 = dma.vmem_to_hbm [thread:$0]  %s3130_s6, 8192, %s3132_s2, [#allocation5], %s3472_s13, %s3472_s13, %s3473_s14  }
 0x446   :  { %3466 = dma.done.wait [#allocation5], 8192  }
 0x447   :  { %3467 = vsyncadd [#allocation5], 4294959104 }
 0x448   :  { %3142 = vsyncpa [#allocation4], 1 }
 0x449   :  { %3143 = vsyncpa [#allocation7], 1 }
 0x44a   :  { %3144 = vsyncpa [#allocation10], 1 }
 0x44b   :  { %3145 = vsyncpa [#allocation5], 1 }

</bundles_post_ra>
